<compile_context>
chip_gen: v5e
topology: v5e:2x2
jax: 0.10.0
libtpu: 0.0.40
codegen_flags: <defaults>
</compile_context>

<pallas_src>
import jax
import jax.numpy as jnp
from jax.experimental import pallas as pl
from jax.experimental.pallas import tpu as pltpu

# ----------------------------------------------------------------------------
# Hyper-parameters (mirror SequenceTagger.__init__ defaults, shrunk for a small run)
# ----------------------------------------------------------------------------
CHAR_VOCAB = 30 + 1    # len(config.character_vocab) + 1
CHAR_DIM   = 16        # char_dim
CHAR_H     = 16        # char_lstm_dim
WORD_VOCAB = 50
WORD_DIM   = 32        # word_dim (shrunk from 300 for a small synthetic run)
GEN        = 100       # gen_layer
LSTM_H     = 32        # lstm_size
N_LABELS   = 2         # ['POSITIVE', 'NEGATIVE']

GEN_PAD    = 128       # GEN padded to a lane-dense width
NLAB_PAD   = 128       # label head padded to a lane-dense width


# ----------------------------------------------------------------------------
# Helpers
# ----------------------------------------------------------------------------
def _full_spec(shape):
    """Full-array block (block_shape == array dims) for a 1-point grid."""
    zeros = (0,) * len(shape)
    return pl.BlockSpec(shape, lambda i, _z=zeros: _z)


def _gelu(x):
    # tanh-approximation GELU: one EUP tanh instead of a long VALU polynomial chain.
    c = 0.7978845608028654  # sqrt(2/pi)
    return 0.5 * x * (1.0 + jnp.tanh(c * (x + 0.044715 * x * x * x)))


def _interleave_gates(wf, wb, H):
    """(D, 4H) fwd + (D, 4H) bwd -> (D, 8H) with columns [i_f,i_b,f_f,f_b,g_f,g_b,o_f,o_b]."""
    D = wf.shape[0]
    wf4 = wf.reshape(D, 4, 1, H)
    wb4 = wb.reshape(D, 4, 1, H)
    return jnp.concatenate([wf4, wb4], axis=2).reshape(D, 8 * H)


def fuse_bilstm_weights(p, H):
    """Build fused BiLSTM weights.

    Returns:
      w_ih_cat: (2D, 8H) — rows 0:D map x[t] onto fwd gate columns, rows D:2D map the
                time-reversed input onto bwd gate columns.
      w_hh_cat: (2H, 8H) — block-diagonal on the concatenated [h_f | h_b] state.
      b_cat:    (1, 8H)  — both direction biases, interleaved to match.
    """
    zi = jnp.zeros_like(p["w_ih_f"])
    zh = jnp.zeros_like(p["w_hh_f"])
    w_ih_cat = jnp.concatenate(
        [_interleave_gates(p["w_ih_f"], zi, H),
         _interleave_gates(zi, p["w_ih_b"], H)], axis=0)
    w_hh_cat = jnp.concatenate(
        [_interleave_gates(p["w_hh_f"], zh, H),
         _interleave_gates(zh, p["w_hh_b"], H)], axis=0)
    b_cat = _interleave_gates(p["b_f"], p["b_b"], H)
    return w_ih_cat, w_hh_cat, b_cat


def _fused_cell(g8, h, c, H2):
    """One fused (fwd+bwd) LSTM cell step. g8: (B, 8H) pre-activation gates,
    h/c: (B, 2H) concatenated [fwd | bwd] state. PyTorch gate order i,f,g,o."""
    i_g = jax.nn.sigmoid(g8[:, 0:H2])
    f_g = jax.nn.sigmoid(g8[:, H2:2 * H2])
    g_g = jnp.tanh(g8[:, 2 * H2:3 * H2])
    o_g = jax.nn.sigmoid(g8[:, 3 * H2:4 * H2])
    c_new = f_g * c + i_g * g_g
    h_new = o_g * jnp.tanh(c_new)
    return h_new, c_new


# ----------------------------------------------------------------------------
# Kernel 1: char BiLSTM (fused directions) + gen_layer Linear + GELU epilogue
# ----------------------------------------------------------------------------
def _make_char_gen_kernel(C, nw, H):
    H2 = 2 * H

    def kernel(xcat_ref, wih_ref, whh_ref, b_ref, we_ref, gww_ref, gwc_ref, gb_ref,
               o_ref, gin):
        # Hoisted input projection for both directions, bias folded in: one MXU matmul.
        # gin row block t holds [fwd gates from x[t] | bwd gates from x[C-1-t]] interleaved.
        gin[...] = (jnp.dot(xcat_ref[...], wih_ref[...],
                            preferred_element_type=jnp.float32) + b_ref[...])

        whh = whh_ref[...]                                   # (2H, 8H), hoisted load
        h = jnp.zeros((nw, H2), jnp.float32)                 # [h_fwd | h_bwd] in vregs
        c = jnp.zeros((nw, H2), jnp.float32)
        for t in range(C):                                   # fully unrolled, static slices
            g8 = (jnp.dot(h, whh, preferred_element_type=jnp.float32)
                  + gin[t * nw:(t + 1) * nw, :])
            h, c = _fused_cell(g8, h, c, H2)

        # After the loop h == [final fwd hidden | final bwd hidden] == char_repr.
        # gen_layer on concat([word_embed, char_repr]) split by input source + GELU.
        y = (jnp.dot(we_ref[...], gww_ref[...], preferred_element_type=jnp.float32)
             + jnp.dot(h, gwc_ref[...], preferred_element_type=jnp.float32)
             + gb_ref[...])
        o_ref[...] = _gelu(y)

    return kernel


def char_gen_call(xcat, wih, whh, b, word_e, gww, gwc, gb, C, nw):
    args = (xcat, wih, whh, b, word_e, gww, gwc, gb)
    grid_spec = pltpu.PrefetchScalarGridSpec(
        num_scalar_prefetch=0,
        grid=(1,),
        in_specs=[_full_spec(a.shape) for a in args],
        out_specs=_full_spec((nw, GEN_PAD)),
        scratch_shapes=[pltpu.VMEM((C * nw, 8 * CHAR_H), jnp.float32)],
    )
    return pl.pallas_call(
        _make_char_gen_kernel(C, nw, CHAR_H),
        out_shape=jax.ShapeDtypeStruct((nw, GEN_PAD), jnp.float32),
        grid_spec=grid_spec,
        compiler_params=pltpu.CompilerParams(dimension_semantics=("arbitrary",)),
    )(*args)


# ----------------------------------------------------------------------------
# Kernel 2: word BiLSTM (fused directions, batch=1) + output Linear + sigmoid epilogue
# ----------------------------------------------------------------------------
def _make_word_head_kernel(T, H):
    H2 = 2 * H

    def kernel(xcat_ref, wih_ref, whh_ref, b_ref, owf_ref, owb_ref, outb_ref,
               o_ref, gin, hf_scr, hb_scr):
        # Hoisted input projection (both directions + bias), one MXU matmul.
        gin[...] = (jnp.dot(xcat_ref[...], wih_ref[...],
                            preferred_element_type=jnp.float32) + b_ref[...])

        whh = whh_ref[...]                                   # (2H, 8H)
        h = jnp.zeros((1, H2), jnp.float32)
        c = jnp.zeros((1, H2), jnp.float32)
        for t in range(T):                                   # fully unrolled, static slices
            g8 = (jnp.dot(h, whh, preferred_element_type=jnp.float32)
                  + gin[t:t + 1, :])
            h, c = _fused_cell(g8, h, c, H2)
            hf_scr[t:t + 1, :] = h[:, :H]                    # fwd output at time t
            hb_scr[T - 1 - t:T - t, :] = h[:, H:]            # bwd output at time T-1-t

        # Output head fused into the epilogue: sigmoid(concat([hf, hb]) @ out_w + b),
        # with out_w split by rows so no in-kernel concat is needed.
        logits = (jnp.dot(hf_scr[...], owf_ref[...], preferred_element_type=jnp.float32)
                  + jnp.dot(hb_scr[...], owb_ref[...], preferred_element_type=jnp.float32)
                  + outb_ref[...])
        o_ref[...] = jax.nn.sigmoid(logits)

    return kernel


def word_head_call(xcat, wih, whh, b, owf, owb, outb, T):
    args = (xcat, wih, whh, b, owf, owb, outb)
    grid_spec = pltpu.PrefetchScalarGridSpec(
        num_scalar_prefetch=0,
        grid=(1,),
        in_specs=[_full_spec(a.shape) for a in args],
        out_specs=_full_spec((T, NLAB_PAD)),
        scratch_shapes=[pltpu.VMEM((T, 8 * LSTM_H), jnp.float32),
                        pltpu.VMEM((T, LSTM_H), jnp.float32),
                        pltpu.VMEM((T, LSTM_H), jnp.float32)],
    )
    return pl.pallas_call(
        _make_word_head_kernel(T, LSTM_H),
        out_shape=jax.ShapeDtypeStruct((T, NLAB_PAD), jnp.float32),
        grid_spec=grid_spec,
        compiler_params=pltpu.CompilerParams(dimension_semantics=("arbitrary",)),
    )(*args)


# ----------------------------------------------------------------------------
# Parameters (deterministic synthetic init — shapes follow the torch __init__)
# ----------------------------------------------------------------------------
def init_params(key):
    ks = jax.random.split(key, 18)

    def rnd(k, shape, scale=0.1):
        return jax.random.normal(k, shape, dtype=jnp.float32) * scale

    return {
        "char_embed": rnd(ks[0], (CHAR_VOCAB, CHAR_DIM), 0.5),
        "word_embed": rnd(ks[1], (WORD_VOCAB, WORD_DIM), 0.5),
        "char_lstm": dict(
            w_ih_f=rnd(ks[2], (CHAR_DIM, 4 * CHAR_H)),
            w_hh_f=rnd(ks[3], (CHAR_H, 4 * CHAR_H)),
            b_f=rnd(ks[4], (1, 4 * CHAR_H)),
            w_ih_b=rnd(ks[5], (CHAR_DIM, 4 * CHAR_H)),
            w_hh_b=rnd(ks[6], (CHAR_H, 4 * CHAR_H)),
            b_b=rnd(ks[7], (1, 4 * CHAR_H)),
        ),
        "gen_w": rnd(ks[8], (WORD_DIM + 2 * CHAR_H, GEN)),
        "gen_b": rnd(ks[9], (1, GEN)),
        "word_lstm": dict(
            w_ih_f=rnd(ks[10], (GEN, 4 * LSTM_H)),
            w_hh_f=rnd(ks[11], (LSTM_H, 4 * LSTM_H)),
            b_f=rnd(ks[12], (1, 4 * LSTM_H)),
            w_ih_b=rnd(ks[13], (GEN, 4 * LSTM_H)),
            w_hh_b=rnd(ks[14], (LSTM_H, 4 * LSTM_H)),
            b_b=rnd(ks[15], (1, 4 * LSTM_H)),
        ),
        "out_w": rnd(ks[16], (2 * LSTM_H, N_LABELS)),
        "out_b": rnd(ks[17], (1, N_LABELS)),
    }


# ----------------------------------------------------------------------------
# Forward pass (mirrors SequenceTagger.forward on tokenized/padded inputs)
# ----------------------------------------------------------------------------
def sequence_tagger_forward(word_ids, char_ids, p):
    # word_ids: (N, T) int32 word-vocab indices
    # char_ids: (N, T, C) int32 char-vocab indices (fixed char length per word)
    # TODO(synk): string->index vocab lookup and pack_padded variable-length handling
    #             have no Pallas equivalent; inputs are pre-tokenized, fixed-length.
    N, T = word_ids.shape
    C = char_ids.shape[-1]
    nw = N * T
    pad_g = GEN_PAD - GEN

    # Embedding lookups (glue gathers).
    word_e = jnp.take(p["word_embed"], word_ids.reshape(nw), axis=0)        # (nw, WORD_DIM)
    char_e = jnp.take(p["char_embed"], char_ids.reshape(nw, C), axis=0)     # (nw, C, CHAR_DIM)

    # Time-major char input with the time-reversed copy appended on the feature axis,
    # so the single fused input projection covers both directions.
    xc = jnp.transpose(char_e, (1, 0, 2))                                   # (C, nw, CHAR_DIM)
    xcat_c = jnp.concatenate([xc, xc[::-1]], axis=-1).reshape(C * nw, 2 * CHAR_DIM)

    # Fused char BiLSTM weights.
    wihc, whhc, bc = fuse_bilstm_weights(p["char_lstm"], CHAR_H)

    # gen_layer weights: split by input source (word embed rows / char repr rows),
    # padded to a lane-dense 128-wide output.
    gww = jnp.pad(p["gen_w"][:WORD_DIM], ((0, 0), (0, pad_g)))
    gwc = jnp.pad(p["gen_w"][WORD_DIM:], ((0, 0), (0, pad_g)))
    gbp = jnp.pad(p["gen_b"], ((0, 0), (0, pad_g)))

    # TODO(synk): F.dropout is active-by-default in the torch forward; implemented as
    #             identity (eval semantics).
    word_vecs_p = char_gen_call(xcat_c, wihc, whhc, bc, word_e, gww, gwc, gbp,
                                C, nw)                                       # (nw, GEN_PAD)

    # Reproduce torch's word_vecs.transpose(1,2).reshape(1,T,G) per sentence, then
    # torch.hstack along dim 1 -> a batch-1 sequence of length N*T.
    # TODO(synk): this transpose+reshape scrambles features across timesteps; it
    #             faithfully reproduces the torch forward (likely a bug upstream).
    wv = word_vecs_p[:, :GEN].reshape(N, T, GEN)
    li = jnp.transpose(wv, (0, 2, 1)).reshape(N, T, GEN).reshape(N * T, GEN)
    li = jnp.pad(li, ((0, 0), (0, pad_g)))                                   # (N*T, GEN_PAD)
    xcat_w = jnp.concatenate([li, li[::-1]], axis=-1)                        # (N*T, 2*GEN_PAD)

    # Fused word BiLSTM weights (pad the K axis of W_ih to GEN_PAD first; padded rows
    # multiply the zero-padded input features, so results are unchanged).
    wl = dict(p["word_lstm"])
    wl["w_ih_f"] = jnp.pad(wl["w_ih_f"], ((0, pad_g), (0, 0)))
    wl["w_ih_b"] = jnp.pad(wl["w_ih_b"], ((0, pad_g), (0, 0)))
    wihw, whhw, bw = fuse_bilstm_weights(wl, LSTM_H)

    # Output head, padded to 128 labels and split by rows (fwd/bwd halves).
    ow = jnp.pad(p["out_w"], ((0, 0), (0, NLAB_PAD - N_LABELS)))
    owf, owb = ow[:LSTM_H], ow[LSTM_H:]
    obp = jnp.pad(p["out_b"], ((0, 0), (0, NLAB_PAD - N_LABELS)))

    probs_p = word_head_call(xcat_w, wihw, whhw, bw, owf, owb, obp, N * T)   # (N*T, NLAB_PAD)
    return probs_p[:, :N_LABELS].reshape(1, N * T, N_LABELS)


# ----------------------------------------------------------------------------
if __name__ == "__main__":
    key = jax.random.PRNGKey(0)
    kp, kw, kc = jax.random.split(key, 3)
    params = init_params(kp)

    N, T, C = 2, 8, 6   # 2 sentences, 8 words each, 6 chars per word
    word_ids = jax.random.randint(kw, (N, T), 0, WORD_VOCAB, dtype=jnp.int32)
    char_ids = jax.random.randint(kc, (N, T, C), 0, CHAR_VOCAB, dtype=jnp.int32)

    out = jax.jit(sequence_tagger_forward)(word_ids, char_ids, params)
    out = jax.block_until_ready(out)

    assert out.shape == (1, N * T, N_LABELS), out.shape
    assert bool(jnp.all((out >= 0.0) & (out <= 1.0)))
    print("KERNEL_OK")
</pallas_src>

<mosaic_0001>
module attributes {stable_mosaic.version = 11 : i64} {
  func.func @kernel(%arg0: i32, %arg1: memref<96x32xf32, #tpu.memory_space<vmem>>, %arg2: memref<32x128xf32, #tpu.memory_space<vmem>>, %arg3: memref<32x128xf32, #tpu.memory_space<vmem>>, %arg4: memref<1x128xf32, #tpu.memory_space<vmem>>, %arg5: memref<16x32xf32, #tpu.memory_space<vmem>>, %arg6: memref<32x128xf32, #tpu.memory_space<vmem>>, %arg7: memref<32x128xf32, #tpu.memory_space<vmem>>, %arg8: memref<1x128xf32, #tpu.memory_space<vmem>>, %arg9: memref<16x128xf32, #tpu.memory_space<vmem>>, %arg10: memref<96x128xf32, #tpu.memory_space<vmem>>) attributes {dimension_semantics = [#tpu.dimension_semantics<arbitrary>], iteration_bounds = array<i64: 1>, scalar_prefetch = 0 : i64, scratch_operands = 1 : i64, tpu.core_type = #tpu.core_type<tc>, window_params = [{pipeline_mode = #tpu.pipeline_mode<synchronous>, transform_indices = @transform_0, window_bounds = array<i64: 96, 32>}, {pipeline_mode = #tpu.pipeline_mode<synchronous>, transform_indices = @transform_1, window_bounds = array<i64: 32, 128>}, {pipeline_mode = #tpu.pipeline_mode<synchronous>, transform_indices = @transform_2, window_bounds = array<i64: 32, 128>}, {pipeline_mode = #tpu.pipeline_mode<synchronous>, transform_indices = @transform_3, window_bounds = array<i64: 1, 128>}, {pipeline_mode = #tpu.pipeline_mode<synchronous>, transform_indices = @transform_4, window_bounds = array<i64: 16, 32>}, {pipeline_mode = #tpu.pipeline_mode<synchronous>, transform_indices = @transform_5, window_bounds = array<i64: 32, 128>}, {pipeline_mode = #tpu.pipeline_mode<synchronous>, transform_indices = @transform_6, window_bounds = array<i64: 32, 128>}, {pipeline_mode = #tpu.pipeline_mode<synchronous>, transform_indices = @transform_7, window_bounds = array<i64: 1, 128>}, {pipeline_mode = #tpu.pipeline_mode<synchronous>, transform_indices = @transform_8, window_bounds = array<i64: 16, 128>}]} {
    %c0 = arith.constant 0 : index
    %c0_0 = arith.constant 0 : index
    %0 = vector.load %arg1[%c0, %c0_0] : memref<96x32xf32, #tpu.memory_space<vmem>>, vector<96x32xf32>
    %c0_1 = arith.constant 0 : index
    %c0_2 = arith.constant 0 : index
    %1 = vector.load %arg2[%c0_1, %c0_2] : memref<32x128xf32, #tpu.memory_space<vmem>>, vector<32x128xf32>
    %cst = arith.constant dense<0.000000e+00> : vector<96x128xf32>
    %2 = tpu.matmul %0, %1, %cst {dimension_numbers = #tpu.dot_dimension_numbers<[1], [0], [0], [1], [0, 0, 1, 1], [], []>} : vector<96x32xf32>, vector<32x128xf32>, vector<96x128xf32> -> vector<96x128xf32>
    %c0_3 = arith.constant 0 : index
    %c0_4 = arith.constant 0 : index
    %3 = vector.load %arg4[%c0_3, %c0_4] : memref<1x128xf32, #tpu.memory_space<vmem>>, vector<1x128xf32>
    %4 = vector.broadcast %3 : vector<1x128xf32> to vector<96x128xf32>
    %5 = arith.addf %2, %4 : vector<96x128xf32>
    %c0_5 = arith.constant 0 : index
    %c0_6 = arith.constant 0 : index
    %6 = vector.load %arg10[%c0_5, %c0_6] : memref<96x128xf32, #tpu.memory_space<vmem>>, vector<96x128xf32>
    tpu.vector_store %arg10[%c0_5, %c0_6], %5 {strides = array<i32>} : memref<96x128xf32, #tpu.memory_space<vmem>>, vector<96x128xf32>,
    %c0_7 = arith.constant 0 : index
    %c0_8 = arith.constant 0 : index
    %7 = vector.load %arg3[%c0_7, %c0_8] : memref<32x128xf32, #tpu.memory_space<vmem>>, vector<32x128xf32>
    %cst_9 = arith.constant 0.000000e+00 : f32
    %8 = vector.broadcast %cst_9 : f32 to vector<16x32xf32>
    %cst_10 = arith.constant 0.000000e+00 : f32
    %9 = vector.broadcast %cst_10 : f32 to vector<16x32xf32>
    %cst_11 = arith.constant dense<0.000000e+00> : vector<16x128xf32>
    %10 = tpu.matmul %8, %7, %cst_11 {dimension_numbers = #tpu.dot_dimension_numbers<[1], [0], [0], [1], [0, 0, 1, 1], [], []>} : vector<16x32xf32>, vector<32x128xf32>, vector<16x128xf32> -> vector<16x128xf32>
    %c0_12 = arith.constant 0 : index
    %c0_13 = arith.constant 0 : index
    %11 = vector.load %arg10[%c0_12, %c0_13] : memref<96x128xf32, #tpu.memory_space<vmem>>, vector<16x128xf32>
    %12 = arith.addf %10, %11 : vector<16x128xf32>
    %13 = vector.extract_strided_slice %12 {offsets = [0, 0], sizes = [16, 32], strides = [1, 1]} : vector<16x128xf32> to vector<16x32xf32>
    %14 = arith.negf %13 : vector<16x32xf32>
    %15 = math.exp %14 : vector<16x32xf32>
    %cst_14 = arith.constant 1.000000e+00 : f32
    %16 = vector.broadcast %cst_14 : f32 to vector<16x32xf32>
    %17 = arith.addf %16, %15 : vector<16x32xf32>
    %18 = arith.divf %16, %17 : vector<16x32xf32>
    %19 = vector.extract_strided_slice %12 {offsets = [0, 32], sizes = [16, 32], strides = [1, 1]} : vector<16x128xf32> to vector<16x32xf32>
    %20 = arith.negf %19 : vector<16x32xf32>
    %21 = math.exp %20 : vector<16x32xf32>
    %cst_15 = arith.constant 1.000000e+00 : f32
    %22 = vector.broadcast %cst_15 : f32 to vector<16x32xf32>
    %23 = arith.addf %22, %21 : vector<16x32xf32>
    %24 = arith.divf %22, %23 : vector<16x32xf32>
    %25 = vector.extract_strided_slice %12 {offsets = [0, 64], sizes = [16, 32], strides = [1, 1]} : vector<16x128xf32> to vector<16x32xf32>
    %26 = math.tanh %25 : vector<16x32xf32>
    %27 = vector.extract_strided_slice %12 {offsets = [0, 96], sizes = [16, 32], strides = [1, 1]} : vector<16x128xf32> to vector<16x32xf32>
    %28 = arith.negf %27 : vector<16x32xf32>
    %29 = math.exp %28 : vector<16x32xf32>
    %cst_16 = arith.constant 1.000000e+00 : f32
    %30 = vector.broadcast %cst_16 : f32 to vector<16x32xf32>
    %31 = arith.addf %30, %29 : vector<16x32xf32>
    %32 = arith.divf %30, %31 : vector<16x32xf32>
    %33 = arith.mulf %24, %9 : vector<16x32xf32>
    %34 = arith.mulf %18, %26 : vector<16x32xf32>
    %35 = arith.addf %33, %34 : vector<16x32xf32>
    %36 = math.tanh %35 : vector<16x32xf32>
    %37 = arith.mulf %32, %36 : vector<16x32xf32>
    %cst_17 = arith.constant dense<0.000000e+00> : vector<16x128xf32>
    %38 = tpu.matmul %37, %7, %cst_17 {dimension_numbers = #tpu.dot_dimension_numbers<[1], [0], [0], [1], [0, 0, 1, 1], [], []>} : vector<16x32xf32>, vector<32x128xf32>, vector<16x128xf32> -> vector<16x128xf32>
    %c16 = arith.constant 16 : index
    %c0_18 = arith.constant 0 : index
    %39 = vector.load %arg10[%c16, %c0_18] : memref<96x128xf32, #tpu.memory_space<vmem>>, vector<16x128xf32>
    %40 = arith.addf %38, %39 : vector<16x128xf32>
    %41 = vector.extract_strided_slice %40 {offsets = [0, 0], sizes = [16, 32], strides = [1, 1]} : vector<16x128xf32> to vector<16x32xf32>
    %42 = arith.negf %41 : vector<16x32xf32>
    %43 = math.exp %42 : vector<16x32xf32>
    %cst_19 = arith.constant 1.000000e+00 : f32
    %44 = vector.broadcast %cst_19 : f32 to vector<16x32xf32>
    %45 = arith.addf %44, %43 : vector<16x32xf32>
    %46 = arith.divf %44, %45 : vector<16x32xf32>
    %47 = vector.extract_strided_slice %40 {offsets = [0, 32], sizes = [16, 32], strides = [1, 1]} : vector<16x128xf32> to vector<16x32xf32>
    %48 = arith.negf %47 : vector<16x32xf32>
    %49 = math.exp %48 : vector<16x32xf32>
    %cst_20 = arith.constant 1.000000e+00 : f32
    %50 = vector.broadcast %cst_20 : f32 to vector<16x32xf32>
    %51 = arith.addf %50, %49 : vector<16x32xf32>
    %52 = arith.divf %50, %51 : vector<16x32xf32>
    %53 = vector.extract_strided_slice %40 {offsets = [0, 64], sizes = [16, 32], strides = [1, 1]} : vector<16x128xf32> to vector<16x32xf32>
    %54 = math.tanh %53 : vector<16x32xf32>
    %55 = vector.extract_strided_slice %40 {offsets = [0, 96], sizes = [16, 32], strides = [1, 1]} : vector<16x128xf32> to vector<16x32xf32>
    %56 = arith.negf %55 : vector<16x32xf32>
    %57 = math.exp %56 : vector<16x32xf32>
    %cst_21 = arith.constant 1.000000e+00 : f32
    %58 = vector.broadcast %cst_21 : f32 to vector<16x32xf32>
    %59 = arith.addf %58, %57 : vector<16x32xf32>
    %60 = arith.divf %58, %59 : vector<16x32xf32>
    %61 = arith.mulf %52, %35 : vector<16x32xf32>
    %62 = arith.mulf %46, %54 : vector<16x32xf32>
    %63 = arith.addf %61, %62 : vector<16x32xf32>
    %64 = math.tanh %63 : vector<16x32xf32>
    %65 = arith.mulf %60, %64 : vector<16x32xf32>
    %cst_22 = arith.constant dense<0.000000e+00> : vector<16x128xf32>
    %66 = tpu.matmul %65, %7, %cst_22 {dimension_numbers = #tpu.dot_dimension_numbers<[1], [0], [0], [1], [0, 0, 1, 1], [], []>} : vector<16x32xf32>, vector<32x128xf32>, vector<16x128xf32> -> vector<16x128xf32>
    %c32 = arith.constant 32 : index
    %c0_23 = arith.constant 0 : index
    %67 = vector.load %arg10[%c32, %c0_23] : memref<96x128xf32, #tpu.memory_space<vmem>>, vector<16x128xf32>
    %68 = arith.addf %66, %67 : vector<16x128xf32>
    %69 = vector.extract_strided_slice %68 {offsets = [0, 0], sizes = [16, 32], strides = [1, 1]} : vector<16x128xf32> to vector<16x32xf32>
    %70 = arith.negf %69 : vector<16x32xf32>
    %71 = math.exp %70 : vector<16x32xf32>
    %cst_24 = arith.constant 1.000000e+00 : f32
    %72 = vector.broadcast %cst_24 : f32 to vector<16x32xf32>
    %73 = arith.addf %72, %71 : vector<16x32xf32>
    %74 = arith.divf %72, %73 : vector<16x32xf32>
    %75 = vector.extract_strided_slice %68 {offsets = [0, 32], sizes = [16, 32], strides = [1, 1]} : vector<16x128xf32> to vector<16x32xf32>
    %76 = arith.negf %75 : vector<16x32xf32>
    %77 = math.exp %76 : vector<16x32xf32>
    %cst_25 = arith.constant 1.000000e+00 : f32
    %78 = vector.broadcast %cst_25 : f32 to vector<16x32xf32>
    %79 = arith.addf %78, %77 : vector<16x32xf32>
    %80 = arith.divf %78, %79 : vector<16x32xf32>
    %81 = vector.extract_strided_slice %68 {offsets = [0, 64], sizes = [16, 32], strides = [1, 1]} : vector<16x128xf32> to vector<16x32xf32>
    %82 = math.tanh %81 : vector<16x32xf32>
    %83 = vector.extract_strided_slice %68 {offsets = [0, 96], sizes = [16, 32], strides = [1, 1]} : vector<16x128xf32> to vector<16x32xf32>
    %84 = arith.negf %83 : vector<16x32xf32>
    %85 = math.exp %84 : vector<16x32xf32>
    %cst_26 = arith.constant 1.000000e+00 : f32
    %86 = vector.broadcast %cst_26 : f32 to vector<16x32xf32>
    %87 = arith.addf %86, %85 : vector<16x32xf32>
    %88 = arith.divf %86, %87 : vector<16x32xf32>
    %89 = arith.mulf %80, %63 : vector<16x32xf32>
    %90 = arith.mulf %74, %82 : vector<16x32xf32>
    %91 = arith.addf %89, %90 : vector<16x32xf32>
    %92 = math.tanh %91 : vector<16x32xf32>
    %93 = arith.mulf %88, %92 : vector<16x32xf32>
    %cst_27 = arith.constant dense<0.000000e+00> : vector<16x128xf32>
    %94 = tpu.matmul %93, %7, %cst_27 {dimension_numbers = #tpu.dot_dimension_numbers<[1], [0], [0], [1], [0, 0, 1, 1], [], []>} : vector<16x32xf32>, vector<32x128xf32>, vector<16x128xf32> -> vector<16x128xf32>
    %c48 = arith.constant 48 : index
    %c0_28 = arith.constant 0 : index
    %95 = vector.load %arg10[%c48, %c0_28] : memref<96x128xf32, #tpu.memory_space<vmem>>, vector<16x128xf32>
    %96 = arith.addf %94, %95 : vector<16x128xf32>
    %97 = vector.extract_strided_slice %96 {offsets = [0, 0], sizes = [16, 32], strides = [1, 1]} : vector<16x128xf32> to vector<16x32xf32>
    %98 = arith.negf %97 : vector<16x32xf32>
    %99 = math.exp %98 : vector<16x32xf32>
    %cst_29 = arith.constant 1.000000e+00 : f32
    %100 = vector.broadcast %cst_29 : f32 to vector<16x32xf32>
    %101 = arith.addf %100, %99 : vector<16x32xf32>
    %102 = arith.divf %100, %101 : vector<16x32xf32>
    %103 = vector.extract_strided_slice %96 {offsets = [0, 32], sizes = [16, 32], strides = [1, 1]} : vector<16x128xf32> to vector<16x32xf32>
    %104 = arith.negf %103 : vector<16x32xf32>
    %105 = math.exp %104 : vector<16x32xf32>
    %cst_30 = arith.constant 1.000000e+00 : f32
    %106 = vector.broadcast %cst_30 : f32 to vector<16x32xf32>
    %107 = arith.addf %106, %105 : vector<16x32xf32>
    %108 = arith.divf %106, %107 : vector<16x32xf32>
    %109 = vector.extract_strided_slice %96 {offsets = [0, 64], sizes = [16, 32], strides = [1, 1]} : vector<16x128xf32> to vector<16x32xf32>
    %110 = math.tanh %109 : vector<16x32xf32>
    %111 = vector.extract_strided_slice %96 {offsets = [0, 96], sizes = [16, 32], strides = [1, 1]} : vector<16x128xf32> to vector<16x32xf32>
    %112 = arith.negf %111 : vector<16x32xf32>
    %113 = math.exp %112 : vector<16x32xf32>
    %cst_31 = arith.constant 1.000000e+00 : f32
    %114 = vector.broadcast %cst_31 : f32 to vector<16x32xf32>
    %115 = arith.addf %114, %113 : vector<16x32xf32>
    %116 = arith.divf %114, %115 : vector<16x32xf32>
    %117 = arith.mulf %108, %91 : vector<16x32xf32>
    %118 = arith.mulf %102, %110 : vector<16x32xf32>
    %119 = arith.addf %117, %118 : vector<16x32xf32>
    %120 = math.tanh %119 : vector<16x32xf32>
    %121 = arith.mulf %116, %120 : vector<16x32xf32>
    %cst_32 = arith.constant dense<0.000000e+00> : vector<16x128xf32>
    %122 = tpu.matmul %121, %7, %cst_32 {dimension_numbers = #tpu.dot_dimension_numbers<[1], [0], [0], [1], [0, 0, 1, 1], [], []>} : vector<16x32xf32>, vector<32x128xf32>, vector<16x128xf32> -> vector<16x128xf32>
    %c64 = arith.constant 64 : index
    %c0_33 = arith.constant 0 : index
    %123 = vector.load %arg10[%c64, %c0_33] : memref<96x128xf32, #tpu.memory_space<vmem>>, vector<16x128xf32>
    %124 = arith.addf %122, %123 : vector<16x128xf32>
    %125 = vector.extract_strided_slice %124 {offsets = [0, 0], sizes = [16, 32], strides = [1, 1]} : vector<16x128xf32> to vector<16x32xf32>
    %126 = arith.negf %125 : vector<16x32xf32>
    %127 = math.exp %126 : vector<16x32xf32>
    %cst_34 = arith.constant 1.000000e+00 : f32
    %128 = vector.broadcast %cst_34 : f32 to vector<16x32xf32>
    %129 = arith.addf %128, %127 : vector<16x32xf32>
    %130 = arith.divf %128, %129 : vector<16x32xf32>
    %131 = vector.extract_strided_slice %124 {offsets = [0, 32], sizes = [16, 32], strides = [1, 1]} : vector<16x128xf32> to vector<16x32xf32>
    %132 = arith.negf %131 : vector<16x32xf32>
    %133 = math.exp %132 : vector<16x32xf32>
    %cst_35 = arith.constant 1.000000e+00 : f32
    %134 = vector.broadcast %cst_35 : f32 to vector<16x32xf32>
    %135 = arith.addf %134, %133 : vector<16x32xf32>
    %136 = arith.divf %134, %135 : vector<16x32xf32>
    %137 = vector.extract_strided_slice %124 {offsets = [0, 64], sizes = [16, 32], strides = [1, 1]} : vector<16x128xf32> to vector<16x32xf32>
    %138 = math.tanh %137 : vector<16x32xf32>
    %139 = vector.extract_strided_slice %124 {offsets = [0, 96], sizes = [16, 32], strides = [1, 1]} : vector<16x128xf32> to vector<16x32xf32>
    %140 = arith.negf %139 : vector<16x32xf32>
    %141 = math.exp %140 : vector<16x32xf32>
    %cst_36 = arith.constant 1.000000e+00 : f32
    %142 = vector.broadcast %cst_36 : f32 to vector<16x32xf32>
    %143 = arith.addf %142, %141 : vector<16x32xf32>
    %144 = arith.divf %142, %143 : vector<16x32xf32>
    %145 = arith.mulf %136, %119 : vector<16x32xf32>
    %146 = arith.mulf %130, %138 : vector<16x32xf32>
    %147 = arith.addf %145, %146 : vector<16x32xf32>
    %148 = math.tanh %147 : vector<16x32xf32>
    %149 = arith.mulf %144, %148 : vector<16x32xf32>
    %cst_37 = arith.constant dense<0.000000e+00> : vector<16x128xf32>
    %150 = tpu.matmul %149, %7, %cst_37 {dimension_numbers = #tpu.dot_dimension_numbers<[1], [0], [0], [1], [0, 0, 1, 1], [], []>} : vector<16x32xf32>, vector<32x128xf32>, vector<16x128xf32> -> vector<16x128xf32>
    %c80 = arith.constant 80 : index
    %c0_38 = arith.constant 0 : index
    %151 = vector.load %arg10[%c80, %c0_38] : memref<96x128xf32, #tpu.memory_space<vmem>>, vector<16x128xf32>
    %152 = arith.addf %150, %151 : vector<16x128xf32>
    %153 = vector.extract_strided_slice %152 {offsets = [0, 0], sizes = [16, 32], strides = [1, 1]} : vector<16x128xf32> to vector<16x32xf32>
    %154 = arith.negf %153 : vector<16x32xf32>
    %155 = math.exp %154 : vector<16x32xf32>
    %cst_39 = arith.constant 1.000000e+00 : f32
    %156 = vector.broadcast %cst_39 : f32 to vector<16x32xf32>
    %157 = arith.addf %156, %155 : vector<16x32xf32>
    %158 = arith.divf %156, %157 : vector<16x32xf32>
    %159 = vector.extract_strided_slice %152 {offsets = [0, 32], sizes = [16, 32], strides = [1, 1]} : vector<16x128xf32> to vector<16x32xf32>
    %160 = arith.negf %159 : vector<16x32xf32>
    %161 = math.exp %160 : vector<16x32xf32>
    %cst_40 = arith.constant 1.000000e+00 : f32
    %162 = vector.broadcast %cst_40 : f32 to vector<16x32xf32>
    %163 = arith.addf %162, %161 : vector<16x32xf32>
    %164 = arith.divf %162, %163 : vector<16x32xf32>
    %165 = vector.extract_strided_slice %152 {offsets = [0, 64], sizes = [16, 32], strides = [1, 1]} : vector<16x128xf32> to vector<16x32xf32>
    %166 = math.tanh %165 : vector<16x32xf32>
    %167 = vector.extract_strided_slice %152 {offsets = [0, 96], sizes = [16, 32], strides = [1, 1]} : vector<16x128xf32> to vector<16x32xf32>
    %168 = arith.negf %167 : vector<16x32xf32>
    %169 = math.exp %168 : vector<16x32xf32>
    %cst_41 = arith.constant 1.000000e+00 : f32
    %170 = vector.broadcast %cst_41 : f32 to vector<16x32xf32>
    %171 = arith.addf %170, %169 : vector<16x32xf32>
    %172 = arith.divf %170, %171 : vector<16x32xf32>
    %173 = arith.mulf %164, %147 : vector<16x32xf32>
    %174 = arith.mulf %158, %166 : vector<16x32xf32>
    %175 = arith.addf %173, %174 : vector<16x32xf32>
    %176 = math.tanh %175 : vector<16x32xf32>
    %177 = arith.mulf %172, %176 : vector<16x32xf32>
    %c0_42 = arith.constant 0 : index
    %c0_43 = arith.constant 0 : index
    %178 = vector.load %arg5[%c0_42, %c0_43] : memref<16x32xf32, #tpu.memory_space<vmem>>, vector<16x32xf32>
    %c0_44 = arith.constant 0 : index
    %c0_45 = arith.constant 0 : index
    %179 = vector.load %arg6[%c0_44, %c0_45] : memref<32x128xf32, #tpu.memory_space<vmem>>, vector<32x128xf32>
    %cst_46 = arith.constant dense<0.000000e+00> : vector<16x128xf32>
    %180 = tpu.matmul %178, %179, %cst_46 {dimension_numbers = #tpu.dot_dimension_numbers<[1], [0], [0], [1], [0, 0, 1, 1], [], []>} : vector<16x32xf32>, vector<32x128xf32>, vector<16x128xf32> -> vector<16x128xf32>
    %c0_47 = arith.constant 0 : index
    %c0_48 = arith.constant 0 : index
    %181 = vector.load %arg7[%c0_47, %c0_48] : memref<32x128xf32, #tpu.memory_space<vmem>>, vector<32x128xf32>
    %cst_49 = arith.constant dense<0.000000e+00> : vector<16x128xf32>
    %182 = tpu.matmul %177, %181, %cst_49 {dimension_numbers = #tpu.dot_dimension_numbers<[1], [0], [0], [1], [0, 0, 1, 1], [], []>} : vector<16x32xf32>, vector<32x128xf32>, vector<16x128xf32> -> vector<16x128xf32>
    %183 = arith.addf %180, %182 : vector<16x128xf32>
    %c0_50 = arith.constant 0 : index
    %c0_51 = arith.constant 0 : index
    %184 = vector.load %arg8[%c0_50, %c0_51] : memref<1x128xf32, #tpu.memory_space<vmem>>, vector<1x128xf32>
    %185 = vector.broadcast %184 : vector<1x128xf32> to vector<16x128xf32>
    %186 = arith.addf %183, %185 : vector<16x128xf32>
    %cst_52 = arith.constant 5.000000e-01 : f32
    %187 = vector.broadcast %cst_52 : f32 to vector<16x128xf32>
    %188 = arith.mulf %187, %186 : vector<16x128xf32>
    %cst_53 = arith.constant 4.471500e-02 : f32
    %189 = vector.broadcast %cst_53 : f32 to vector<16x128xf32>
    %190 = arith.mulf %189, %186 : vector<16x128xf32>
    %191 = arith.mulf %190, %186 : vector<16x128xf32>
    %192 = arith.mulf %191, %186 : vector<16x128xf32>
    %193 = arith.addf %186, %192 : vector<16x128xf32>
    %cst_54 = arith.constant 0.797884583 : f32
    %194 = vector.broadcast %cst_54 : f32 to vector<16x128xf32>
    %195 = arith.mulf %194, %193 : vector<16x128xf32>
    %196 = math.tanh %195 : vector<16x128xf32>
    %cst_55 = arith.constant 1.000000e+00 : f32
    %197 = vector.broadcast %cst_55 : f32 to vector<16x128xf32>
    %198 = arith.addf %197, %196 : vector<16x128xf32>
    %199 = arith.mulf %188, %198 : vector<16x128xf32>
    %c0_56 = arith.constant 0 : index
    %c0_57 = arith.constant 0 : index
    %200 = vector.load %arg9[%c0_56, %c0_57] : memref<16x128xf32, #tpu.memory_space<vmem>>, vector<16x128xf32>
    tpu.vector_store %arg9[%c0_56, %c0_57], %199 {strides = array<i32>} : memref<16x128xf32, #tpu.memory_space<vmem>>, vector<16x128xf32>,
    return
  }
  func.func @transform_0(%arg0: i32) -> (i32, i32) {
    %c0_i32 = arith.constant 0 : i32
    %c0_i32_0 = arith.constant 0 : i32
    %c0_i32_1 = arith.constant 0 : i32
    return %c0_i32, %c0_i32_0 : i32, i32
  }
  func.func @transform_1(%arg0: i32) -> (i32, i32) {
    %c0_i32 = arith.constant 0 : i32
    %c0_i32_0 = arith.constant 0 : i32
    %c0_i32_1 = arith.constant 0 : i32
    return %c0_i32, %c0_i32_0 : i32, i32
  }
  func.func @transform_2(%arg0: i32) -> (i32, i32) {
    %c0_i32 = arith.constant 0 : i32
    %c0_i32_0 = arith.constant 0 : i32
    %c0_i32_1 = arith.constant 0 : i32
    return %c0_i32, %c0_i32_0 : i32, i32
  }
  func.func @transform_3(%arg0: i32) -> (i32, i32) {
    %c0_i32 = arith.constant 0 : i32
    %c0_i32_0 = arith.constant 0 : i32
    %c0_i32_1 = arith.constant 0 : i32
    return %c0_i32, %c0_i32_0 : i32, i32
  }
  func.func @transform_4(%arg0: i32) -> (i32, i32) {
    %c0_i32 = arith.constant 0 : i32
    %c0_i32_0 = arith.constant 0 : i32
    %c0_i32_1 = arith.constant 0 : i32
    return %c0_i32, %c0_i32_0 : i32, i32
  }
  func.func @transform_5(%arg0: i32) -> (i32, i32) {
    %c0_i32 = arith.constant 0 : i32
    %c0_i32_0 = arith.constant 0 : i32
    %c0_i32_1 = arith.constant 0 : i32
    return %c0_i32, %c0_i32_0 : i32, i32
  }
  func.func @transform_6(%arg0: i32) -> (i32, i32) {
    %c0_i32 = arith.constant 0 : i32
    %c0_i32_0 = arith.constant 0 : i32
    %c0_i32_1 = arith.constant 0 : i32
    return %c0_i32, %c0_i32_0 : i32, i32
  }
  func.func @transform_7(%arg0: i32) -> (i32, i32) {
    %c0_i32 = arith.constant 0 : i32
    %c0_i32_0 = arith.constant 0 : i32
    %c0_i32_1 = arith.constant 0 : i32
    return %c0_i32, %c0_i32_0 : i32, i32
  }
  func.func @transform_8(%arg0: i32) -> (i32, i32) {
    %c0_i32 = arith.constant 0 : i32
    %c0_i32_0 = arith.constant 0 : i32
    %c0_i32_1 = arith.constant 0 : i32
    return %c0_i32, %c0_i32_0 : i32, i32
  }
}

module attributes {stable_mosaic.version = 11 : i64} {
  func.func @kernel(%arg0: i32, %arg1: memref<16x256xf32, #tpu.memory_space<vmem>>, %arg2: memref<256x256xf32, #tpu.memory_space<vmem>>, %arg3: memref<64x256xf32, #tpu.memory_space<vmem>>, %arg4: memref<1x256xf32, #tpu.memory_space<vmem>>, %arg5: memref<32x128xf32, #tpu.memory_space<vmem>>, %arg6: memref<32x128xf32, #tpu.memory_space<vmem>>, %arg7: memref<1x128xf32, #tpu.memory_space<vmem>>, %arg8: memref<16x128xf32, #tpu.memory_space<vmem>>, %arg9: memref<16x256xf32, #tpu.memory_space<vmem>>, %arg10: memref<16x32xf32, #tpu.memory_space<vmem>>, %arg11: memref<16x32xf32, #tpu.memory_space<vmem>>) attributes {dimension_semantics = [#tpu.dimension_semantics<arbitrary>], iteration_bounds = array<i64: 1>, scalar_prefetch = 0 : i64, scratch_operands = 3 : i64, tpu.core_type = #tpu.core_type<tc>, window_params = [{pipeline_mode = #tpu.pipeline_mode<synchronous>, transform_indices = @transform_0, window_bounds = array<i64: 16, 256>}, {pipeline_mode = #tpu.pipeline_mode<synchronous>, transform_indices = @transform_1, window_bounds = array<i64: 256, 256>}, {pipeline_mode = #tpu.pipeline_mode<synchronous>, transform_indices = @transform_2, window_bounds = array<i64: 64, 256>}, {pipeline_mode = #tpu.pipeline_mode<synchronous>, transform_indices = @transform_3, window_bounds = array<i64: 1, 256>}, {pipeline_mode = #tpu.pipeline_mode<synchronous>, transform_indices = @transform_4, window_bounds = array<i64: 32, 128>}, {pipeline_mode = #tpu.pipeline_mode<synchronous>, transform_indices = @transform_5, window_bounds = array<i64: 32, 128>}, {pipeline_mode = #tpu.pipeline_mode<synchronous>, transform_indices = @transform_6, window_bounds = array<i64: 1, 128>}, {pipeline_mode = #tpu.pipeline_mode<synchronous>, transform_indices = @transform_7, window_bounds = array<i64: 16, 128>}]} {
    %c0 = arith.constant 0 : index
    %c0_0 = arith.constant 0 : index
    %0 = vector.load %arg1[%c0, %c0_0] : memref<16x256xf32, #tpu.memory_space<vmem>>, vector<16x256xf32>
    %c0_1 = arith.constant 0 : index
    %c0_2 = arith.constant 0 : index
    %1 = vector.load %arg2[%c0_1, %c0_2] : memref<256x256xf32, #tpu.memory_space<vmem>>, vector<256x256xf32>
    %cst = arith.constant dense<0.000000e+00> : vector<16x256xf32>
    %2 = tpu.matmul %0, %1, %cst {dimension_numbers = #tpu.dot_dimension_numbers<[1], [0], [0], [1], [0, 0, 1, 1], [], []>} : vector<16x256xf32>, vector<256x256xf32>, vector<16x256xf32> -> vector<16x256xf32>
    %c0_3 = arith.constant 0 : index
    %c0_4 = arith.constant 0 : index
    %3 = vector.load %arg4[%c0_3, %c0_4] : memref<1x256xf32, #tpu.memory_space<vmem>>, vector<1x256xf32>
    %4 = vector.broadcast %3 : vector<1x256xf32> to vector<16x256xf32>
    %5 = arith.addf %2, %4 : vector<16x256xf32>
    %c0_5 = arith.constant 0 : index
    %c0_6 = arith.constant 0 : index
    %6 = vector.load %arg9[%c0_5, %c0_6] : memref<16x256xf32, #tpu.memory_space<vmem>>, vector<16x256xf32>
    tpu.vector_store %arg9[%c0_5, %c0_6], %5 {strides = array<i32>} : memref<16x256xf32, #tpu.memory_space<vmem>>, vector<16x256xf32>,
    %c0_7 = arith.constant 0 : index
    %c0_8 = arith.constant 0 : index
    %7 = vector.load %arg3[%c0_7, %c0_8] : memref<64x256xf32, #tpu.memory_space<vmem>>, vector<64x256xf32>
    %cst_9 = arith.constant 0.000000e+00 : f32
    %8 = vector.broadcast %cst_9 : f32 to vector<1x64xf32>
    %cst_10 = arith.constant 0.000000e+00 : f32
    %9 = vector.broadcast %cst_10 : f32 to vector<1x64xf32>
    %cst_11 = arith.constant dense<0.000000e+00> : vector<1x256xf32>
    %10 = tpu.matmul %8, %7, %cst_11 {dimension_numbers = #tpu.dot_dimension_numbers<[1], [0], [0], [1], [0, 0, 1, 1], [], []>} : vector<1x64xf32>, vector<64x256xf32>, vector<1x256xf32> -> vector<1x256xf32>
    %c0_12 = arith.constant 0 : index
    %c0_13 = arith.constant 0 : index
    %11 = vector.load %arg9[%c0_12, %c0_13] : memref<16x256xf32, #tpu.memory_space<vmem>>, vector<1x256xf32>
    %12 = arith.addf %10, %11 : vector<1x256xf32>
    %13 = vector.extract_strided_slice %12 {offsets = [0, 0], sizes = [1, 64], strides = [1, 1]} : vector<1x256xf32> to vector<1x64xf32>
    %14 = arith.negf %13 : vector<1x64xf32>
    %15 = math.exp %14 : vector<1x64xf32>
    %cst_14 = arith.constant 1.000000e+00 : f32
    %16 = vector.broadcast %cst_14 : f32 to vector<1x64xf32>
    %17 = arith.addf %16, %15 : vector<1x64xf32>
    %18 = arith.divf %16, %17 : vector<1x64xf32>
    %19 = vector.extract_strided_slice %12 {offsets = [0, 64], sizes = [1, 64], strides = [1, 1]} : vector<1x256xf32> to vector<1x64xf32>
    %20 = arith.negf %19 : vector<1x64xf32>
    %21 = math.exp %20 : vector<1x64xf32>
    %cst_15 = arith.constant 1.000000e+00 : f32
    %22 = vector.broadcast %cst_15 : f32 to vector<1x64xf32>
    %23 = arith.addf %22, %21 : vector<1x64xf32>
    %24 = arith.divf %22, %23 : vector<1x64xf32>
    %25 = vector.extract_strided_slice %12 {offsets = [0, 128], sizes = [1, 64], strides = [1, 1]} : vector<1x256xf32> to vector<1x64xf32>
    %26 = math.tanh %25 : vector<1x64xf32>
    %27 = vector.extract_strided_slice %12 {offsets = [0, 192], sizes = [1, 64], strides = [1, 1]} : vector<1x256xf32> to vector<1x64xf32>
    %28 = arith.negf %27 : vector<1x64xf32>
    %29 = math.exp %28 : vector<1x64xf32>
    %cst_16 = arith.constant 1.000000e+00 : f32
    %30 = vector.broadcast %cst_16 : f32 to vector<1x64xf32>
    %31 = arith.addf %30, %29 : vector<1x64xf32>
    %32 = arith.divf %30, %31 : vector<1x64xf32>
    %33 = arith.mulf %24, %9 : vector<1x64xf32>
    %34 = arith.mulf %18, %26 : vector<1x64xf32>
    %35 = arith.addf %33, %34 : vector<1x64xf32>
    %36 = math.tanh %35 : vector<1x64xf32>
    %37 = arith.mulf %32, %36 : vector<1x64xf32>
    %38 = vector.extract_strided_slice %37 {offsets = [0, 0], sizes = [1, 32], strides = [1, 1]} : vector<1x64xf32> to vector<1x32xf32>
    %c0_17 = arith.constant 0 : index
    %c0_18 = arith.constant 0 : index
    %39 = vector.load %arg10[%c0_17, %c0_18] : memref<16x32xf32, #tpu.memory_space<vmem>>, vector<1x32xf32>
    tpu.vector_store %arg10[%c0_17, %c0_18], %38 {strides = array<i32>} : memref<16x32xf32, #tpu.memory_space<vmem>>, vector<1x32xf32>,
    %40 = vector.extract_strided_slice %37 {offsets = [0, 32], sizes = [1, 32], strides = [1, 1]} : vector<1x64xf32> to vector<1x32xf32>
    %c15 = arith.constant 15 : index
    %c0_19 = arith.constant 0 : index
    %41 = vector.load %arg11[%c15, %c0_19] : memref<16x32xf32, #tpu.memory_space<vmem>>, vector<1x32xf32>
    tpu.vector_store %arg11[%c15, %c0_19], %40 {strides = array<i32>} : memref<16x32xf32, #tpu.memory_space<vmem>>, vector<1x32xf32>,
    %cst_20 = arith.constant dense<0.000000e+00> : vector<1x256xf32>
    %42 = tpu.matmul %37, %7, %cst_20 {dimension_numbers = #tpu.dot_dimension_numbers<[1], [0], [0], [1], [0, 0, 1, 1], [], []>} : vector<1x64xf32>, vector<64x256xf32>, vector<1x256xf32> -> vector<1x256xf32>
    %c1 = arith.constant 1 : index
    %c0_21 = arith.constant 0 : index
    %43 = vector.load %arg9[%c1, %c0_21] : memref<16x256xf32, #tpu.memory_space<vmem>>, vector<1x256xf32>
    %44 = arith.addf %42, %43 : vector<1x256xf32>
    %45 = vector.extract_strided_slice %44 {offsets = [0, 0], sizes = [1, 64], strides = [1, 1]} : vector<1x256xf32> to vector<1x64xf32>
    %46 = arith.negf %45 : vector<1x64xf32>
    %47 = math.exp %46 : vector<1x64xf32>
    %cst_22 = arith.constant 1.000000e+00 : f32
    %48 = vector.broadcast %cst_22 : f32 to vector<1x64xf32>
    %49 = arith.addf %48, %47 : vector<1x64xf32>
    %50 = arith.divf %48, %49 : vector<1x64xf32>
    %51 = vector.extract_strided_slice %44 {offsets = [0, 64], sizes = [1, 64], strides = [1, 1]} : vector<1x256xf32> to vector<1x64xf32>
    %52 = arith.negf %51 : vector<1x64xf32>
    %53 = math.exp %52 : vector<1x64xf32>
    %cst_23 = arith.constant 1.000000e+00 : f32
    %54 = vector.broadcast %cst_23 : f32 to vector<1x64xf32>
    %55 = arith.addf %54, %53 : vector<1x64xf32>
    %56 = arith.divf %54, %55 : vector<1x64xf32>
    %57 = vector.extract_strided_slice %44 {offsets = [0, 128], sizes = [1, 64], strides = [1, 1]} : vector<1x256xf32> to vector<1x64xf32>
    %58 = math.tanh %57 : vector<1x64xf32>
    %59 = vector.extract_strided_slice %44 {offsets = [0, 192], sizes = [1, 64], strides = [1, 1]} : vector<1x256xf32> to vector<1x64xf32>
    %60 = arith.negf %59 : vector<1x64xf32>
    %61 = math.exp %60 : vector<1x64xf32>
    %cst_24 = arith.constant 1.000000e+00 : f32
    %62 = vector.broadcast %cst_24 : f32 to vector<1x64xf32>
    %63 = arith.addf %62, %61 : vector<1x64xf32>
    %64 = arith.divf %62, %63 : vector<1x64xf32>
    %65 = arith.mulf %56, %35 : vector<1x64xf32>
    %66 = arith.mulf %50, %58 : vector<1x64xf32>
    %67 = arith.addf %65, %66 : vector<1x64xf32>
    %68 = math.tanh %67 : vector<1x64xf32>
    %69 = arith.mulf %64, %68 : vector<1x64xf32>
    %70 = vector.extract_strided_slice %69 {offsets = [0, 0], sizes = [1, 32], strides = [1, 1]} : vector<1x64xf32> to vector<1x32xf32>
    %c1_25 = arith.constant 1 : index
    %c0_26 = arith.constant 0 : index
    %71 = vector.load %arg10[%c1_25, %c0_26] : memref<16x32xf32, #tpu.memory_space<vmem>>, vector<1x32xf32>
    tpu.vector_store %arg10[%c1_25, %c0_26], %70 {strides = array<i32>} : memref<16x32xf32, #tpu.memory_space<vmem>>, vector<1x32xf32>,
    %72 = vector.extract_strided_slice %69 {offsets = [0, 32], sizes = [1, 32], strides = [1, 1]} : vector<1x64xf32> to vector<1x32xf32>
    %c14 = arith.constant 14 : index
    %c0_27 = arith.constant 0 : index
    %73 = vector.load %arg11[%c14, %c0_27] : memref<16x32xf32, #tpu.memory_space<vmem>>, vector<1x32xf32>
    tpu.vector_store %arg11[%c14, %c0_27], %72 {strides = array<i32>} : memref<16x32xf32, #tpu.memory_space<vmem>>, vector<1x32xf32>,
    %cst_28 = arith.constant dense<0.000000e+00> : vector<1x256xf32>
    %74 = tpu.matmul %69, %7, %cst_28 {dimension_numbers = #tpu.dot_dimension_numbers<[1], [0], [0], [1], [0, 0, 1, 1], [], []>} : vector<1x64xf32>, vector<64x256xf32>, vector<1x256xf32> -> vector<1x256xf32>
    %c2 = arith.constant 2 : index
    %c0_29 = arith.constant 0 : index
    %75 = vector.load %arg9[%c2, %c0_29] : memref<16x256xf32, #tpu.memory_space<vmem>>, vector<1x256xf32>
    %76 = arith.addf %74, %75 : vector<1x256xf32>
    %77 = vector.extract_strided_slice %76 {offsets = [0, 0], sizes = [1, 64], strides = [1, 1]} : vector<1x256xf32> to vector<1x64xf32>
    %78 = arith.negf %77 : vector<1x64xf32>
    %79 = math.exp %78 : vector<1x64xf32>
    %cst_30 = arith.constant 1.000000e+00 : f32
    %80 = vector.broadcast %cst_30 : f32 to vector<1x64xf32>
    %81 = arith.addf %80, %79 : vector<1x64xf32>
    %82 = arith.divf %80, %81 : vector<1x64xf32>
    %83 = vector.extract_strided_slice %76 {offsets = [0, 64], sizes = [1, 64], strides = [1, 1]} : vector<1x256xf32> to vector<1x64xf32>
    %84 = arith.negf %83 : vector<1x64xf32>
    %85 = math.exp %84 : vector<1x64xf32>
    %cst_31 = arith.constant 1.000000e+00 : f32
    %86 = vector.broadcast %cst_31 : f32 to vector<1x64xf32>
    %87 = arith.addf %86, %85 : vector<1x64xf32>
    %88 = arith.divf %86, %87 : vector<1x64xf32>
    %89 = vector.extract_strided_slice %76 {offsets = [0, 128], sizes = [1, 64], strides = [1, 1]} : vector<1x256xf32> to vector<1x64xf32>
    %90 = math.tanh %89 : vector<1x64xf32>
    %91 = vector.extract_strided_slice %76 {offsets = [0, 192], sizes = [1, 64], strides = [1, 1]} : vector<1x256xf32> to vector<1x64xf32>
    %92 = arith.negf %91 : vector<1x64xf32>
    %93 = math.exp %92 : vector<1x64xf32>
    %cst_32 = arith.constant 1.000000e+00 : f32
    %94 = vector.broadcast %cst_32 : f32 to vector<1x64xf32>
    %95 = arith.addf %94, %93 : vector<1x64xf32>
    %96 = arith.divf %94, %95 : vector<1x64xf32>
    %97 = arith.mulf %88, %67 : vector<1x64xf32>
    %98 = arith.mulf %82, %90 : vector<1x64xf32>
    %99 = arith.addf %97, %98 : vector<1x64xf32>
    %100 = math.tanh %99 : vector<1x64xf32>
    %101 = arith.mulf %96, %100 : vector<1x64xf32>
    %102 = vector.extract_strided_slice %101 {offsets = [0, 0], sizes = [1, 32], strides = [1, 1]} : vector<1x64xf32> to vector<1x32xf32>
    %c2_33 = arith.constant 2 : index
    %c0_34 = arith.constant 0 : index
    %103 = vector.load %arg10[%c2_33, %c0_34] : memref<16x32xf32, #tpu.memory_space<vmem>>, vector<1x32xf32>
    tpu.vector_store %arg10[%c2_33, %c0_34], %102 {strides = array<i32>} : memref<16x32xf32, #tpu.memory_space<vmem>>, vector<1x32xf32>,
    %104 = vector.extract_strided_slice %101 {offsets = [0, 32], sizes = [1, 32], strides = [1, 1]} : vector<1x64xf32> to vector<1x32xf32>
    %c13 = arith.constant 13 : index
    %c0_35 = arith.constant 0 : index
    %105 = vector.load %arg11[%c13, %c0_35] : memref<16x32xf32, #tpu.memory_space<vmem>>, vector<1x32xf32>
    tpu.vector_store %arg11[%c13, %c0_35], %104 {strides = array<i32>} : memref<16x32xf32, #tpu.memory_space<vmem>>, vector<1x32xf32>,
    %cst_36 = arith.constant dense<0.000000e+00> : vector<1x256xf32>
    %106 = tpu.matmul %101, %7, %cst_36 {dimension_numbers = #tpu.dot_dimension_numbers<[1], [0], [0], [1], [0, 0, 1, 1], [], []>} : vector<1x64xf32>, vector<64x256xf32>, vector<1x256xf32> -> vector<1x256xf32>
    %c3 = arith.constant 3 : index
    %c0_37 = arith.constant 0 : index
    %107 = vector.load %arg9[%c3, %c0_37] : memref<16x256xf32, #tpu.memory_space<vmem>>, vector<1x256xf32>
    %108 = arith.addf %106, %107 : vector<1x256xf32>
    %109 = vector.extract_strided_slice %108 {offsets = [0, 0], sizes = [1, 64], strides = [1, 1]} : vector<1x256xf32> to vector<1x64xf32>
    %110 = arith.negf %109 : vector<1x64xf32>
    %111 = math.exp %110 : vector<1x64xf32>
    %cst_38 = arith.constant 1.000000e+00 : f32
    %112 = vector.broadcast %cst_38 : f32 to vector<1x64xf32>
    %113 = arith.addf %112, %111 : vector<1x64xf32>
    %114 = arith.divf %112, %113 : vector<1x64xf32>
    %115 = vector.extract_strided_slice %108 {offsets = [0, 64], sizes = [1, 64], strides = [1, 1]} : vector<1x256xf32> to vector<1x64xf32>
    %116 = arith.negf %115 : vector<1x64xf32>
    %117 = math.exp %116 : vector<1x64xf32>
    %cst_39 = arith.constant 1.000000e+00 : f32
    %118 = vector.broadcast %cst_39 : f32 to vector<1x64xf32>
    %119 = arith.addf %118, %117 : vector<1x64xf32>
    %120 = arith.divf %118, %119 : vector<1x64xf32>
    %121 = vector.extract_strided_slice %108 {offsets = [0, 128], sizes = [1, 64], strides = [1, 1]} : vector<1x256xf32> to vector<1x64xf32>
    %122 = math.tanh %121 : vector<1x64xf32>
    %123 = vector.extract_strided_slice %108 {offsets = [0, 192], sizes = [1, 64], strides = [1, 1]} : vector<1x256xf32> to vector<1x64xf32>
    %124 = arith.negf %123 : vector<1x64xf32>
    %125 = math.exp %124 : vector<1x64xf32>
    %cst_40 = arith.constant 1.000000e+00 : f32
    %126 = vector.broadcast %cst_40 : f32 to vector<1x64xf32>
    %127 = arith.addf %126, %125 : vector<1x64xf32>
    %128 = arith.divf %126, %127 : vector<1x64xf32>
    %129 = arith.mulf %120, %99 : vector<1x64xf32>
    %130 = arith.mulf %114, %122 : vector<1x64xf32>
    %131 = arith.addf %129, %130 : vector<1x64xf32>
    %132 = math.tanh %131 : vector<1x64xf32>
    %133 = arith.mulf %128, %132 : vector<1x64xf32>
    %134 = vector.extract_strided_slice %133 {offsets = [0, 0], sizes = [1, 32], strides = [1, 1]} : vector<1x64xf32> to vector<1x32xf32>
    %c3_41 = arith.constant 3 : index
    %c0_42 = arith.constant 0 : index
    %135 = vector.load %arg10[%c3_41, %c0_42] : memref<16x32xf32, #tpu.memory_space<vmem>>, vector<1x32xf32>
    tpu.vector_store %arg10[%c3_41, %c0_42], %134 {strides = array<i32>} : memref<16x32xf32, #tpu.memory_space<vmem>>, vector<1x32xf32>,
    %136 = vector.extract_strided_slice %133 {offsets = [0, 32], sizes = [1, 32], strides = [1, 1]} : vector<1x64xf32> to vector<1x32xf32>
    %c12 = arith.constant 12 : index
    %c0_43 = arith.constant 0 : index
    %137 = vector.load %arg11[%c12, %c0_43] : memref<16x32xf32, #tpu.memory_space<vmem>>, vector<1x32xf32>
    tpu.vector_store %arg11[%c12, %c0_43], %136 {strides = array<i32>} : memref<16x32xf32, #tpu.memory_space<vmem>>, vector<1x32xf32>,
    %cst_44 = arith.constant dense<0.000000e+00> : vector<1x256xf32>
    %138 = tpu.matmul %133, %7, %cst_44 {dimension_numbers = #tpu.dot_dimension_numbers<[1], [0], [0], [1], [0, 0, 1, 1], [], []>} : vector<1x64xf32>, vector<64x256xf32>, vector<1x256xf32> -> vector<1x256xf32>
    %c4 = arith.constant 4 : index
    %c0_45 = arith.constant 0 : index
    %139 = vector.load %arg9[%c4, %c0_45] : memref<16x256xf32, #tpu.memory_space<vmem>>, vector<1x256xf32>
    %140 = arith.addf %138, %139 : vector<1x256xf32>
    %141 = vector.extract_strided_slice %140 {offsets = [0, 0], sizes = [1, 64], strides = [1, 1]} : vector<1x256xf32> to vector<1x64xf32>
    %142 = arith.negf %141 : vector<1x64xf32>
    %143 = math.exp %142 : vector<1x64xf32>
    %cst_46 = arith.constant 1.000000e+00 : f32
    %144 = vector.broadcast %cst_46 : f32 to vector<1x64xf32>
    %145 = arith.addf %144, %143 : vector<1x64xf32>
    %146 = arith.divf %144, %145 : vector<1x64xf32>
    %147 = vector.extract_strided_slice %140 {offsets = [0, 64], sizes = [1, 64], strides = [1, 1]} : vector<1x256xf32> to vector<1x64xf32>
    %148 = arith.negf %147 : vector<1x64xf32>
    %149 = math.exp %148 : vector<1x64xf32>
    %cst_47 = arith.constant 1.000000e+00 : f32
    %150 = vector.broadcast %cst_47 : f32 to vector<1x64xf32>
    %151 = arith.addf %150, %149 : vector<1x64xf32>
    %152 = arith.divf %150, %151 : vector<1x64xf32>
    %153 = vector.extract_strided_slice %140 {offsets = [0, 128], sizes = [1, 64], strides = [1, 1]} : vector<1x256xf32> to vector<1x64xf32>
    %154 = math.tanh %153 : vector<1x64xf32>
    %155 = vector.extract_strided_slice %140 {offsets = [0, 192], sizes = [1, 64], strides = [1, 1]} : vector<1x256xf32> to vector<1x64xf32>
    %156 = arith.negf %155 : vector<1x64xf32>
    %157 = math.exp %156 : vector<1x64xf32>
    %cst_48 = arith.constant 1.000000e+00 : f32
    %158 = vector.broadcast %cst_48 : f32 to vector<1x64xf32>
    %159 = arith.addf %158, %157 : vector<1x64xf32>
    %160 = arith.divf %158, %159 : vector<1x64xf32>
    %161 = arith.mulf %152, %131 : vector<1x64xf32>
    %162 = arith.mulf %146, %154 : vector<1x64xf32>
    %163 = arith.addf %161, %162 : vector<1x64xf32>
    %164 = math.tanh %163 : vector<1x64xf32>
    %165 = arith.mulf %160, %164 : vector<1x64xf32>
    %166 = vector.extract_strided_slice %165 {offsets = [0, 0], sizes = [1, 32], strides = [1, 1]} : vector<1x64xf32> to vector<1x32xf32>
    %c4_49 = arith.constant 4 : index
    %c0_50 = arith.constant 0 : index
    %167 = vector.load %arg10[%c4_49, %c0_50] : memref<16x32xf32, #tpu.memory_space<vmem>>, vector<1x32xf32>
    tpu.vector_store %arg10[%c4_49, %c0_50], %166 {strides = array<i32>} : memref<16x32xf32, #tpu.memory_space<vmem>>, vector<1x32xf32>,
    %168 = vector.extract_strided_slice %165 {offsets = [0, 32], sizes = [1, 32], strides = [1, 1]} : vector<1x64xf32> to vector<1x32xf32>
    %c11 = arith.constant 11 : index
    %c0_51 = arith.constant 0 : index
    %169 = vector.load %arg11[%c11, %c0_51] : memref<16x32xf32, #tpu.memory_space<vmem>>, vector<1x32xf32>
    tpu.vector_store %arg11[%c11, %c0_51], %168 {strides = array<i32>} : memref<16x32xf32, #tpu.memory_space<vmem>>, vector<1x32xf32>,
    %cst_52 = arith.constant dense<0.000000e+00> : vector<1x256xf32>
    %170 = tpu.matmul %165, %7, %cst_52 {dimension_numbers = #tpu.dot_dimension_numbers<[1], [0], [0], [1], [0, 0, 1, 1], [], []>} : vector<1x64xf32>, vector<64x256xf32>, vector<1x256xf32> -> vector<1x256xf32>
    %c5 = arith.constant 5 : index
    %c0_53 = arith.constant 0 : index
    %171 = vector.load %arg9[%c5, %c0_53] : memref<16x256xf32, #tpu.memory_space<vmem>>, vector<1x256xf32>
    %172 = arith.addf %170, %171 : vector<1x256xf32>
    %173 = vector.extract_strided_slice %172 {offsets = [0, 0], sizes = [1, 64], strides = [1, 1]} : vector<1x256xf32> to vector<1x64xf32>
    %174 = arith.negf %173 : vector<1x64xf32>
    %175 = math.exp %174 : vector<1x64xf32>
    %cst_54 = arith.constant 1.000000e+00 : f32
    %176 = vector.broadcast %cst_54 : f32 to vector<1x64xf32>
    %177 = arith.addf %176, %175 : vector<1x64xf32>
    %178 = arith.divf %176, %177 : vector<1x64xf32>
    %179 = vector.extract_strided_slice %172 {offsets = [0, 64], sizes = [1, 64], strides = [1, 1]} : vector<1x256xf32> to vector<1x64xf32>
    %180 = arith.negf %179 : vector<1x64xf32>
    %181 = math.exp %180 : vector<1x64xf32>
    %cst_55 = arith.constant 1.000000e+00 : f32
    %182 = vector.broadcast %cst_55 : f32 to vector<1x64xf32>
    %183 = arith.addf %182, %181 : vector<1x64xf32>
    %184 = arith.divf %182, %183 : vector<1x64xf32>
    %185 = vector.extract_strided_slice %172 {offsets = [0, 128], sizes = [1, 64], strides = [1, 1]} : vector<1x256xf32> to vector<1x64xf32>
    %186 = math.tanh %185 : vector<1x64xf32>
    %187 = vector.extract_strided_slice %172 {offsets = [0, 192], sizes = [1, 64], strides = [1, 1]} : vector<1x256xf32> to vector<1x64xf32>
    %188 = arith.negf %187 : vector<1x64xf32>
    %189 = math.exp %188 : vector<1x64xf32>
    %cst_56 = arith.constant 1.000000e+00 : f32
    %190 = vector.broadcast %cst_56 : f32 to vector<1x64xf32>
    %191 = arith.addf %190, %189 : vector<1x64xf32>
    %192 = arith.divf %190, %191 : vector<1x64xf32>
    %193 = arith.mulf %184, %163 : vector<1x64xf32>
    %194 = arith.mulf %178, %186 : vector<1x64xf32>
    %195 = arith.addf %193, %194 : vector<1x64xf32>
    %196 = math.tanh %195 : vector<1x64xf32>
    %197 = arith.mulf %192, %196 : vector<1x64xf32>
    %198 = vector.extract_strided_slice %197 {offsets = [0, 0], sizes = [1, 32], strides = [1, 1]} : vector<1x64xf32> to vector<1x32xf32>
    %c5_57 = arith.constant 5 : index
    %c0_58 = arith.constant 0 : index
    %199 = vector.load %arg10[%c5_57, %c0_58] : memref<16x32xf32, #tpu.memory_space<vmem>>, vector<1x32xf32>
    tpu.vector_store %arg10[%c5_57, %c0_58], %198 {strides = array<i32>} : memref<16x32xf32, #tpu.memory_space<vmem>>, vector<1x32xf32>,
    %200 = vector.extract_strided_slice %197 {offsets = [0, 32], sizes = [1, 32], strides = [1, 1]} : vector<1x64xf32> to vector<1x32xf32>
    %c10 = arith.constant 10 : index
    %c0_59 = arith.constant 0 : index
    %201 = vector.load %arg11[%c10, %c0_59] : memref<16x32xf32, #tpu.memory_space<vmem>>, vector<1x32xf32>
    tpu.vector_store %arg11[%c10, %c0_59], %200 {strides = array<i32>} : memref<16x32xf32, #tpu.memory_space<vmem>>, vector<1x32xf32>,
    %cst_60 = arith.constant dense<0.000000e+00> : vector<1x256xf32>
    %202 = tpu.matmul %197, %7, %cst_60 {dimension_numbers = #tpu.dot_dimension_numbers<[1], [0], [0], [1], [0, 0, 1, 1], [], []>} : vector<1x64xf32>, vector<64x256xf32>, vector<1x256xf32> -> vector<1x256xf32>
    %c6 = arith.constant 6 : index
    %c0_61 = arith.constant 0 : index
    %203 = vector.load %arg9[%c6, %c0_61] : memref<16x256xf32, #tpu.memory_space<vmem>>, vector<1x256xf32>
    %204 = arith.addf %202, %203 : vector<1x256xf32>
    %205 = vector.extract_strided_slice %204 {offsets = [0, 0], sizes = [1, 64], strides = [1, 1]} : vector<1x256xf32> to vector<1x64xf32>
    %206 = arith.negf %205 : vector<1x64xf32>
    %207 = math.exp %206 : vector<1x64xf32>
    %cst_62 = arith.constant 1.000000e+00 : f32
    %208 = vector.broadcast %cst_62 : f32 to vector<1x64xf32>
    %209 = arith.addf %208, %207 : vector<1x64xf32>
    %210 = arith.divf %208, %209 : vector<1x64xf32>
    %211 = vector.extract_strided_slice %204 {offsets = [0, 64], sizes = [1, 64], strides = [1, 1]} : vector<1x256xf32> to vector<1x64xf32>
    %212 = arith.negf %211 : vector<1x64xf32>
    %213 = math.exp %212 : vector<1x64xf32>
    %cst_63 = arith.constant 1.000000e+00 : f32
    %214 = vector.broadcast %cst_63 : f32 to vector<1x64xf32>
    %215 = arith.addf %214, %213 : vector<1x64xf32>
    %216 = arith.divf %214, %215 : vector<1x64xf32>
    %217 = vector.extract_strided_slice %204 {offsets = [0, 128], sizes = [1, 64], strides = [1, 1]} : vector<1x256xf32> to vector<1x64xf32>
    %218 = math.tanh %217 : vector<1x64xf32>
    %219 = vector.extract_strided_slice %204 {offsets = [0, 192], sizes = [1, 64], strides = [1, 1]} : vector<1x256xf32> to vector<1x64xf32>
    %220 = arith.negf %219 : vector<1x64xf32>
    %221 = math.exp %220 : vector<1x64xf32>
    %cst_64 = arith.constant 1.000000e+00 : f32
    %222 = vector.broadcast %cst_64 : f32 to vector<1x64xf32>
    %223 = arith.addf %222, %221 : vector<1x64xf32>
    %224 = arith.divf %222, %223 : vector<1x64xf32>
    %225 = arith.mulf %216, %195 : vector<1x64xf32>
    %226 = arith.mulf %210, %218 : vector<1x64xf32>
    %227 = arith.addf %225, %226 : vector<1x64xf32>
    %228 = math.tanh %227 : vector<1x64xf32>
    %229 = arith.mulf %224, %228 : vector<1x64xf32>
    %230 = vector.extract_strided_slice %229 {offsets = [0, 0], sizes = [1, 32], strides = [1, 1]} : vector<1x64xf32> to vector<1x32xf32>
    %c6_65 = arith.constant 6 : index
    %c0_66 = arith.constant 0 : index
    %231 = vector.load %arg10[%c6_65, %c0_66] : memref<16x32xf32, #tpu.memory_space<vmem>>, vector<1x32xf32>
    tpu.vector_store %arg10[%c6_65, %c0_66], %230 {strides = array<i32>} : memref<16x32xf32, #tpu.memory_space<vmem>>, vector<1x32xf32>,
    %232 = vector.extract_strided_slice %229 {offsets = [0, 32], sizes = [1, 32], strides = [1, 1]} : vector<1x64xf32> to vector<1x32xf32>
    %c9 = arith.constant 9 : index
    %c0_67 = arith.constant 0 : index
    %233 = vector.load %arg11[%c9, %c0_67] : memref<16x32xf32, #tpu.memory_space<vmem>>, vector<1x32xf32>
    tpu.vector_store %arg11[%c9, %c0_67], %232 {strides = array<i32>} : memref<16x32xf32, #tpu.memory_space<vmem>>, vector<1x32xf32>,
    %cst_68 = arith.constant dense<0.000000e+00> : vector<1x256xf32>
    %234 = tpu.matmul %229, %7, %cst_68 {dimension_numbers = #tpu.dot_dimension_numbers<[1], [0], [0], [1], [0, 0, 1, 1], [], []>} : vector<1x64xf32>, vector<64x256xf32>, vector<1x256xf32> -> vector<1x256xf32>
    %c7 = arith.constant 7 : index
    %c0_69 = arith.constant 0 : index
    %235 = vector.load %arg9[%c7, %c0_69] : memref<16x256xf32, #tpu.memory_space<vmem>>, vector<1x256xf32>
    %236 = arith.addf %234, %235 : vector<1x256xf32>
    %237 = vector.extract_strided_slice %236 {offsets = [0, 0], sizes = [1, 64], strides = [1, 1]} : vector<1x256xf32> to vector<1x64xf32>
    %238 = arith.negf %237 : vector<1x64xf32>
    %239 = math.exp %238 : vector<1x64xf32>
    %cst_70 = arith.constant 1.000000e+00 : f32
    %240 = vector.broadcast %cst_70 : f32 to vector<1x64xf32>
    %241 = arith.addf %240, %239 : vector<1x64xf32>
    %242 = arith.divf %240, %241 : vector<1x64xf32>
    %243 = vector.extract_strided_slice %236 {offsets = [0, 64], sizes = [1, 64], strides = [1, 1]} : vector<1x256xf32> to vector<1x64xf32>
    %244 = arith.negf %243 : vector<1x64xf32>
    %245 = math.exp %244 : vector<1x64xf32>
    %cst_71 = arith.constant 1.000000e+00 : f32
    %246 = vector.broadcast %cst_71 : f32 to vector<1x64xf32>
    %247 = arith.addf %246, %245 : vector<1x64xf32>
    %248 = arith.divf %246, %247 : vector<1x64xf32>
    %249 = vector.extract_strided_slice %236 {offsets = [0, 128], sizes = [1, 64], strides = [1, 1]} : vector<1x256xf32> to vector<1x64xf32>
    %250 = math.tanh %249 : vector<1x64xf32>
    %251 = vector.extract_strided_slice %236 {offsets = [0, 192], sizes = [1, 64], strides = [1, 1]} : vector<1x256xf32> to vector<1x64xf32>
    %252 = arith.negf %251 : vector<1x64xf32>
    %253 = math.exp %252 : vector<1x64xf32>
    %cst_72 = arith.constant 1.000000e+00 : f32
    %254 = vector.broadcast %cst_72 : f32 to vector<1x64xf32>
    %255 = arith.addf %254, %253 : vector<1x64xf32>
    %256 = arith.divf %254, %255 : vector<1x64xf32>
    %257 = arith.mulf %248, %227 : vector<1x64xf32>
    %258 = arith.mulf %242, %250 : vector<1x64xf32>
    %259 = arith.addf %257, %258 : vector<1x64xf32>
    %260 = math.tanh %259 : vector<1x64xf32>
    %261 = arith.mulf %256, %260 : vector<1x64xf32>
    %262 = vector.extract_strided_slice %261 {offsets = [0, 0], sizes = [1, 32], strides = [1, 1]} : vector<1x64xf32> to vector<1x32xf32>
    %c7_73 = arith.constant 7 : index
    %c0_74 = arith.constant 0 : index
    %263 = vector.load %arg10[%c7_73, %c0_74] : memref<16x32xf32, #tpu.memory_space<vmem>>, vector<1x32xf32>
    tpu.vector_store %arg10[%c7_73, %c0_74], %262 {strides = array<i32>} : memref<16x32xf32, #tpu.memory_space<vmem>>, vector<1x32xf32>,
    %264 = vector.extract_strided_slice %261 {offsets = [0, 32], sizes = [1, 32], strides = [1, 1]} : vector<1x64xf32> to vector<1x32xf32>
    %c8 = arith.constant 8 : index
    %c0_75 = arith.constant 0 : index
    %265 = vector.load %arg11[%c8, %c0_75] : memref<16x32xf32, #tpu.memory_space<vmem>>, vector<1x32xf32>
    tpu.vector_store %arg11[%c8, %c0_75], %264 {strides = array<i32>} : memref<16x32xf32, #tpu.memory_space<vmem>>, vector<1x32xf32>,
    %cst_76 = arith.constant dense<0.000000e+00> : vector<1x256xf32>
    %266 = tpu.matmul %261, %7, %cst_76 {dimension_numbers = #tpu.dot_dimension_numbers<[1], [0], [0], [1], [0, 0, 1, 1], [], []>} : vector<1x64xf32>, vector<64x256xf32>, vector<1x256xf32> -> vector<1x256xf32>
    %c8_77 = arith.constant 8 : index
    %c0_78 = arith.constant 0 : index
    %267 = vector.load %arg9[%c8_77, %c0_78] : memref<16x256xf32, #tpu.memory_space<vmem>>, vector<1x256xf32>
    %268 = arith.addf %266, %267 : vector<1x256xf32>
    %269 = vector.extract_strided_slice %268 {offsets = [0, 0], sizes = [1, 64], strides = [1, 1]} : vector<1x256xf32> to vector<1x64xf32>
    %270 = arith.negf %269 : vector<1x64xf32>
    %271 = math.exp %270 : vector<1x64xf32>
    %cst_79 = arith.constant 1.000000e+00 : f32
    %272 = vector.broadcast %cst_79 : f32 to vector<1x64xf32>
    %273 = arith.addf %272, %271 : vector<1x64xf32>
    %274 = arith.divf %272, %273 : vector<1x64xf32>
    %275 = vector.extract_strided_slice %268 {offsets = [0, 64], sizes = [1, 64], strides = [1, 1]} : vector<1x256xf32> to vector<1x64xf32>
    %276 = arith.negf %275 : vector<1x64xf32>
    %277 = math.exp %276 : vector<1x64xf32>
    %cst_80 = arith.constant 1.000000e+00 : f32
    %278 = vector.broadcast %cst_80 : f32 to vector<1x64xf32>
    %279 = arith.addf %278, %277 : vector<1x64xf32>
    %280 = arith.divf %278, %279 : vector<1x64xf32>
    %281 = vector.extract_strided_slice %268 {offsets = [0, 128], sizes = [1, 64], strides = [1, 1]} : vector<1x256xf32> to vector<1x64xf32>
    %282 = math.tanh %281 : vector<1x64xf32>
    %283 = vector.extract_strided_slice %268 {offsets = [0, 192], sizes = [1, 64], strides = [1, 1]} : vector<1x256xf32> to vector<1x64xf32>
    %284 = arith.negf %283 : vector<1x64xf32>
    %285 = math.exp %284 : vector<1x64xf32>
    %cst_81 = arith.constant 1.000000e+00 : f32
    %286 = vector.broadcast %cst_81 : f32 to vector<1x64xf32>
    %287 = arith.addf %286, %285 : vector<1x64xf32>
    %288 = arith.divf %286, %287 : vector<1x64xf32>
    %289 = arith.mulf %280, %259 : vector<1x64xf32>
    %290 = arith.mulf %274, %282 : vector<1x64xf32>
    %291 = arith.addf %289, %290 : vector<1x64xf32>
    %292 = math.tanh %291 : vector<1x64xf32>
    %293 = arith.mulf %288, %292 : vector<1x64xf32>
    %294 = vector.extract_strided_slice %293 {offsets = [0, 0], sizes = [1, 32], strides = [1, 1]} : vector<1x64xf32> to vector<1x32xf32>
    %c8_82 = arith.constant 8 : index
    %c0_83 = arith.constant 0 : index
    %295 = vector.load %arg10[%c8_82, %c0_83] : memref<16x32xf32, #tpu.memory_space<vmem>>, vector<1x32xf32>
    tpu.vector_store %arg10[%c8_82, %c0_83], %294 {strides = array<i32>} : memref<16x32xf32, #tpu.memory_space<vmem>>, vector<1x32xf32>,
    %296 = vector.extract_strided_slice %293 {offsets = [0, 32], sizes = [1, 32], strides = [1, 1]} : vector<1x64xf32> to vector<1x32xf32>
    %c7_84 = arith.constant 7 : index
    %c0_85 = arith.constant 0 : index
    %297 = vector.load %arg11[%c7_84, %c0_85] : memref<16x32xf32, #tpu.memory_space<vmem>>, vector<1x32xf32>
    tpu.vector_store %arg11[%c7_84, %c0_85], %296 {strides = array<i32>} : memref<16x32xf32, #tpu.memory_space<vmem>>, vector<1x32xf32>,
    %cst_86 = arith.constant dense<0.000000e+00> : vector<1x256xf32>
    %298 = tpu.matmul %293, %7, %cst_86 {dimension_numbers = #tpu.dot_dimension_numbers<[1], [0], [0], [1], [0, 0, 1, 1], [], []>} : vector<1x64xf32>, vector<64x256xf32>, vector<1x256xf32> -> vector<1x256xf32>
    %c9_87 = arith.constant 9 : index
    %c0_88 = arith.constant 0 : index
    %299 = vector.load %arg9[%c9_87, %c0_88] : memref<16x256xf32, #tpu.memory_space<vmem>>, vector<1x256xf32>
    %300 = arith.addf %298, %299 : vector<1x256xf32>
    %301 = vector.extract_strided_slice %300 {offsets = [0, 0], sizes = [1, 64], strides = [1, 1]} : vector<1x256xf32> to vector<1x64xf32>
    %302 = arith.negf %301 : vector<1x64xf32>
    %303 = math.exp %302 : vector<1x64xf32>
    %cst_89 = arith.constant 1.000000e+00 : f32
    %304 = vector.broadcast %cst_89 : f32 to vector<1x64xf32>
    %305 = arith.addf %304, %303 : vector<1x64xf32>
    %306 = arith.divf %304, %305 : vector<1x64xf32>
    %307 = vector.extract_strided_slice %300 {offsets = [0, 64], sizes = [1, 64], strides = [1, 1]} : vector<1x256xf32> to vector<1x64xf32>
    %308 = arith.negf %307 : vector<1x64xf32>
    %309 = math.exp %308 : vector<1x64xf32>
    %cst_90 = arith.constant 1.000000e+00 : f32
    %310 = vector.broadcast %cst_90 : f32 to vector<1x64xf32>
    %311 = arith.addf %310, %309 : vector<1x64xf32>
    %312 = arith.divf %310, %311 : vector<1x64xf32>
    %313 = vector.extract_strided_slice %300 {offsets = [0, 128], sizes = [1, 64], strides = [1, 1]} : vector<1x256xf32> to vector<1x64xf32>
    %314 = math.tanh %313 : vector<1x64xf32>
    %315 = vector.extract_strided_slice %300 {offsets = [0, 192], sizes = [1, 64], strides = [1, 1]} : vector<1x256xf32> to vector<1x64xf32>
    %316 = arith.negf %315 : vector<1x64xf32>
    %317 = math.exp %316 : vector<1x64xf32>
    %cst_91 = arith.constant 1.000000e+00 : f32
    %318 = vector.broadcast %cst_91 : f32 to vector<1x64xf32>
    %319 = arith.addf %318, %317 : vector<1x64xf32>
    %320 = arith.divf %318, %319 : vector<1x64xf32>
    %321 = arith.mulf %312, %291 : vector<1x64xf32>
    %322 = arith.mulf %306, %314 : vector<1x64xf32>
    %323 = arith.addf %321, %322 : vector<1x64xf32>
    %324 = math.tanh %323 : vector<1x64xf32>
    %325 = arith.mulf %320, %324 : vector<1x64xf32>
    %326 = vector.extract_strided_slice %325 {offsets = [0, 0], sizes = [1, 32], strides = [1, 1]} : vector<1x64xf32> to vector<1x32xf32>
    %c9_92 = arith.constant 9 : index
    %c0_93 = arith.constant 0 : index
    %327 = vector.load %arg10[%c9_92, %c0_93] : memref<16x32xf32, #tpu.memory_space<vmem>>, vector<1x32xf32>
    tpu.vector_store %arg10[%c9_92, %c0_93], %326 {strides = array<i32>} : memref<16x32xf32, #tpu.memory_space<vmem>>, vector<1x32xf32>,
    %328 = vector.extract_strided_slice %325 {offsets = [0, 32], sizes = [1, 32], strides = [1, 1]} : vector<1x64xf32> to vector<1x32xf32>
    %c6_94 = arith.constant 6 : index
    %c0_95 = arith.constant 0 : index
    %329 = vector.load %arg11[%c6_94, %c0_95] : memref<16x32xf32, #tpu.memory_space<vmem>>, vector<1x32xf32>
    tpu.vector_store %arg11[%c6_94, %c0_95], %328 {strides = array<i32>} : memref<16x32xf32, #tpu.memory_space<vmem>>, vector<1x32xf32>,
    %cst_96 = arith.constant dense<0.000000e+00> : vector<1x256xf32>
    %330 = tpu.matmul %325, %7, %cst_96 {dimension_numbers = #tpu.dot_dimension_numbers<[1], [0], [0], [1], [0, 0, 1, 1], [], []>} : vector<1x64xf32>, vector<64x256xf32>, vector<1x256xf32> -> vector<1x256xf32>
    %c10_97 = arith.constant 10 : index
    %c0_98 = arith.constant 0 : index
    %331 = vector.load %arg9[%c10_97, %c0_98] : memref<16x256xf32, #tpu.memory_space<vmem>>, vector<1x256xf32>
    %332 = arith.addf %330, %331 : vector<1x256xf32>
    %333 = vector.extract_strided_slice %332 {offsets = [0, 0], sizes = [1, 64], strides = [1, 1]} : vector<1x256xf32> to vector<1x64xf32>
    %334 = arith.negf %333 : vector<1x64xf32>
    %335 = math.exp %334 : vector<1x64xf32>
    %cst_99 = arith.constant 1.000000e+00 : f32
    %336 = vector.broadcast %cst_99 : f32 to vector<1x64xf32>
    %337 = arith.addf %336, %335 : vector<1x64xf32>
    %338 = arith.divf %336, %337 : vector<1x64xf32>
    %339 = vector.extract_strided_slice %332 {offsets = [0, 64], sizes = [1, 64], strides = [1, 1]} : vector<1x256xf32> to vector<1x64xf32>
    %340 = arith.negf %339 : vector<1x64xf32>
    %341 = math.exp %340 : vector<1x64xf32>
    %cst_100 = arith.constant 1.000000e+00 : f32
    %342 = vector.broadcast %cst_100 : f32 to vector<1x64xf32>
    %343 = arith.addf %342, %341 : vector<1x64xf32>
    %344 = arith.divf %342, %343 : vector<1x64xf32>
    %345 = vector.extract_strided_slice %332 {offsets = [0, 128], sizes = [1, 64], strides = [1, 1]} : vector<1x256xf32> to vector<1x64xf32>
    %346 = math.tanh %345 : vector<1x64xf32>
    %347 = vector.extract_strided_slice %332 {offsets = [0, 192], sizes = [1, 64], strides = [1, 1]} : vector<1x256xf32> to vector<1x64xf32>
    %348 = arith.negf %347 : vector<1x64xf32>
    %349 = math.exp %348 : vector<1x64xf32>
    %cst_101 = arith.constant 1.000000e+00 : f32
    %350 = vector.broadcast %cst_101 : f32 to vector<1x64xf32>
    %351 = arith.addf %350, %349 : vector<1x64xf32>
    %352 = arith.divf %350, %351 : vector<1x64xf32>
    %353 = arith.mulf %344, %323 : vector<1x64xf32>
    %354 = arith.mulf %338, %346 : vector<1x64xf32>
    %355 = arith.addf %353, %354 : vector<1x64xf32>
    %356 = math.tanh %355 : vector<1x64xf32>
    %357 = arith.mulf %352, %356 : vector<1x64xf32>
    %358 = vector.extract_strided_slice %357 {offsets = [0, 0], sizes = [1, 32], strides = [1, 1]} : vector<1x64xf32> to vector<1x32xf32>
    %c10_102 = arith.constant 10 : index
    %c0_103 = arith.constant 0 : index
    %359 = vector.load %arg10[%c10_102, %c0_103] : memref<16x32xf32, #tpu.memory_space<vmem>>, vector<1x32xf32>
    tpu.vector_store %arg10[%c10_102, %c0_103], %358 {strides = array<i32>} : memref<16x32xf32, #tpu.memory_space<vmem>>, vector<1x32xf32>,
    %360 = vector.extract_strided_slice %357 {offsets = [0, 32], sizes = [1, 32], strides = [1, 1]} : vector<1x64xf32> to vector<1x32xf32>
    %c5_104 = arith.constant 5 : index
    %c0_105 = arith.constant 0 : index
    %361 = vector.load %arg11[%c5_104, %c0_105] : memref<16x32xf32, #tpu.memory_space<vmem>>, vector<1x32xf32>
    tpu.vector_store %arg11[%c5_104, %c0_105], %360 {strides = array<i32>} : memref<16x32xf32, #tpu.memory_space<vmem>>, vector<1x32xf32>,
    %cst_106 = arith.constant dense<0.000000e+00> : vector<1x256xf32>
    %362 = tpu.matmul %357, %7, %cst_106 {dimension_numbers = #tpu.dot_dimension_numbers<[1], [0], [0], [1], [0, 0, 1, 1], [], []>} : vector<1x64xf32>, vector<64x256xf32>, vector<1x256xf32> -> vector<1x256xf32>
    %c11_107 = arith.constant 11 : index
    %c0_108 = arith.constant 0 : index
    %363 = vector.load %arg9[%c11_107, %c0_108] : memref<16x256xf32, #tpu.memory_space<vmem>>, vector<1x256xf32>
    %364 = arith.addf %362, %363 : vector<1x256xf32>
    %365 = vector.extract_strided_slice %364 {offsets = [0, 0], sizes = [1, 64], strides = [1, 1]} : vector<1x256xf32> to vector<1x64xf32>
    %366 = arith.negf %365 : vector<1x64xf32>
    %367 = math.exp %366 : vector<1x64xf32>
    %cst_109 = arith.constant 1.000000e+00 : f32
    %368 = vector.broadcast %cst_109 : f32 to vector<1x64xf32>
    %369 = arith.addf %368, %367 : vector<1x64xf32>
    %370 = arith.divf %368, %369 : vector<1x64xf32>
    %371 = vector.extract_strided_slice %364 {offsets = [0, 64], sizes = [1, 64], strides = [1, 1]} : vector<1x256xf32> to vector<1x64xf32>
    %372 = arith.negf %371 : vector<1x64xf32>
    %373 = math.exp %372 : vector<1x64xf32>
    %cst_110 = arith.constant 1.000000e+00 : f32
    %374 = vector.broadcast %cst_110 : f32 to vector<1x64xf32>
    %375 = arith.addf %374, %373 : vector<1x64xf32>
    %376 = arith.divf %374, %375 : vector<1x64xf32>
    %377 = vector.extract_strided_slice %364 {offsets = [0, 128], sizes = [1, 64], strides = [1, 1]} : vector<1x256xf32> to vector<1x64xf32>
    %378 = math.tanh %377 : vector<1x64xf32>
    %379 = vector.extract_strided_slice %364 {offsets = [0, 192], sizes = [1, 64], strides = [1, 1]} : vector<1x256xf32> to vector<1x64xf32>
    %380 = arith.negf %379 : vector<1x64xf32>
    %381 = math.exp %380 : vector<1x64xf32>
    %cst_111 = arith.constant 1.000000e+00 : f32
    %382 = vector.broadcast %cst_111 : f32 to vector<1x64xf32>
    %383 = arith.addf %382, %381 : vector<1x64xf32>
    %384 = arith.divf %382, %383 : vector<1x64xf32>
    %385 = arith.mulf %376, %355 : vector<1x64xf32>
    %386 = arith.mulf %370, %378 : vector<1x64xf32>
    %387 = arith.addf %385, %386 : vector<1x64xf32>
    %388 = math.tanh %387 : vector<1x64xf32>
    %389 = arith.mulf %384, %388 : vector<1x64xf32>
    %390 = vector.extract_strided_slice %389 {offsets = [0, 0], sizes = [1, 32], strides = [1, 1]} : vector<1x64xf32> to vector<1x32xf32>
    %c11_112 = arith.constant 11 : index
    %c0_113 = arith.constant 0 : index
    %391 = vector.load %arg10[%c11_112, %c0_113] : memref<16x32xf32, #tpu.memory_space<vmem>>, vector<1x32xf32>
    tpu.vector_store %arg10[%c11_112, %c0_113], %390 {strides = array<i32>} : memref<16x32xf32, #tpu.memory_space<vmem>>, vector<1x32xf32>,
    %392 = vector.extract_strided_slice %389 {offsets = [0, 32], sizes = [1, 32], strides = [1, 1]} : vector<1x64xf32> to vector<1x32xf32>
    %c4_114 = arith.constant 4 : index
    %c0_115 = arith.constant 0 : index
    %393 = vector.load %arg11[%c4_114, %c0_115] : memref<16x32xf32, #tpu.memory_space<vmem>>, vector<1x32xf32>
    tpu.vector_store %arg11[%c4_114, %c0_115], %392 {strides = array<i32>} : memref<16x32xf32, #tpu.memory_space<vmem>>, vector<1x32xf32>,
    %cst_116 = arith.constant dense<0.000000e+00> : vector<1x256xf32>
    %394 = tpu.matmul %389, %7, %cst_116 {dimension_numbers = #tpu.dot_dimension_numbers<[1], [0], [0], [1], [0, 0, 1, 1], [], []>} : vector<1x64xf32>, vector<64x256xf32>, vector<1x256xf32> -> vector<1x256xf32>
    %c12_117 = arith.constant 12 : index
    %c0_118 = arith.constant 0 : index
    %395 = vector.load %arg9[%c12_117, %c0_118] : memref<16x256xf32, #tpu.memory_space<vmem>>, vector<1x256xf32>
    %396 = arith.addf %394, %395 : vector<1x256xf32>
    %397 = vector.extract_strided_slice %396 {offsets = [0, 0], sizes = [1, 64], strides = [1, 1]} : vector<1x256xf32> to vector<1x64xf32>
    %398 = arith.negf %397 : vector<1x64xf32>
    %399 = math.exp %398 : vector<1x64xf32>
    %cst_119 = arith.constant 1.000000e+00 : f32
    %400 = vector.broadcast %cst_119 : f32 to vector<1x64xf32>
    %401 = arith.addf %400, %399 : vector<1x64xf32>
    %402 = arith.divf %400, %401 : vector<1x64xf32>
    %403 = vector.extract_strided_slice %396 {offsets = [0, 64], sizes = [1, 64], strides = [1, 1]} : vector<1x256xf32> to vector<1x64xf32>
    %404 = arith.negf %403 : vector<1x64xf32>
    %405 = math.exp %404 : vector<1x64xf32>
    %cst_120 = arith.constant 1.000000e+00 : f32
    %406 = vector.broadcast %cst_120 : f32 to vector<1x64xf32>
    %407 = arith.addf %406, %405 : vector<1x64xf32>
    %408 = arith.divf %406, %407 : vector<1x64xf32>
    %409 = vector.extract_strided_slice %396 {offsets = [0, 128], sizes = [1, 64], strides = [1, 1]} : vector<1x256xf32> to vector<1x64xf32>
    %410 = math.tanh %409 : vector<1x64xf32>
    %411 = vector.extract_strided_slice %396 {offsets = [0, 192], sizes = [1, 64], strides = [1, 1]} : vector<1x256xf32> to vector<1x64xf32>
    %412 = arith.negf %411 : vector<1x64xf32>
    %413 = math.exp %412 : vector<1x64xf32>
    %cst_121 = arith.constant 1.000000e+00 : f32
    %414 = vector.broadcast %cst_121 : f32 to vector<1x64xf32>
    %415 = arith.addf %414, %413 : vector<1x64xf32>
    %416 = arith.divf %414, %415 : vector<1x64xf32>
    %417 = arith.mulf %408, %387 : vector<1x64xf32>
    %418 = arith.mulf %402, %410 : vector<1x64xf32>
    %419 = arith.addf %417, %418 : vector<1x64xf32>
    %420 = math.tanh %419 : vector<1x64xf32>
    %421 = arith.mulf %416, %420 : vector<1x64xf32>
    %422 = vector.extract_strided_slice %421 {offsets = [0, 0], sizes = [1, 32], strides = [1, 1]} : vector<1x64xf32> to vector<1x32xf32>
    %c12_122 = arith.constant 12 : index
    %c0_123 = arith.constant 0 : index
    %423 = vector.load %arg10[%c12_122, %c0_123] : memref<16x32xf32, #tpu.memory_space<vmem>>, vector<1x32xf32>
    tpu.vector_store %arg10[%c12_122, %c0_123], %422 {strides = array<i32>} : memref<16x32xf32, #tpu.memory_space<vmem>>, vector<1x32xf32>,
    %424 = vector.extract_strided_slice %421 {offsets = [0, 32], sizes = [1, 32], strides = [1, 1]} : vector<1x64xf32> to vector<1x32xf32>
    %c3_124 = arith.constant 3 : index
    %c0_125 = arith.constant 0 : index
    %425 = vector.load %arg11[%c3_124, %c0_125] : memref<16x32xf32, #tpu.memory_space<vmem>>, vector<1x32xf32>
    tpu.vector_store %arg11[%c3_124, %c0_125], %424 {strides = array<i32>} : memref<16x32xf32, #tpu.memory_space<vmem>>, vector<1x32xf32>,
    %cst_126 = arith.constant dense<0.000000e+00> : vector<1x256xf32>
    %426 = tpu.matmul %421, %7, %cst_126 {dimension_numbers = #tpu.dot_dimension_numbers<[1], [0], [0], [1], [0, 0, 1, 1], [], []>} : vector<1x64xf32>, vector<64x256xf32>, vector<1x256xf32> -> vector<1x256xf32>
    %c13_127 = arith.constant 13 : index
    %c0_128 = arith.constant 0 : index
    %427 = vector.load %arg9[%c13_127, %c0_128] : memref<16x256xf32, #tpu.memory_space<vmem>>, vector<1x256xf32>
    %428 = arith.addf %426, %427 : vector<1x256xf32>
    %429 = vector.extract_strided_slice %428 {offsets = [0, 0], sizes = [1, 64], strides = [1, 1]} : vector<1x256xf32> to vector<1x64xf32>
    %430 = arith.negf %429 : vector<1x64xf32>
    %431 = math.exp %430 : vector<1x64xf32>
    %cst_129 = arith.constant 1.000000e+00 : f32
    %432 = vector.broadcast %cst_129 : f32 to vector<1x64xf32>
    %433 = arith.addf %432, %431 : vector<1x64xf32>
    %434 = arith.divf %432, %433 : vector<1x64xf32>
    %435 = vector.extract_strided_slice %428 {offsets = [0, 64], sizes = [1, 64], strides = [1, 1]} : vector<1x256xf32> to vector<1x64xf32>
    %436 = arith.negf %435 : vector<1x64xf32>
    %437 = math.exp %436 : vector<1x64xf32>
    %cst_130 = arith.constant 1.000000e+00 : f32
    %438 = vector.broadcast %cst_130 : f32 to vector<1x64xf32>
    %439 = arith.addf %438, %437 : vector<1x64xf32>
    %440 = arith.divf %438, %439 : vector<1x64xf32>
    %441 = vector.extract_strided_slice %428 {offsets = [0, 128], sizes = [1, 64], strides = [1, 1]} : vector<1x256xf32> to vector<1x64xf32>
    %442 = math.tanh %441 : vector<1x64xf32>
    %443 = vector.extract_strided_slice %428 {offsets = [0, 192], sizes = [1, 64], strides = [1, 1]} : vector<1x256xf32> to vector<1x64xf32>
    %444 = arith.negf %443 : vector<1x64xf32>
    %445 = math.exp %444 : vector<1x64xf32>
    %cst_131 = arith.constant 1.000000e+00 : f32
    %446 = vector.broadcast %cst_131 : f32 to vector<1x64xf32>
    %447 = arith.addf %446, %445 : vector<1x64xf32>
    %448 = arith.divf %446, %447 : vector<1x64xf32>
    %449 = arith.mulf %440, %419 : vector<1x64xf32>
    %450 = arith.mulf %434, %442 : vector<1x64xf32>
    %451 = arith.addf %449, %450 : vector<1x64xf32>
    %452 = math.tanh %451 : vector<1x64xf32>
    %453 = arith.mulf %448, %452 : vector<1x64xf32>
    %454 = vector.extract_strided_slice %453 {offsets = [0, 0], sizes = [1, 32], strides = [1, 1]} : vector<1x64xf32> to vector<1x32xf32>
    %c13_132 = arith.constant 13 : index
    %c0_133 = arith.constant 0 : index
    %455 = vector.load %arg10[%c13_132, %c0_133] : memref<16x32xf32, #tpu.memory_space<vmem>>, vector<1x32xf32>
    tpu.vector_store %arg10[%c13_132, %c0_133], %454 {strides = array<i32>} : memref<16x32xf32, #tpu.memory_space<vmem>>, vector<1x32xf32>,
    %456 = vector.extract_strided_slice %453 {offsets = [0, 32], sizes = [1, 32], strides = [1, 1]} : vector<1x64xf32> to vector<1x32xf32>
    %c2_134 = arith.constant 2 : index
    %c0_135 = arith.constant 0 : index
    %457 = vector.load %arg11[%c2_134, %c0_135] : memref<16x32xf32, #tpu.memory_space<vmem>>, vector<1x32xf32>
    tpu.vector_store %arg11[%c2_134, %c0_135], %456 {strides = array<i32>} : memref<16x32xf32, #tpu.memory_space<vmem>>, vector<1x32xf32>,
    %cst_136 = arith.constant dense<0.000000e+00> : vector<1x256xf32>
    %458 = tpu.matmul %453, %7, %cst_136 {dimension_numbers = #tpu.dot_dimension_numbers<[1], [0], [0], [1], [0, 0, 1, 1], [], []>} : vector<1x64xf32>, vector<64x256xf32>, vector<1x256xf32> -> vector<1x256xf32>
    %c14_137 = arith.constant 14 : index
    %c0_138 = arith.constant 0 : index
    %459 = vector.load %arg9[%c14_137, %c0_138] : memref<16x256xf32, #tpu.memory_space<vmem>>, vector<1x256xf32>
    %460 = arith.addf %458, %459 : vector<1x256xf32>
    %461 = vector.extract_strided_slice %460 {offsets = [0, 0], sizes = [1, 64], strides = [1, 1]} : vector<1x256xf32> to vector<1x64xf32>
    %462 = arith.negf %461 : vector<1x64xf32>
    %463 = math.exp %462 : vector<1x64xf32>
    %cst_139 = arith.constant 1.000000e+00 : f32
    %464 = vector.broadcast %cst_139 : f32 to vector<1x64xf32>
    %465 = arith.addf %464, %463 : vector<1x64xf32>
    %466 = arith.divf %464, %465 : vector<1x64xf32>
    %467 = vector.extract_strided_slice %460 {offsets = [0, 64], sizes = [1, 64], strides = [1, 1]} : vector<1x256xf32> to vector<1x64xf32>
    %468 = arith.negf %467 : vector<1x64xf32>
    %469 = math.exp %468 : vector<1x64xf32>
    %cst_140 = arith.constant 1.000000e+00 : f32
    %470 = vector.broadcast %cst_140 : f32 to vector<1x64xf32>
    %471 = arith.addf %470, %469 : vector<1x64xf32>
    %472 = arith.divf %470, %471 : vector<1x64xf32>
    %473 = vector.extract_strided_slice %460 {offsets = [0, 128], sizes = [1, 64], strides = [1, 1]} : vector<1x256xf32> to vector<1x64xf32>
    %474 = math.tanh %473 : vector<1x64xf32>
    %475 = vector.extract_strided_slice %460 {offsets = [0, 192], sizes = [1, 64], strides = [1, 1]} : vector<1x256xf32> to vector<1x64xf32>
    %476 = arith.negf %475 : vector<1x64xf32>
    %477 = math.exp %476 : vector<1x64xf32>
    %cst_141 = arith.constant 1.000000e+00 : f32
    %478 = vector.broadcast %cst_141 : f32 to vector<1x64xf32>
    %479 = arith.addf %478, %477 : vector<1x64xf32>
    %480 = arith.divf %478, %479 : vector<1x64xf32>
    %481 = arith.mulf %472, %451 : vector<1x64xf32>
    %482 = arith.mulf %466, %474 : vector<1x64xf32>
    %483 = arith.addf %481, %482 : vector<1x64xf32>
    %484 = math.tanh %483 : vector<1x64xf32>
    %485 = arith.mulf %480, %484 : vector<1x64xf32>
    %486 = vector.extract_strided_slice %485 {offsets = [0, 0], sizes = [1, 32], strides = [1, 1]} : vector<1x64xf32> to vector<1x32xf32>
    %c14_142 = arith.constant 14 : index
    %c0_143 = arith.constant 0 : index
    %487 = vector.load %arg10[%c14_142, %c0_143] : memref<16x32xf32, #tpu.memory_space<vmem>>, vector<1x32xf32>
    tpu.vector_store %arg10[%c14_142, %c0_143], %486 {strides = array<i32>} : memref<16x32xf32, #tpu.memory_space<vmem>>, vector<1x32xf32>,
    %488 = vector.extract_strided_slice %485 {offsets = [0, 32], sizes = [1, 32], strides = [1, 1]} : vector<1x64xf32> to vector<1x32xf32>
    %c1_144 = arith.constant 1 : index
    %c0_145 = arith.constant 0 : index
    %489 = vector.load %arg11[%c1_144, %c0_145] : memref<16x32xf32, #tpu.memory_space<vmem>>, vector<1x32xf32>
    tpu.vector_store %arg11[%c1_144, %c0_145], %488 {strides = array<i32>} : memref<16x32xf32, #tpu.memory_space<vmem>>, vector<1x32xf32>,
    %cst_146 = arith.constant dense<0.000000e+00> : vector<1x256xf32>
    %490 = tpu.matmul %485, %7, %cst_146 {dimension_numbers = #tpu.dot_dimension_numbers<[1], [0], [0], [1], [0, 0, 1, 1], [], []>} : vector<1x64xf32>, vector<64x256xf32>, vector<1x256xf32> -> vector<1x256xf32>
    %c15_147 = arith.constant 15 : index
    %c0_148 = arith.constant 0 : index
    %491 = vector.load %arg9[%c15_147, %c0_148] : memref<16x256xf32, #tpu.memory_space<vmem>>, vector<1x256xf32>
    %492 = arith.addf %490, %491 : vector<1x256xf32>
    %493 = vector.extract_strided_slice %492 {offsets = [0, 0], sizes = [1, 64], strides = [1, 1]} : vector<1x256xf32> to vector<1x64xf32>
    %494 = arith.negf %493 : vector<1x64xf32>
    %495 = math.exp %494 : vector<1x64xf32>
    %cst_149 = arith.constant 1.000000e+00 : f32
    %496 = vector.broadcast %cst_149 : f32 to vector<1x64xf32>
    %497 = arith.addf %496, %495 : vector<1x64xf32>
    %498 = arith.divf %496, %497 : vector<1x64xf32>
    %499 = vector.extract_strided_slice %492 {offsets = [0, 64], sizes = [1, 64], strides = [1, 1]} : vector<1x256xf32> to vector<1x64xf32>
    %500 = arith.negf %499 : vector<1x64xf32>
    %501 = math.exp %500 : vector<1x64xf32>
    %cst_150 = arith.constant 1.000000e+00 : f32
    %502 = vector.broadcast %cst_150 : f32 to vector<1x64xf32>
    %503 = arith.addf %502, %501 : vector<1x64xf32>
    %504 = arith.divf %502, %503 : vector<1x64xf32>
    %505 = vector.extract_strided_slice %492 {offsets = [0, 128], sizes = [1, 64], strides = [1, 1]} : vector<1x256xf32> to vector<1x64xf32>
    %506 = math.tanh %505 : vector<1x64xf32>
    %507 = vector.extract_strided_slice %492 {offsets = [0, 192], sizes = [1, 64], strides = [1, 1]} : vector<1x256xf32> to vector<1x64xf32>
    %508 = arith.negf %507 : vector<1x64xf32>
    %509 = math.exp %508 : vector<1x64xf32>
    %cst_151 = arith.constant 1.000000e+00 : f32
    %510 = vector.broadcast %cst_151 : f32 to vector<1x64xf32>
    %511 = arith.addf %510, %509 : vector<1x64xf32>
    %512 = arith.divf %510, %511 : vector<1x64xf32>
    %513 = arith.mulf %504, %483 : vector<1x64xf32>
    %514 = arith.mulf %498, %506 : vector<1x64xf32>
    %515 = arith.addf %513, %514 : vector<1x64xf32>
    %516 = math.tanh %515 : vector<1x64xf32>
    %517 = arith.mulf %512, %516 : vector<1x64xf32>
    %518 = vector.extract_strided_slice %517 {offsets = [0, 0], sizes = [1, 32], strides = [1, 1]} : vector<1x64xf32> to vector<1x32xf32>
    %c15_152 = arith.constant 15 : index
    %c0_153 = arith.constant 0 : index
    %519 = vector.load %arg10[%c15_152, %c0_153] : memref<16x32xf32, #tpu.memory_space<vmem>>, vector<1x32xf32>
    tpu.vector_store %arg10[%c15_152, %c0_153], %518 {strides = array<i32>} : memref<16x32xf32, #tpu.memory_space<vmem>>, vector<1x32xf32>,
    %520 = vector.extract_strided_slice %517 {offsets = [0, 32], sizes = [1, 32], strides = [1, 1]} : vector<1x64xf32> to vector<1x32xf32>
    %c0_154 = arith.constant 0 : index
    %c0_155 = arith.constant 0 : index
    %521 = vector.load %arg11[%c0_154, %c0_155] : memref<16x32xf32, #tpu.memory_space<vmem>>, vector<1x32xf32>
    tpu.vector_store %arg11[%c0_154, %c0_155], %520 {strides = array<i32>} : memref<16x32xf32, #tpu.memory_space<vmem>>, vector<1x32xf32>,
    %c0_156 = arith.constant 0 : index
    %c0_157 = arith.constant 0 : index
    %522 = vector.load %arg10[%c0_156, %c0_157] : memref<16x32xf32, #tpu.memory_space<vmem>>, vector<16x32xf32>
    %c0_158 = arith.constant 0 : index
    %c0_159 = arith.constant 0 : index
    %523 = vector.load %arg5[%c0_158, %c0_159] : memref<32x128xf32, #tpu.memory_space<vmem>>, vector<32x128xf32>
    %cst_160 = arith.constant dense<0.000000e+00> : vector<16x128xf32>
    %524 = tpu.matmul %522, %523, %cst_160 {dimension_numbers = #tpu.dot_dimension_numbers<[1], [0], [0], [1], [0, 0, 1, 1], [], []>} : vector<16x32xf32>, vector<32x128xf32>, vector<16x128xf32> -> vector<16x128xf32>
    %c0_161 = arith.constant 0 : index
    %c0_162 = arith.constant 0 : index
    %525 = vector.load %arg11[%c0_161, %c0_162] : memref<16x32xf32, #tpu.memory_space<vmem>>, vector<16x32xf32>
    %c0_163 = arith.constant 0 : index
    %c0_164 = arith.constant 0 : index
    %526 = vector.load %arg6[%c0_163, %c0_164] : memref<32x128xf32, #tpu.memory_space<vmem>>, vector<32x128xf32>
    %cst_165 = arith.constant dense<0.000000e+00> : vector<16x128xf32>
    %527 = tpu.matmul %525, %526, %cst_165 {dimension_numbers = #tpu.dot_dimension_numbers<[1], [0], [0], [1], [0, 0, 1, 1], [], []>} : vector<16x32xf32>, vector<32x128xf32>, vector<16x128xf32> -> vector<16x128xf32>
    %528 = arith.addf %524, %527 : vector<16x128xf32>
    %c0_166 = arith.constant 0 : index
    %c0_167 = arith.constant 0 : index
    %529 = vector.load %arg7[%c0_166, %c0_167] : memref<1x128xf32, #tpu.memory_space<vmem>>, vector<1x128xf32>
    %530 = vector.broadcast %529 : vector<1x128xf32> to vector<16x128xf32>
    %531 = arith.addf %528, %530 : vector<16x128xf32>
    %532 = arith.negf %531 : vector<16x128xf32>
    %533 = math.exp %532 : vector<16x128xf32>
    %cst_168 = arith.constant 1.000000e+00 : f32
    %534 = vector.broadcast %cst_168 : f32 to vector<16x128xf32>
    %535 = arith.addf %534, %533 : vector<16x128xf32>
    %536 = arith.divf %534, %535 : vector<16x128xf32>
    %c0_169 = arith.constant 0 : index
    %c0_170 = arith.constant 0 : index
    %537 = vector.load %arg8[%c0_169, %c0_170] : memref<16x128xf32, #tpu.memory_space<vmem>>, vector<16x128xf32>
    tpu.vector_store %arg8[%c0_169, %c0_170], %536 {strides = array<i32>} : memref<16x128xf32, #tpu.memory_space<vmem>>, vector<16x128xf32>,
    return
  }
  func.func @transform_0(%arg0: i32) -> (i32, i32) {
    %c0_i32 = arith.constant 0 : i32
    %c0_i32_0 = arith.constant 0 : i32
    %c0_i32_1 = arith.constant 0 : i32
    return %c0_i32, %c0_i32_0 : i32, i32
  }
  func.func @transform_1(%arg0: i32) -> (i32, i32) {
    %c0_i32 = arith.constant 0 : i32
    %c0_i32_0 = arith.constant 0 : i32
    %c0_i32_1 = arith.constant 0 : i32
    return %c0_i32, %c0_i32_0 : i32, i32
  }
  func.func @transform_2(%arg0: i32) -> (i32, i32) {
    %c0_i32 = arith.constant 0 : i32
    %c0_i32_0 = arith.constant 0 : i32
    %c0_i32_1 = arith.constant 0 : i32
    return %c0_i32, %c0_i32_0 : i32, i32
  }
  func.func @transform_3(%arg0: i32) -> (i32, i32) {
    %c0_i32 = arith.constant 0 : i32
    %c0_i32_0 = arith.constant 0 : i32
    %c0_i32_1 = arith.constant 0 : i32
    return %c0_i32, %c0_i32_0 : i32, i32
  }
  func.func @transform_4(%arg0: i32) -> (i32, i32) {
    %c0_i32 = arith.constant 0 : i32
    %c0_i32_0 = arith.constant 0 : i32
    %c0_i32_1 = arith.constant 0 : i32
    return %c0_i32, %c0_i32_0 : i32, i32
  }
  func.func @transform_5(%arg0: i32) -> (i32, i32) {
    %c0_i32 = arith.constant 0 : i32
    %c0_i32_0 = arith.constant 0 : i32
    %c0_i32_1 = arith.constant 0 : i32
    return %c0_i32, %c0_i32_0 : i32, i32
  }
  func.func @transform_6(%arg0: i32) -> (i32, i32) {
    %c0_i32 = arith.constant 0 : i32
    %c0_i32_0 = arith.constant 0 : i32
    %c0_i32_1 = arith.constant 0 : i32
    return %c0_i32, %c0_i32_0 : i32, i32
  }
  func.func @transform_7(%arg0: i32) -> (i32, i32) {
    %c0_i32 = arith.constant 0 : i32
    %c0_i32_0 = arith.constant 0 : i32
    %c0_i32_1 = arith.constant 0 : i32
    return %c0_i32, %c0_i32_0 : i32, i32
  }
}

</mosaic_0001>

<bundles_post_ra>
// kernel: sequence_tagger_forward.2
= control target key start
LH: loop header
LB: loop body
LE: loop exit
PB: predicated region body
PF: predicated region fallthrough
CT: control target
= control target key end

     0   :  { %vm49_vm0 = vcmask 261120   ;;  %v1059_v11 = vmov 0.0   ;;  %s1060_s27 = smov 64   ;;  %s1384_s1 = inlined_call_operand.vmem [shape: f32[32,128], index: 1, kind: input, shape index: {}]   ;;  %s1385_s0 = inlined_call_operand.vmem [shape: f32[96,32], index: 0, kind: input, shape index: {}]   ;;  %s1386_s3 = inlined_call_operand.vmem [shape: f32[1,128], index: 3, kind: input, shape index: {}]   ;;  %s1387_s2 = inlined_call_operand.vmem [shape: f32[32,128], index: 2, kind: input, shape index: {}]   ;;  %s1388_s5 = inlined_call_operand.vmem [shape: f32[32,128], index: 5, kind: input, shape index: {}]   ;;  %s1389_s6 = inlined_call_operand.vmem [shape: f32[32,128], index: 6, kind: input, shape index: {}]   ;;  %s1390_s4 = inlined_call_operand.vmem [shape: f32[16,32], index: 4, kind: input, shape index: {}]   ;;  %s1391_s7 = inlined_call_operand.vmem [shape: f32[1,128], index: 7, kind: input, shape index: {}]   ;;  %s1392_s8 = inlined_call_operand.vmem [shape: f32[16,128], index: 8, kind: output, shape index: {}]  }
   0x1   :  { %v44_v0 = vld [vmem:[%s1384_s1 + $0x18] sm:$0xff]  ;;  %v43_v1 = vld [vmem:[%s1384_s1 + $0x10] sm:$0xff]  ;;  %v42_v2 = vld [vmem:[%s1384_s1 + $0x8] sm:$0xff] }
   0x2   :  { %942 = vmatpush.msra.mxu1 %v44_v0  ;;  %98 = vmatpush.msra.mxu0 %v44_v0  ;;  %v41_v3 = vld [vmem:[%s1384_s1] sm:$0xff]  ;;  %v36_v4 = vld [vmem:[%s1385_s0 + $0x38] sm:$0xff]  ;;  %v1134_v7 = vld [vmem:[%s1387_s2 + $0x10] sm:$0xff] }
   0x3   :  { %943 = vmatpush.msra.mxu2 %v44_v0  ;;  %944 = vmatpush.msra.mxu3 %v44_v0  ;;  %v29_v5 = vld [vmem:[%s1385_s0] sm:$0xff]  ;;  %v1128_v6 = vld [vmem:[%s1387_s2 + $0x18] sm:$0xff]  ;;  %v1141_v8 = vld [vmem:[%s1387_s2 + $0x8] sm:$0xff] }
   0x4   :  { %945 = vmatpush.msra.mxu1 %v43_v1  ;;  %99 = vmatpush.msra.mxu0 %v43_v1  ;;  %v1149_v9 = vld [vmem:[%s1387_s2] sm:$0xff]  ;;  %v30_v10 = vld [vmem:[%s1385_s0 + $0x8] sm:$0xff] }
   0x5   :  { %946 = vmatpush.msra.mxu2 %v43_v1  ;;  %947 = vmatpush.msra.mxu3 %v43_v1  ;;  %v1172_v14 = vld [vmem:[%s1386_s3] ss:$0 sm:$0xff]  ;;  %s1061_s3 = smov 32  }
   0x6   :  { %948 = vmatpush.msra.mxu1 %v42_v2  ;;  %100 = vmatpush.msra.mxu0 %v42_v2  ;;  %v37_v62 = vld [vmem:[%s1385_s0 + $0x40] sm:$0xff] }
   0x7   :  { %949 = vmatpush.msra.mxu2 %v42_v2  ;;  %950 = vmatpush.msra.mxu3 %v42_v2 }
   0x8   :  { %951 = vmatpush.msra.mxu1 %v41_v3  ;;  %101 = vmatpush.msra.mxu0 %v41_v3 }
   0x9   :  { %911 = vmatmul.msk.f32.vlgmr.msra.gmra.mxu1 %vm49_vm0, %v36_v4  ;;  %904 = vmatmul.msk.f32.vlgmr.msra.gmra.mxu0 %vm49_vm0, %v29_v5  ;;  %v32_v4 = vld [vmem:[%s1385_s0 + $0x18] sm:$0xff] }
   0xa   :  { %172 = vmatpush.msrb.mxu1 %v1128_v6  ;;  %952 = vmatpush.msra.mxu2 %v41_v3 }
   0xb   :  { %953 = vmatpush.msra.mxu3 %v41_v3  ;;  %912 = vmatmul.msk.f32.vlgmr.msra.gmra.mxu2 %vm49_vm0, %v37_v62  ;;  %v31_v3 = vld [vmem:[%s1385_s0 + $0x10] sm:$0xff] }
   0xc   :  { %281 = vmatpush.msrb.mxu2 %v1128_v6  ;;  %173 = vmatpush.msrb.mxu1 %v1134_v7 }
   0xd   :  { %390 = vmatpush.msrb.mxu3 %v1128_v6 }
   0xe   :  { %282 = vmatpush.msrb.mxu2 %v1134_v7  ;;  %174 = vmatpush.msrb.mxu1 %v1141_v8 }
   0xf   :  { %391 = vmatpush.msrb.mxu3 %v1134_v7 }
  0x10   :  { %283 = vmatpush.msrb.mxu2 %v1141_v8  ;;  %175 = vmatpush.msrb.mxu1 %v1149_v9 }
  0x11   :  { %392 = vmatpush.msrb.mxu3 %v1141_v8  ;;  %176 = vmatmul.f32.vlgmr.msrb.gmra.mxu1 %v1059_v11 }
  0x12   :  { %905 = vmatmul.msk.f32.gmra.mxu0 %vm49_vm0, %v30_v10  ;;  %284 = vmatpush.msrb.mxu2 %v1149_v9 }
  0x13   :  { %393 = vmatpush.msrb.mxu3 %v1149_v9  ;;  %499 = vmatpush.msra.mxu1 %v1128_v6 }
  0x14   :  { %608 = vmatpush.msra.mxu2 %v1128_v6 }
  0x15   :  { %500 = vmatpush.msra.mxu1 %v1134_v7 }
  0x16   :  { %609 = vmatpush.msra.mxu2 %v1134_v7 }
  0x17   :  { %501 = vmatpush.msra.mxu1 %v1141_v8 }
  0x18   :  { %610 = vmatpush.msra.mxu2 %v1141_v8 }
  0x19   :  { %179 = vmatmul.f32.gmra.mxu1 %v1059_v11 }
  0x1a   :  { %502 = vmatpush.msra.mxu1 %v1149_v9  ;;  %611 = vmatpush.msra.mxu2 %v1149_v9 }
  0x1b   :  { %906 = vmatmul.msk.f32.gmra.mxu0 %vm49_vm0, %v31_v3  ;;  %v34_v3 = vld [vmem:[%s1385_s0 + $0x28] sm:$0xff] }
  0x23   :  { %907 = vmatmul.msk.f32.gmra.mxu0 %vm49_vm0, %v32_v4 }
  0x86   :  { %v1167_v12 = vpop.f32.mrf.mxu1  ;;  %v103_v13 = vpop.f32.mrf.mxu0 }
  0x87   :  { %v104_v15 = vadd.f32 %v1172_v14, %v103_v13 }
  0x8e   :  { %v177_v16 = vpop.f32.mrf.mxu1  ;;  %v1208_v11 = vpop.f32.mrf.mxu2 }
  0x8f   :  { %v178_v17 = vadd.f32 %v177_v16, %v104_v15  ;;  %v106_v18 = vpop.f32.mrf.mxu0 }
  0x90   :  { %v107_v19 = vadd.f32 %v1172_v14, %v106_v18 }
  0x91   :  { %959 = vtanh.f32 %v178_v17  ;;  %v916_v24 = vmul.f32 -1.442695, %v178_v17 }
  0x96   :  { %v180_v20 = vpop.f32.mrf.mxu1 }
  0x97   :  { %v960_v21 = vpop.eup %959  ;;  %v181_v22 = vadd.f32 %v180_v20, %v107_v19 }
  0x98   :  { %227 = vrot.lane.b32.xlu0 %v960_v21, %s1060_s27  ;;  %v109_v13 = vpop.f32.mrf.mxu0 }
  0x99   :  { %961 = vtanh.f32 %v181_v22  ;;  %v917_v25 = vmul.f32 -1.442695, %v181_v22  ;;  %v110_v15 = vadd.f32 %v1172_v14, %v109_v13 }
  0x9a   :  { %963 = vpow2.f32 %v916_v24 }
  0x9b   :  { %965 = vpow2.f32 %v917_v25 }
  0x9f   :  { %v962_v23 = vpop.eup %961 }
  0xa0   :  { %229 = vrot.lane.b32.xlu0 %v962_v23, %s1060_s27  ;;  %v964_v26 = vpop.eup %963  ;;  %v112_v18 = vpop.f32.mrf.mxu0 }
  0xa1   :  { %v189_v27 = vadd.f32 1.0, %v964_v26  ;;  %v966_v28 = vpop.eup %965  ;;  %v113_v19 = vadd.f32 %v1172_v14, %v112_v18 }
  0xa2   :  { %v190_v29 = vadd.f32 1.0, %v966_v28 }
  0xa3   :  { %967 = vrcp.f32 %v189_v27  ;;  %v202_v38 = vand.u32 2147483648, %v189_v27  ;;  %vm196_vm2 = vweird.f32 %v189_v27  ;;  %v200_v39 = vand.u32 2147483647, %v189_v27 }
  0xa4   :  { %969 = vrcp.f32 %v190_v29  ;;  %v217_v47 = vand.u32 2147483648, %v190_v29  ;;  %vm211_vm6 = vweird.f32 %v190_v29  ;;  %v215_v48 = vand.u32 2147483647, %v190_v29 }
  0xa5   :  { %v203_v42 = vor.u32 1.1754944e-38, %v202_v38  ;;  %vm201_vm4 = vcmp.eq.f32.partialorder %v200_v39, 8.507059e+37 }
  0xa6   :  { %v218_v50 = vor.u32 1.1754944e-38, %v217_v47  ;;  %vm216_vm8 = vcmp.eq.f32.partialorder %v215_v48, 8.507059e+37 }
  0xa9   :  { %v968_v30 = vpop.eup %967 }
  0xaa   :  { %v192_v31 = vmul.f32 %v968_v30, %v189_v27  ;;  %v970_v33 = vpop.eup %969  ;;  %vm197_vm1 = vweird.f32 %v968_v30 }
  0xab   :  { %v207_v35 = vmul.f32 %v970_v33, %v190_v29  ;;  %vm198_vm3 = vmor %vm196_vm2, %vm197_vm1  ;;  %vm212_vm5 = vweird.f32 %v970_v33 }
  0xac   :  { %v193_v32 = vsub.f32 1.0, %v192_v31  ;;  %vm213_vm7 = vmor %vm211_vm6, %vm212_vm5 }
  0xad   :  { %v208_v37 = vsub.f32 1.0, %v207_v35 }
  0xae   :  { %v194_v34 = vmul.f32 %v968_v30, %v193_v32 }
  0xaf   :  { %v209_v41 = vmul.f32 %v970_v33, %v208_v37 }
  0xb0   :  { %v195_v36 = vadd.f32 %v968_v30, %v194_v34 }
  0xb1   :  { %v210_v46 = vadd.f32 %v970_v33, %v209_v41 }
  0xb2   :  { %v199_v40 = vsel %vm198_vm3, %v968_v30, %v195_v36 }
  0xb3   :  { %v204_v44 = vsel %vm201_vm4, %v203_v42, %v199_v40  ;;  %v214_v49 = vsel %vm213_vm7, %v970_v33, %v210_v46 }
  0xb4   :  { %v219_v51 = vsel %vm216_vm8, %v218_v50, %v214_v49  ;;  %v223_v54 = vmul.f32 0.0, %v204_v44 }
  0xb5   :  { %v224_v57 = vmul.f32 0.0, %v219_v51 }
 0x10a   :  { %v228_v43 = vpop.permute.xlu0 %227 }
 0x10b   :  { %v233_v45 = vmul.f32 %v228_v43, %v204_v44 }
 0x10d   :  { %237 = vrot.lane.b32.xlu1 %v233_v45, %s1061_s3 }
 0x112   :  { %v230_v52 = vpop.permute.xlu0 %229 }
 0x113   :  { %v234_v53 = vmul.f32 %v230_v52, %v219_v51 }
 0x115   :  { %239 = vrot.lane.b32.xlu1 %v234_v53, %s1061_s3 }
 0x17f   :  { %v238_v55 = vpop.permute.xlu1 %237 }
 0x180   :  { %v1180_v56 = vadd.f32 %v238_v55, %v223_v54 }
 0x182   :  { %971 = vtanh.f32 %v1180_v56 }
 0x187   :  { %v240_v58 = vpop.permute.xlu1 %239 }
 0x188   :  { %v972_v59 = vpop.eup %971  ;;  %v1183_v60 = vadd.f32 %v240_v58, %v224_v57 }
 0x189   :  { %249 = vrot.lane.b32.xlu2 %v972_v59, %s1060_s27 }
 0x18a   :  { %973 = vtanh.f32 %v1183_v60 }
 0x190   :  { %v974_v61 = vpop.eup %973 }
 0x191   :  { %251 = vrot.lane.b32.xlu2 %v974_v61, %s1060_s27 }
 0x1e3   :  { %v250_v63 = vpop.permute.xlu2 %249 }
 0x1e4   :  { %v255_v0 = vmul.f32 %v250_v63, %v204_v44 }
 0x1e6   :  { %261 = vrot.lane.b32.xlu0 %v255_v0, %s1061_s3  ;;  %v40_v0 = vld [vmem:[%s1385_s0 + $0x58] sm:$0xff] }
 0x1eb   :  { %v252_v1 = vpop.permute.xlu2 %251 }
 0x1ec   :  { %v256_v2 = vmul.f32 %v252_v1, %v219_v51 }
 0x1ee   :  { %263 = vrot.lane.b32.xlu1 %v256_v2, %s1061_s3 }
 0x258   :  { %v262_v5 = vpop.permute.xlu0 %261 }
 0x259   :  { %918 = vmatmul.msk.f32.vlgmr.msrb.gmra.mxu2 %vm49_vm0, %v262_v5 }
 0x260   :  { %v264_v10 = vpop.permute.xlu1 %263 }
 0x261   :  { %919 = vmatmul.msk.f32.gmra.mxu2 %vm49_vm0, %v264_v10 }
 0x2dc   :  { %v286_v16 = vpop.f32.mrf.mxu2 }
 0x2dd   :  { %v287_v17 = vadd.f32 %v286_v16, %v110_v15 }
 0x2df   :  { %975 = vtanh.f32 %v287_v17  ;;  %v920_v24 = vmul.f32 -1.442695, %v287_v17 }
 0x2e4   :  { %v289_v20 = vpop.f32.mrf.mxu2 }
 0x2e5   :  { %v976_v21 = vpop.eup %975  ;;  %v290_v22 = vadd.f32 %v289_v20, %v113_v19 }
 0x2e6   :  { %336 = vrot.lane.b32.xlu2 %v976_v21, %s1060_s27 }
 0x2e7   :  { %977 = vtanh.f32 %v290_v22  ;;  %v921_v30 = vmul.f32 -1.442695, %v290_v22 }
 0x2e8   :  { %979 = vpow2.f32 %v920_v24 }
 0x2ed   :  { %v978_v23 = vpop.eup %977 }
 0x2ee   :  { %338 = vrot.lane.b32.xlu0 %v978_v23, %s1060_s27  ;;  %v980_v25 = vpop.eup %979 }
 0x2ef   :  { %v298_v26 = vadd.f32 1.0, %v980_v25 }
 0x2f1   :  { %981 = vrcp.f32 %v298_v26  ;;  %v311_v33 = vand.u32 2147483648, %v298_v26  ;;  %vm305_vm10 = vweird.f32 %v298_v26  ;;  %v309_v34 = vand.u32 2147483647, %v298_v26 }
 0x2f2   :  { %983 = vpow2.f32 %v921_v30 }
 0x2f3   :  { %v312_v37 = vor.u32 1.1754944e-38, %v311_v33  ;;  %vm310_vm12 = vcmp.eq.f32.partialorder %v309_v34, 8.507059e+37 }
 0x2f7   :  { %v982_v27 = vpop.eup %981 }
 0x2f8   :  { %v301_v28 = vmul.f32 %v982_v27, %v298_v26  ;;  %vm306_vm9 = vweird.f32 %v982_v27  ;;  %v984_v35 = vpop.eup %983 }
 0x2f9   :  { %vm307_vm11 = vmor %vm305_vm10, %vm306_vm9  ;;  %v299_v38 = vadd.f32 1.0, %v984_v35 }
 0x2fa   :  { %v302_v29 = vsub.f32 1.0, %v301_v28 }
 0x2fb   :  { %985 = vrcp.f32 %v299_v38  ;;  %v326_v47 = vand.u32 2147483648, %v299_v38  ;;  %vm320_vm14 = vweird.f32 %v299_v38  ;;  %v324_v48 = vand.u32 2147483647, %v299_v38 }
 0x2fc   :  { %v303_v31 = vmul.f32 %v982_v27, %v302_v29 }
 0x2fd   :  { %v327_v50 = vor.u32 1.1754944e-38, %v326_v47  ;;  %vm325_vm1 = vcmp.eq.f32.partialorder %v324_v48, 8.507059e+37 }
 0x2fe   :  { %v304_v32 = vadd.f32 %v982_v27, %v303_v31 }
 0x300   :  { %v308_v36 = vsel %vm307_vm11, %v982_v27, %v304_v32 }
 0x301   :  { %v313_v39 = vsel %vm310_vm12, %v312_v37, %v308_v36  ;;  %v986_v42 = vpop.eup %985 }
 0x302   :  { %v316_v43 = vmul.f32 %v986_v42, %v299_v38  ;;  %vm321_vm13 = vweird.f32 %v986_v42  ;;  %v332_v54 = vmul.f32 %v313_v39, %v1180_v56  ;;  %v38_v56 = vld [vmem:[%s1385_s0 + $0x48] sm:$0xff] }
 0x303   :  { %vm322_vm15 = vmor %vm320_vm14, %vm321_vm13  ;;  %913 = vmatmul.msk.f32.vlgmr.msra.gmra.mxu3 %vm49_vm0, %v38_v56 }
 0x304   :  { %v317_v44 = vsub.f32 1.0, %v316_v43  ;;  %717 = vmatpush.msra.mxu3 %v1128_v6 }
 0x306   :  { %v318_v45 = vmul.f32 %v986_v42, %v317_v44  ;;  %718 = vmatpush.msra.mxu3 %v1134_v7 }
 0x308   :  { %v319_v46 = vadd.f32 %v986_v42, %v318_v45  ;;  %719 = vmatpush.msra.mxu3 %v1141_v8  ;;  %v33_v8 = vld [vmem:[%s1385_s0 + $0x20] sm:$0xff] }
 0x309   :  { %908 = vmatmul.msk.f32.gmra.mxu0 %vm49_vm0, %v33_v8 }
 0x30a   :  { %v323_v49 = vsel %vm322_vm15, %v986_v42, %v319_v46  ;;  %720 = vmatpush.msra.mxu3 %v1149_v9 }
 0x30b   :  { %v328_v52 = vsel %vm325_vm1, %v327_v50, %v323_v49 }
 0x30c   :  { %v333_v58 = vmul.f32 %v328_v52, %v1183_v60  ;;  %v39_v60 = vld [vmem:[%s1385_s0 + $0x50] sm:$0xff] }
 0x30d   :  { %914 = vmatmul.msk.f32.gmra.mxu3 %vm49_vm0, %v39_v60 }
 0x311   :  { %909 = vmatmul.msk.f32.gmra.mxu0 %vm49_vm0, %v34_v3 }
 0x315   :  { %915 = vmatmul.msk.f32.gmra.mxu3 %vm49_vm0, %v40_v0 }
 0x340   :  { %v337_v40 = vpop.permute.xlu2 %336 }
 0x341   :  { %v342_v41 = vmul.f32 %v337_v40, %v313_v39 }
 0x343   :  { %346 = vrot.lane.b32.xlu1 %v342_v41, %s1061_s3 }
 0x360   :  { %v339_v51 = vpop.permute.xlu0 %338 }
 0x361   :  { %v343_v53 = vmul.f32 %v339_v51, %v328_v52 }
 0x363   :  { %348 = vrot.lane.b32.xlu2 %v343_v53, %s1061_s3 }
 0x386   :  { %v1254_v5 = vpop.f32.mrf.mxu3  ;;  %v115_v15 = vpop.f32.mrf.mxu0 }
 0x387   :  { %v116_v16 = vadd.f32 %v1172_v14, %v115_v15 }
 0x38e   :  { %v118_v20 = vpop.f32.mrf.mxu0 }
 0x38f   :  { %v119_v21 = vadd.f32 %v1172_v14, %v118_v20 }
 0x390   :  { %v1256_v10 = vpop.f32.mrf.mxu3 }
 0x398   :  { %v1258_v13 = vpop.f32.mrf.mxu3 }
 0x3b5   :  { %v347_v55 = vpop.permute.xlu1 %346 }
 0x3b6   :  { %v1217_v57 = vadd.f32 %v347_v55, %v332_v54 }
 0x3b8   :  { %987 = vtanh.f32 %v1217_v57 }
 0x3bd   :  { %v349_v59 = vpop.permute.xlu2 %348 }
 0x3be   :  { %v988_v61 = vpop.eup %987  ;;  %v1221_v62 = vadd.f32 %v349_v59, %v333_v58 }
 0x3bf   :  { %358 = vrot.lane.b32.xlu0 %v988_v61, %s1060_s27 }
 0x3c0   :  { %989 = vtanh.f32 %v1221_v62 }
 0x3c6   :  { %v990_v63 = vpop.eup %989 }
 0x3c7   :  { %360 = vrot.lane.b32.xlu1 %v990_v63, %s1060_s27 }
 0x431   :  { %v359_v1 = vpop.permute.xlu0 %358 }
 0x432   :  { %v364_v6 = vmul.f32 %v359_v1, %v313_v39 }
 0x434   :  { %370 = vrot.lane.b32.xlu2 %v364_v6, %s1061_s3  ;;  %v35_v6 = vld [vmem:[%s1385_s0 + $0x30] sm:$0xff] }
 0x435   :  { %910 = vmatmul.msk.f32.gmra.mxu0 %vm49_vm0, %v35_v6 }
 0x439   :  { %v361_v7 = vpop.permute.xlu1 %360 }
 0x43a   :  { %v365_v2 = vmul.f32 %v361_v7, %v328_v52 }
 0x43c   :  { %372 = vrot.lane.b32.xlu0 %v365_v2, %s1061_s3 }
 0x48e   :  { %v371_v9 = vpop.permute.xlu2 %370 }
 0x48f   :  { %922 = vmatmul.msk.f32.vlgmr.msrb.gmra.mxu3 %vm49_vm0, %v371_v9 }
 0x4ae   :  { %v373_v4 = vpop.permute.xlu0 %372 }
 0x4af   :  { %923 = vmatmul.msk.f32.gmra.mxu3 %vm49_vm0, %v373_v4 }
 0x4b2   :  { %v121_v9 = vpop.f32.mrf.mxu0 }
 0x4b3   :  { %v122_v3 = vadd.f32 %v1172_v14, %v121_v9 }
 0x512   :  { %v395_v17 = vpop.f32.mrf.mxu3 }
 0x513   :  { %v396_v18 = vadd.f32 %v395_v17, %v116_v16  ;;  %v125_v16 = vadd.f32 %v1172_v14, %v1167_v12 }
 0x515   :  { %991 = vtanh.f32 %v396_v18  ;;  %v924_v25 = vmul.f32 -1.442695, %v396_v18 }
 0x51b   :  { %v992_v19 = vpop.eup %991 }
 0x51c   :  { %445 = vrot.lane.b32.xlu1 %v992_v19, %s1060_s27 }
 0x532   :  { %v398_v22 = vpop.f32.mrf.mxu3 }
 0x533   :  { %v399_v23 = vadd.f32 %v398_v22, %v119_v21 }
 0x535   :  { %993 = vtanh.f32 %v399_v23  ;;  %v925_v26 = vmul.f32 -1.442695, %v399_v23 }
 0x536   :  { %995 = vpow2.f32 %v924_v25 }
 0x537   :  { %997 = vpow2.f32 %v925_v26 }
 0x53b   :  { %v994_v24 = vpop.eup %993 }
 0x53c   :  { %447 = vrot.lane.b32.xlu2 %v994_v24, %s1060_s27  ;;  %v996_v27 = vpop.eup %995 }
 0x53d   :  { %v407_v28 = vadd.f32 1.0, %v996_v27  ;;  %v998_v29 = vpop.eup %997 }
 0x53e   :  { %v408_v30 = vadd.f32 1.0, %v998_v29 }
 0x53f   :  { %999 = vrcp.f32 %v407_v28  ;;  %v420_v39 = vand.u32 2147483648, %v407_v28  ;;  %vm414_vm3 = vweird.f32 %v407_v28  ;;  %v418_v40 = vand.u32 2147483647, %v407_v28 }
 0x540   :  { %1001 = vrcp.f32 %v408_v30  ;;  %v435_v48 = vand.u32 2147483648, %v408_v30  ;;  %vm429_vm7 = vweird.f32 %v408_v30  ;;  %v433_v49 = vand.u32 2147483647, %v408_v30 }
 0x541   :  { %v421_v43 = vor.u32 1.1754944e-38, %v420_v39  ;;  %vm419_vm5 = vcmp.eq.f32.partialorder %v418_v40, 8.507059e+37 }
 0x542   :  { %v436_v51 = vor.u32 1.1754944e-38, %v435_v48  ;;  %vm434_vm9 = vcmp.eq.f32.partialorder %v433_v49, 8.507059e+37 }
 0x545   :  { %v1000_v31 = vpop.eup %999 }
 0x546   :  { %v410_v32 = vmul.f32 %v1000_v31, %v407_v28  ;;  %v1002_v34 = vpop.eup %1001  ;;  %vm415_vm2 = vweird.f32 %v1000_v31 }
 0x547   :  { %v425_v36 = vmul.f32 %v1002_v34, %v408_v30  ;;  %vm416_vm4 = vmor %vm414_vm3, %vm415_vm2  ;;  %vm430_vm6 = vweird.f32 %v1002_v34 }
 0x548   :  { %v411_v33 = vsub.f32 1.0, %v410_v32  ;;  %vm431_vm8 = vmor %vm429_vm7, %vm430_vm6 }
 0x549   :  { %v426_v38 = vsub.f32 1.0, %v425_v36 }
 0x54a   :  { %v412_v35 = vmul.f32 %v1000_v31, %v411_v33 }
 0x54b   :  { %v427_v42 = vmul.f32 %v1002_v34, %v426_v38 }
 0x54c   :  { %v413_v37 = vadd.f32 %v1000_v31, %v412_v35 }
 0x54d   :  { %v428_v47 = vadd.f32 %v1002_v34, %v427_v42 }
 0x54e   :  { %v417_v41 = vsel %vm416_vm4, %v1000_v31, %v413_v37 }
 0x54f   :  { %v422_v45 = vsel %vm419_vm5, %v421_v43, %v417_v41  ;;  %v432_v50 = vsel %vm431_vm8, %v1002_v34, %v428_v47 }
 0x550   :  { %v437_v53 = vsel %vm434_vm9, %v436_v51, %v432_v50  ;;  %v441_v55 = vmul.f32 %v422_v45, %v1217_v57 }
 0x551   :  { %v442_v61 = vmul.f32 %v437_v53, %v1221_v62 }
 0x58e   :  { %v446_v44 = vpop.permute.xlu1 %445 }
 0x58f   :  { %v451_v46 = vmul.f32 %v446_v44, %v422_v45 }
 0x591   :  { %455 = vrot.lane.b32.xlu0 %v451_v46, %s1061_s3 }
 0x596   :  { %v448_v52 = vpop.permute.xlu2 %447 }
 0x597   :  { %v452_v54 = vmul.f32 %v448_v52, %v437_v53 }
 0x599   :  { %457 = vrot.lane.b32.xlu1 %v452_v54, %s1061_s3 }
 0x603   :  { %v456_v58 = vpop.permute.xlu0 %455 }
 0x604   :  { %v1267_v59 = vadd.f32 %v456_v58, %v441_v55 }
 0x606   :  { %1003 = vtanh.f32 %v1267_v59 }
 0x60b   :  { %v458_v63 = vpop.permute.xlu1 %457 }
 0x60c   :  { %v1004_v56 = vpop.eup %1003  ;;  %v1271_v60 = vadd.f32 %v458_v63, %v442_v61 }
 0x60d   :  { %467 = vrot.lane.b32.xlu2 %v1004_v56, %s1060_s27 }
 0x60e   :  { %1005 = vtanh.f32 %v1271_v60 }
 0x614   :  { %v1006_v0 = vpop.eup %1005 }
 0x615   :  { %469 = vrot.lane.b32.xlu0 %v1006_v0, %s1060_s27 }
 0x667   :  { %v468_v1 = vpop.permute.xlu2 %467 }
 0x668   :  { %v473_v57 = vmul.f32 %v468_v1, %v422_v45 }
 0x66a   :  { %479 = vrot.lane.b32.xlu1 %v473_v57, %s1061_s3  ;;  %v128_v57 = vadd.f32 %v1172_v14, %v1208_v11 }
 0x687   :  { %v470_v62 = vpop.permute.xlu0 %469 }
 0x688   :  { %v474_v7 = vmul.f32 %v470_v62, %v437_v53 }
 0x68a   :  { %481 = vrot.lane.b32.xlu2 %v474_v7, %s1061_s3  ;;  %v131_v7 = vadd.f32 %v1172_v14, %v1254_v5 }
 0x6dc   :  { %v480_v2 = vpop.permute.xlu1 %479 }
 0x6dd   :  { %926 = vmatmul.msk.f32.vlgmr.msra.gmra.mxu1 %vm49_vm0, %v480_v2 }
 0x6e4   :  { %v482_v8 = vpop.permute.xlu2 %481 }
 0x6e5   :  { %927 = vmatmul.msk.f32.gmra.mxu1 %vm49_vm0, %v482_v8 }
 0x75a   :  { %v504_v4 = vpop.f32.mrf.mxu1 }
 0x75b   :  { %v505_v15 = vadd.f32 %v504_v4, %v122_v3 }
 0x75d   :  { %1007 = vtanh.f32 %v505_v15  ;;  %v928_v21 = vmul.f32 -1.442695, %v505_v15 }
 0x762   :  { %v507_v17 = vpop.f32.mrf.mxu1 }
 0x763   :  { %v1008_v18 = vpop.eup %1007  ;;  %v508_v19 = vadd.f32 %v507_v17, %v125_v16 }
 0x764   :  { %554 = vrot.lane.b32.xlu0 %v1008_v18, %s1060_s27 }
 0x765   :  { %1009 = vtanh.f32 %v508_v19  ;;  %v929_v22 = vmul.f32 -1.442695, %v508_v19 }
 0x766   :  { %1011 = vpow2.f32 %v928_v21 }
 0x767   :  { %1013 = vpow2.f32 %v929_v22 }
 0x76b   :  { %v1010_v20 = vpop.eup %1009 }
 0x76c   :  { %556 = vrot.lane.b32.xlu1 %v1010_v20, %s1060_s27  ;;  %v1012_v23 = vpop.eup %1011 }
 0x76d   :  { %v516_v24 = vadd.f32 1.0, %v1012_v23  ;;  %v1014_v25 = vpop.eup %1013 }
 0x76e   :  { %v517_v26 = vadd.f32 1.0, %v1014_v25 }
 0x76f   :  { %1015 = vrcp.f32 %v516_v24  ;;  %v529_v34 = vand.u32 2147483648, %v516_v24  ;;  %vm523_vm11 = vweird.f32 %v516_v24  ;;  %v527_v35 = vand.u32 2147483647, %v516_v24 }
 0x770   :  { %1017 = vrcp.f32 %v517_v26  ;;  %v544_v43 = vand.u32 2147483648, %v517_v26  ;;  %vm538_vm15 = vweird.f32 %v517_v26  ;;  %v542_v44 = vand.u32 2147483647, %v517_v26 }
 0x771   :  { %v530_v38 = vor.u32 1.1754944e-38, %v529_v34  ;;  %vm528_vm13 = vcmp.eq.f32.partialorder %v527_v35, 8.507059e+37 }
 0x772   :  { %v545_v46 = vor.u32 1.1754944e-38, %v544_v43  ;;  %vm543_vm2 = vcmp.eq.f32.partialorder %v542_v44, 8.507059e+37 }
 0x775   :  { %v1016_v27 = vpop.eup %1015 }
 0x776   :  { %v519_v12 = vmul.f32 %v1016_v27, %v516_v24  ;;  %v1018_v29 = vpop.eup %1017  ;;  %vm524_vm10 = vweird.f32 %v1016_v27 }
 0x777   :  { %v534_v31 = vmul.f32 %v1018_v29, %v517_v26  ;;  %vm525_vm12 = vmor %vm523_vm11, %vm524_vm10  ;;  %vm539_vm14 = vweird.f32 %v1018_v29 }
 0x778   :  { %v520_v28 = vsub.f32 1.0, %v519_v12  ;;  %vm540_vm1 = vmor %vm538_vm15, %vm539_vm14 }
 0x779   :  { %v535_v33 = vsub.f32 1.0, %v534_v31 }
 0x77a   :  { %v521_v30 = vmul.f32 %v1016_v27, %v520_v28 }
 0x77b   :  { %v536_v37 = vmul.f32 %v1018_v29, %v535_v33 }
 0x77c   :  { %v522_v32 = vadd.f32 %v1016_v27, %v521_v30 }
 0x77d   :  { %v537_v42 = vadd.f32 %v1018_v29, %v536_v37 }
 0x77e   :  { %v526_v36 = vsel %vm525_vm12, %v1016_v27, %v522_v32 }
 0x77f   :  { %v531_v40 = vsel %vm528_vm13, %v530_v38, %v526_v36  ;;  %v541_v45 = vsel %vm540_vm1, %v1018_v29, %v537_v42 }
 0x780   :  { %v546_v48 = vsel %vm543_vm2, %v545_v46, %v541_v45  ;;  %v550_v50 = vmul.f32 %v531_v40, %v1267_v59 }
 0x781   :  { %v551_v54 = vmul.f32 %v546_v48, %v1271_v60 }
 0x7d6   :  { %v555_v39 = vpop.permute.xlu0 %554 }
 0x7d7   :  { %v560_v41 = vmul.f32 %v555_v39, %v531_v40 }
 0x7d9   :  { %564 = vrot.lane.b32.xlu2 %v560_v41, %s1061_s3 }
 0x7de   :  { %v557_v47 = vpop.permute.xlu1 %556 }
 0x7df   :  { %v561_v49 = vmul.f32 %v557_v47, %v546_v48 }
 0x7e1   :  { %566 = vrot.lane.b32.xlu0 %v561_v49, %s1061_s3 }
 0x833   :  { %v565_v51 = vpop.permute.xlu2 %564 }
 0x834   :  { %v1292_v52 = vadd.f32 %v565_v51, %v550_v50 }
 0x836   :  { %1019 = vtanh.f32 %v1292_v52 }
 0x83c   :  { %v1020_v53 = vpop.eup %1019 }
 0x83d   :  { %576 = vrot.lane.b32.xlu1 %v1020_v53, %s1060_s27 }
 0x853   :  { %v567_v55 = vpop.permute.xlu0 %566 }
 0x854   :  { %v1297_v58 = vadd.f32 %v567_v55, %v551_v54  ;;  %v134_v55 = vadd.f32 %v1172_v14, %v1256_v10 }
 0x856   :  { %1021 = vtanh.f32 %v1297_v58 }
 0x85c   :  { %v1022_v61 = vpop.eup %1021 }
 0x85d   :  { %578 = vrot.lane.b32.xlu2 %v1022_v61, %s1060_s27 }
 0x8af   :  { %v577_v63 = vpop.permute.xlu1 %576 }
 0x8b0   :  { %v582_v59 = vmul.f32 %v577_v63, %v531_v40 }
 0x8b2   :  { %588 = vrot.lane.b32.xlu0 %v582_v59, %s1061_s3  ;;  %v137_v59 = vadd.f32 %v1172_v14, %v1258_v13 }
 0x8b7   :  { %v579_v56 = vpop.permute.xlu2 %578 }
 0x8b8   :  { %v583_v0 = vmul.f32 %v579_v56, %v546_v48 }
 0x8ba   :  { %590 = vrot.lane.b32.xlu1 %v583_v0, %s1061_s3 }
 0x924   :  { %v589_v1 = vpop.permute.xlu0 %588 }
 0x925   :  { %930 = vmatmul.msk.f32.vlgmr.msra.gmra.mxu2 %vm49_vm0, %v589_v1 }
 0x92c   :  { %v591_v60 = vpop.permute.xlu1 %590 }
 0x92d   :  { %931 = vmatmul.msk.f32.gmra.mxu2 %vm49_vm0, %v591_v60 }
 0x9a8   :  { %v613_v6 = vpop.f32.mrf.mxu2 }
 0x9a9   :  { %v614_v62 = vadd.f32 %v613_v6, %v128_v57 }
 0x9ab   :  { %1023 = vtanh.f32 %v614_v62  ;;  %v932_v4 = vmul.f32 -1.442695, %v614_v62 }
 0x9b0   :  { %v616_v2 = vpop.f32.mrf.mxu2 }
 0x9b1   :  { %v1024_v8 = vpop.eup %1023  ;;  %v617_v9 = vadd.f32 %v616_v2, %v131_v7 }
 0x9b2   :  { %663 = vrot.lane.b32.xlu2 %v1024_v8, %s1060_s27 }
 0x9b3   :  { %1025 = vtanh.f32 %v617_v9  ;;  %v933_v19 = vmul.f32 -1.442695, %v617_v9 }
 0x9b4   :  { %1027 = vpow2.f32 %v932_v4 }
 0x9b9   :  { %v1026_v3 = vpop.eup %1025 }
 0x9ba   :  { %665 = vrot.lane.b32.xlu0 %v1026_v3, %s1060_s27  ;;  %v1028_v15 = vpop.eup %1027 }
 0x9bb   :  { %v625_v16 = vadd.f32 1.0, %v1028_v15 }
 0x9bd   :  { %1029 = vrcp.f32 %v625_v16  ;;  %v638_v21 = vand.u32 2147483648, %v625_v16  ;;  %vm632_vm4 = vweird.f32 %v625_v16  ;;  %v636_v22 = vand.u32 2147483647, %v625_v16 }
 0x9be   :  { %1031 = vpow2.f32 %v933_v19 }
 0x9bf   :  { %v639_v25 = vor.u32 1.1754944e-38, %v638_v21  ;;  %vm637_vm6 = vcmp.eq.f32.partialorder %v636_v22, 8.507059e+37 }
 0x9c3   :  { %v1030_v11 = vpop.eup %1029 }
 0x9c4   :  { %v628_v17 = vmul.f32 %v1030_v11, %v625_v16  ;;  %vm633_vm3 = vweird.f32 %v1030_v11  ;;  %v1032_v23 = vpop.eup %1031 }
 0x9c5   :  { %vm634_vm5 = vmor %vm632_vm4, %vm633_vm3  ;;  %v626_v26 = vadd.f32 1.0, %v1032_v23 }
 0x9c6   :  { %v629_v18 = vsub.f32 1.0, %v628_v17 }
 0x9c7   :  { %1033 = vrcp.f32 %v626_v26  ;;  %v653_v34 = vand.u32 2147483648, %v626_v26  ;;  %vm647_vm8 = vweird.f32 %v626_v26  ;;  %v651_v35 = vand.u32 2147483647, %v626_v26 }
 0x9c8   :  { %v630_v20 = vmul.f32 %v1030_v11, %v629_v18 }
 0x9c9   :  { %v654_v37 = vor.u32 1.1754944e-38, %v653_v34  ;;  %vm652_vm10 = vcmp.eq.f32.partialorder %v651_v35, 8.507059e+37 }
 0x9ca   :  { %v631_v5 = vadd.f32 %v1030_v11, %v630_v20 }
 0x9cc   :  { %v635_v24 = vsel %vm634_vm5, %v1030_v11, %v631_v5 }
 0x9cd   :  { %v640_v27 = vsel %vm637_vm6, %v639_v25, %v635_v24  ;;  %v1034_v29 = vpop.eup %1033 }
 0x9ce   :  { %v643_v30 = vmul.f32 %v1034_v29, %v626_v26  ;;  %vm648_vm7 = vweird.f32 %v1034_v29  ;;  %v659_v41 = vmul.f32 %v640_v27, %v1292_v52 }
 0x9cf   :  { %vm649_vm9 = vmor %vm647_vm8, %vm648_vm7 }
 0x9d0   :  { %v644_v31 = vsub.f32 1.0, %v643_v30 }
 0x9d2   :  { %v645_v32 = vmul.f32 %v1034_v29, %v644_v31 }
 0x9d4   :  { %v646_v33 = vadd.f32 %v1034_v29, %v645_v32 }
 0x9d6   :  { %v650_v36 = vsel %vm649_vm9, %v1034_v29, %v646_v33 }
 0x9d7   :  { %v655_v39 = vsel %vm652_vm10, %v654_v37, %v650_v36 }
 0x9d8   :  { %v660_v44 = vmul.f32 %v655_v39, %v1297_v58 }
 0xa0c   :  { %v664_v12 = vpop.permute.xlu2 %663 }
 0xa0d   :  { %v669_v28 = vmul.f32 %v664_v12, %v640_v27 }
 0xa0f   :  { %673 = vrot.lane.b32.xlu1 %v669_v28, %s1061_s3 }
 0xa2c   :  { %v666_v38 = vpop.permute.xlu0 %665 }
 0xa2d   :  { %v670_v40 = vmul.f32 %v666_v38, %v655_v39 }
 0xa2f   :  { %675 = vrot.lane.b32.xlu2 %v670_v40, %s1061_s3  ;;  %v806_v40 = vld [vmem:[%s1388_s5 + $0x10] sm:$0xff] }
 0xa81   :  { %v674_v42 = vpop.permute.xlu1 %673 }
 0xa82   :  { %v1314_v43 = vadd.f32 %v674_v42, %v659_v41  ;;  %v811_v41 = vld [vmem:[%s1389_s6 + $0x18] sm:$0xff]  ;;  %v810_v42 = vld [vmem:[%s1389_s6 + $0x10] sm:$0xff] }
 0xa83   :  { %834 = vmatpush.msrb.mxu1 %v811_v41 }
 0xa84   :  { %1035 = vtanh.f32 %v1314_v43 }
 0xa85   :  { %835 = vmatpush.msrb.mxu1 %v810_v42 }
 0xa89   :  { %v676_v45 = vpop.permute.xlu2 %675 }
 0xa8a   :  { %v1036_v46 = vpop.eup %1035  ;;  %v1318_v47 = vadd.f32 %v676_v45, %v660_v44  ;;  %v809_v44 = vld [vmem:[%s1389_s6 + $0x8] sm:$0xff]  ;;  %v804_v45 = vld [vmem:[%s1388_s5] sm:$0xff] }
 0xa8b   :  { %685 = vrot.lane.b32.xlu0 %v1036_v46, %s1060_s27  ;;  %v808_v46 = vld [vmem:[%s1389_s6] sm:$0xff]  ;;  %836 = vmatpush.msrb.mxu1 %v809_v44 }
 0xa8c   :  { %1037 = vtanh.f32 %v1318_v47 }
 0xa8d   :  { %837 = vmatpush.msrb.mxu1 %v808_v46 }
 0xa92   :  { %v1038_v48 = vpop.eup %1037 }
 0xa93   :  { %687 = vrot.lane.b32.xlu1 %v1038_v48, %s1060_s27 }
 0xafd   :  { %v686_v49 = vpop.permute.xlu0 %685 }
 0xafe   :  { %v691_v50 = vmul.f32 %v686_v49, %v640_v27 }
 0xb00   :  { %697 = vrot.lane.b32.xlu2 %v691_v50, %s1061_s3  ;;  %v803_v50 = vld [vmem:[%s1390_s4 + $0x8] sm:$0xff] }
 0xb05   :  { %v688_v51 = vpop.permute.xlu1 %687 }
 0xb06   :  { %v692_v52 = vmul.f32 %v688_v51, %v655_v39  ;;  %v807_v39 = vld [vmem:[%s1388_s5 + $0x18] sm:$0xff] }
 0xb07   :  { %863 = vmatpush.msrb.mxu2 %v807_v39 }
 0xb08   :  { %699 = vrot.lane.b32.xlu0 %v692_v52, %s1061_s3 }
 0xb09   :  { %864 = vmatpush.msrb.mxu2 %v806_v40 }
 0xb5a   :  { %v698_v53 = vpop.permute.xlu2 %697 }
 0xb5b   :  { %934 = vmatmul.msk.f32.vlgmr.msra.gmra.mxu3 %vm49_vm0, %v698_v53 }
 0xb7a   :  { %v700_v54 = vpop.permute.xlu0 %699 }
 0xb7b   :  { %935 = vmatmul.msk.f32.gmra.mxu3 %vm49_vm0, %v700_v54  ;;  %v958_v54 = vld [vmem:[%s1391_s7] ss:$0 sm:$0xff] }
 0xbde   :  { %v722_v58 = vpop.f32.mrf.mxu3 }
 0xbdf   :  { %v723_v61 = vadd.f32 %v722_v58, %v134_v55 }
 0xbe1   :  { %1039 = vtanh.f32 %v723_v61  ;;  %v936_v60 = vmul.f32 -1.442695, %v723_v61 }
 0xbe7   :  { %v1040_v63 = vpop.eup %1039 }
 0xbe8   :  { %772 = vrot.lane.b32.xlu1 %v1040_v63, %s1060_s27 }
 0xbfe   :  { %v725_v56 = vpop.f32.mrf.mxu3 }
 0xbff   :  { %v726_v0 = vadd.f32 %v725_v56, %v137_v59 }
 0xc01   :  { %1041 = vtanh.f32 %v726_v0  ;;  %v937_v57 = vmul.f32 -1.442695, %v726_v0 }
 0xc02   :  { %1043 = vpow2.f32 %v936_v60 }
 0xc03   :  { %1045 = vpow2.f32 %v937_v57 }
 0xc07   :  { %v1042_v1 = vpop.eup %1041 }
 0xc08   :  { %774 = vrot.lane.b32.xlu2 %v1042_v1, %s1060_s27  ;;  %v1044_v6 = vpop.eup %1043 }
 0xc09   :  { %v734_v10 = vadd.f32 1.0, %v1044_v6  ;;  %v1046_v62 = vpop.eup %1045 }
 0xc0a   :  { %v735_v7 = vadd.f32 1.0, %v1046_v62 }
 0xc0b   :  { %1047 = vrcp.f32 %v734_v10  ;;  %v747_v16 = vand.u32 2147483648, %v734_v10  ;;  %vm741_vm12 = vweird.f32 %v734_v10  ;;  %v745_v11 = vand.u32 2147483647, %v734_v10 }
 0xc0c   :  { %1049 = vrcp.f32 %v735_v7  ;;  %v762_v23 = vand.u32 2147483648, %v735_v7  ;;  %vm756_vm1 = vweird.f32 %v735_v7  ;;  %v760_v24 = vand.u32 2147483647, %v735_v7 }
 0xc0d   :  { %v748_v19 = vor.u32 1.1754944e-38, %v747_v16  ;;  %vm746_vm14 = vcmp.eq.f32.partialorder %v745_v11, 8.507059e+37 }
 0xc0e   :  { %v763_v26 = vor.u32 1.1754944e-38, %v762_v23  ;;  %vm761_vm3 = vcmp.eq.f32.partialorder %v760_v24, 8.507059e+37 }
 0xc11   :  { %v1048_v2 = vpop.eup %1047 }
 0xc12   :  { %v737_v8 = vmul.f32 %v1048_v2, %v734_v10  ;;  %v1050_v14 = vpop.eup %1049  ;;  %vm742_vm11 = vweird.f32 %v1048_v2 }
 0xc13   :  { %v752_v3 = vmul.f32 %v1050_v14, %v735_v7  ;;  %vm743_vm13 = vmor %vm741_vm12, %vm742_vm11  ;;  %vm757_vm15 = vweird.f32 %v1050_v14 }
 0xc14   :  { %v738_v9 = vsub.f32 1.0, %v737_v8  ;;  %vm758_vm2 = vmor %vm756_vm1, %vm757_vm15 }
 0xc15   :  { %v753_v15 = vsub.f32 1.0, %v752_v3 }
 0xc16   :  { %v739_v13 = vmul.f32 %v1048_v2, %v738_v9 }
 0xc17   :  { %v754_v18 = vmul.f32 %v1050_v14, %v753_v15 }
 0xc18   :  { %v740_v4 = vadd.f32 %v1048_v2, %v739_v13 }
 0xc19   :  { %v755_v22 = vadd.f32 %v1050_v14, %v754_v18 }
 0xc1a   :  { %v744_v17 = vsel %vm743_vm13, %v1048_v2, %v740_v4 }
 0xc1b   :  { %v749_v5 = vsel %vm746_vm14, %v748_v19, %v744_v17  ;;  %v759_v25 = vsel %vm758_vm2, %v1050_v14, %v755_v22 }
 0xc1c   :  { %v764_v12 = vsel %vm761_vm3, %v763_v26, %v759_v25  ;;  %v768_v29 = vmul.f32 %v749_v5, %v1314_v43  ;;  %v805_v43 = vld [vmem:[%s1388_s5 + $0x8] sm:$0xff] }
 0xc1d   :  { %v769_v32 = vmul.f32 %v764_v12, %v1318_v47  ;;  %865 = vmatpush.msrb.mxu2 %v805_v43  ;;  %v802_v47 = vld [vmem:[%s1390_s4] sm:$0xff] }
 0xc1f   :  { %866 = vmatpush.msrb.mxu2 %v804_v45 }
 0xc20   :  { %940 = vmatmul.msk.f32.vlgmr.msrb.gmra.mxu2 %vm49_vm0, %v802_v47 }
 0xc28   :  { %941 = vmatmul.msk.f32.gmra.mxu2 %vm49_vm0, %v803_v50 }
 0xc5a   :  { %v773_v20 = vpop.permute.xlu1 %772 }
 0xc5b   :  { %v778_v21 = vmul.f32 %v773_v20, %v749_v5 }
 0xc5d   :  { %782 = vrot.lane.b32.xlu0 %v778_v21, %s1061_s3 }
 0xc62   :  { %v775_v27 = vpop.permute.xlu2 %774 }
 0xc63   :  { %v779_v28 = vmul.f32 %v775_v27, %v764_v12 }
 0xc65   :  { %784 = vrot.lane.b32.xlu1 %v779_v28, %s1061_s3 }
 0xca3   :  { %v868_v53 = vpop.f32.mrf.mxu2 }
 0xcab   :  { %v871_v59 = vpop.f32.mrf.mxu2 }
 0xccf   :  { %v783_v30 = vpop.permute.xlu0 %782 }
 0xcd0   :  { %v788_v31 = vadd.f32 %v783_v30, %v768_v29 }
 0xcd2   :  { %1051 = vtanh.f32 %v788_v31 }
 0xcd7   :  { %v785_v33 = vpop.permute.xlu1 %784 }
 0xcd8   :  { %v1052_v34 = vpop.eup %1051  ;;  %v789_v35 = vadd.f32 %v785_v33, %v769_v32 }
 0xcd9   :  { %794 = vrot.lane.b32.xlu2 %v1052_v34, %s1060_s27 }
 0xcda   :  { %1053 = vtanh.f32 %v789_v35 }
 0xce0   :  { %v1054_v36 = vpop.eup %1053 }
 0xce1   :  { %796 = vrot.lane.b32.xlu0 %v1054_v36, %s1060_s27 }
 0xd33   :  { %v795_v37 = vpop.permute.xlu2 %794 }
 0xd34   :  { %v800_v38 = vmul.f32 %v795_v37, %v749_v5 }
 0xd36   :  { %814 = vrot.lane.b32.xlu1 %v800_v38, %s1061_s3 }
 0xd53   :  { %v797_v48 = vpop.permute.xlu0 %796 }
 0xd54   :  { %v801_v49 = vmul.f32 %v797_v48, %v764_v12 }
 0xd56   :  { %816 = vrot.lane.b32.xlu2 %v801_v49, %s1061_s3 }
 0xda8   :  { %v815_v51 = vpop.permute.xlu1 %814 }
 0xda9   :  { %938 = vmatmul.msk.f32.vlgmr.msrb.gmra.mxu1 %vm49_vm0, %v815_v51 }
 0xdb0   :  { %v817_v52 = vpop.permute.xlu2 %816 }
 0xdb1   :  { %939 = vmatmul.msk.f32.gmra.mxu1 %vm49_vm0, %v817_v52 }
 0xe26   :  { %v839_v55 = vpop.f32.mrf.mxu1 }
 0xe27   :  { %v869_v58 = vadd.f32 %v868_v53, %v839_v55 }
 0xe29   :  { %v878_v61 = vadd.f32 %v958_v54, %v869_v58 }
 0xe2b   :  { %v882_v63 = vmul.f32 0.044715, %v878_v61  ;;  %v880_v13 = vmul.f32 0.5, %v878_v61 }
 0xe2d   :  { %v884_v56 = vmul.f32 %v882_v63, %v878_v61 }
 0xe2e   :  { %v842_v0 = vpop.f32.mrf.mxu1 }
 0xe2f   :  { %v886_v1 = vmul.f32 %v884_v56, %v878_v61  ;;  %v872_v60 = vadd.f32 %v871_v59, %v842_v0 }
 0xe31   :  { %v888_v57 = vadd.f32 %v886_v1, %v878_v61  ;;  %v879_v6 = vadd.f32 %v958_v54, %v872_v60 }
 0xe33   :  { %v890_v10 = vmul.f32 0.7978846, %v888_v57  ;;  %v883_v62 = vmul.f32 0.044715, %v879_v6  ;;  %v881_v16 = vmul.f32 0.5, %v879_v6 }
 0xe35   :  { %1055 = vtanh.f32 %v890_v10  ;;  %v885_v7 = vmul.f32 %v883_v62, %v879_v6 }
 0xe37   :  { %v887_v2 = vmul.f32 %v885_v7, %v879_v6 }
 0xe39   :  { %v889_v8 = vadd.f32 %v887_v2, %v879_v6 }
 0xe3b   :  { %v1056_v9 = vpop.eup %1055  ;;  %v891_v14 = vmul.f32 0.7978846, %v889_v8 }
 0xe3c   :  { %v894_v3 = vadd.f32 1.0, %v1056_v9 }
 0xe3d   :  { %1057 = vtanh.f32 %v891_v14 }
 0xe3e   :  { %v896_v4 = vmul.f32 %v894_v3, %v880_v13 }
 0xe40   :  { %898 = vst [vmem:[%s1392_s8] sm:$0xff] %v896_v4 }
 0xe43   :  { %v1058_v15 = vpop.eup %1057 }
 0xe44   :  { %v895_v11 = vadd.f32 1.0, %v1058_v15 }
 0xe46   :  { %v897_v17 = vmul.f32 %v895_v11, %v881_v16 }
 0xe48   :  { %899 = vst [vmem:[%s1392_s8 + $0x8] sm:$0xff] %v897_v17 }

// kernel: sequence_tagger_forward.3
= control target key start
LH: loop header
LB: loop body
LE: loop exit
PB: predicated region body
PF: predicated region fallthrough
CT: control target
= control target key end

     0   :  { %vm314_vm8 = vcmask 253952   ;;  %vm218_vm9 = vcmask 523264   ;;  %s3248_s1 = inlined_call_operand.vmem [shape: f32[256,256], index: 1, kind: input, shape index: {}]   ;;  %s3249_s0 = inlined_call_operand.vmem [shape: f32[16,256], index: 0, kind: input, shape index: {}]   ;;  %s3250_s2 = inlined_call_operand.vmem [shape: f32[64,256], index: 2, kind: input, shape index: {}]   ;;  %s3251_s3 = inlined_call_operand.vmem [shape: f32[1,256], index: 3, kind: input, shape index: {}]   ;;  %s3252_s4 = inlined_call_operand.vmem [shape: f32[32,128], index: 4, kind: input, shape index: {}]   ;;  %s3253_s5 = inlined_call_operand.vmem [shape: f32[32,128], index: 5, kind: input, shape index: {}]   ;;  %s3254_s6 = inlined_call_operand.vmem [shape: f32[1,128], index: 6, kind: input, shape index: {}]   ;;  %s3255_s7 = inlined_call_operand.vmem [shape: f32[16,128], index: 7, kind: output, shape index: {}]  }
   0x1   :  { %v61_v0 = vld [vmem:[%s3248_s1 + $0xf8] sm:$0xff]  ;;  %v59_v1 = vld [vmem:[%s3248_s1 + $0xe8] sm:$0xff]  ;;  %v60_v3 = vld [vmem:[%s3248_s1 + $0xf0] sm:$0xff] }
   0x2   :  { %v93_v2 = vld [vmem:[%s3248_s1 + $0x1f8] sm:$0xff]  ;;  %146 = vmatpush.msra.mxu2 %v61_v0  ;;  %v92_v4 = vld [vmem:[%s3248_s1 + $0x1f0] sm:$0xff]  ;;  %100 = vmatpush.msra.mxu0 %v60_v3  ;;  %v91_v6 = vld [vmem:[%s3248_s1 + $0x1e8] sm:$0xff] }
   0x3   :  { %169 = vmatpush.msra.mxu3 %v93_v2  ;;  %v57_v5 = vld [vmem:[%s3248_s1 + $0xd8] sm:$0xff]  ;;  %123 = vmatpush.msra.mxu1 %v92_v4  ;;  %v58_v7 = vld [vmem:[%s3248_s1 + $0xe0] sm:$0xff]  ;;  %v56_v10 = vld [vmem:[%s3248_s1 + $0xd0] sm:$0xff] }
   0x4   :  { %v90_v8 = vld [vmem:[%s3248_s1 + $0x1e0] sm:$0xff]  ;;  %147 = vmatpush.msra.mxu2 %v59_v1  ;;  %v89_v9 = vld [vmem:[%s3248_s1 + $0x1d8] sm:$0xff]  ;;  %101 = vmatpush.msra.mxu0 %v58_v7  ;;  %v55_v11 = vld [vmem:[%s3248_s1 + $0xc8] sm:$0xff] }
   0x5   :  { %170 = vmatpush.msra.mxu3 %v91_v6  ;;  %124 = vmatpush.msra.mxu1 %v90_v8  ;;  %v88_v12 = vld [vmem:[%s3248_s1 + $0x1d0] sm:$0xff]  ;;  %v87_v13 = vld [vmem:[%s3248_s1 + $0x1c8] sm:$0xff]  ;;  %v54_v14 = vld [vmem:[%s3248_s1 + $0xc0] sm:$0xff] }
   0x6   :  { %148 = vmatpush.msra.mxu2 %v57_v5  ;;  %v86_v15 = vld [vmem:[%s3248_s1 + $0x1c0] sm:$0xff]  ;;  %102 = vmatpush.msra.mxu0 %v56_v10  ;;  %v53_v16 = vld [vmem:[%s3248_s1 + $0xb8] sm:$0xff]  ;;  %v52_v18 = vld [vmem:[%s3248_s1 + $0xb0] sm:$0xff] }
   0x7   :  { %171 = vmatpush.msra.mxu3 %v89_v9  ;;  %125 = vmatpush.msra.mxu1 %v88_v12  ;;  %v85_v17 = vld [vmem:[%s3248_s1 + $0x1b8] sm:$0xff]  ;;  %v84_v19 = vld [vmem:[%s3248_s1 + $0x1b0] sm:$0xff]  ;;  %v51_v20 = vld [vmem:[%s3248_s1 + $0xa8] sm:$0xff] }
   0x8   :  { %149 = vmatpush.msra.mxu2 %v55_v11  ;;  %103 = vmatpush.msra.mxu0 %v54_v14  ;;  %v83_v21 = vld [vmem:[%s3248_s1 + $0x1a8] sm:$0xff]  ;;  %v50_v22 = vld [vmem:[%s3248_s1 + $0xa0] sm:$0xff]  ;;  %v49_v24 = vld [vmem:[%s3248_s1 + $0x98] sm:$0xff] }
   0x9   :  { %172 = vmatpush.msra.mxu3 %v87_v13  ;;  %126 = vmatpush.msra.mxu1 %v86_v15  ;;  %v82_v23 = vld [vmem:[%s3248_s1 + $0x1a0] sm:$0xff]  ;;  %v81_v25 = vld [vmem:[%s3248_s1 + $0x198] sm:$0xff]  ;;  %v48_v26 = vld [vmem:[%s3248_s1 + $0x90] sm:$0xff] }
   0xa   :  { %150 = vmatpush.msra.mxu2 %v53_v16  ;;  %104 = vmatpush.msra.mxu0 %v52_v18  ;;  %v80_v27 = vld [vmem:[%s3248_s1 + $0x190] sm:$0xff]  ;;  %v47_v28 = vld [vmem:[%s3248_s1 + $0x88] sm:$0xff]  ;;  %v46_v30 = vld [vmem:[%s3248_s1 + $0x80] sm:$0xff] }
   0xb   :  { %173 = vmatpush.msra.mxu3 %v85_v17  ;;  %127 = vmatpush.msra.mxu1 %v84_v19  ;;  %v79_v29 = vld [vmem:[%s3248_s1 + $0x188] sm:$0xff]  ;;  %v78_v31 = vld [vmem:[%s3248_s1 + $0x180] sm:$0xff]  ;;  %v45_v32 = vld [vmem:[%s3248_s1 + $0x78] sm:$0xff] }
   0xc   :  { %151 = vmatpush.msra.mxu2 %v51_v20  ;;  %105 = vmatpush.msra.mxu0 %v50_v22  ;;  %v77_v33 = vld [vmem:[%s3248_s1 + $0x178] sm:$0xff]  ;;  %v44_v34 = vld [vmem:[%s3248_s1 + $0x70] sm:$0xff]  ;;  %v43_v36 = vld [vmem:[%s3248_s1 + $0x68] sm:$0xff]  ;;  %v2327_v20 = vmov 0.0  }
   0xd   :  { %174 = vmatpush.msra.mxu3 %v83_v21  ;;  %128 = vmatpush.msra.mxu1 %v82_v23  ;;  %v76_v35 = vld [vmem:[%s3248_s1 + $0x170] sm:$0xff]  ;;  %v75_v37 = vld [vmem:[%s3248_s1 + $0x168] sm:$0xff]  ;;  %v42_v38 = vld [vmem:[%s3248_s1 + $0x60] sm:$0xff] }
   0xe   :  { %152 = vmatpush.msra.mxu2 %v49_v24  ;;  %106 = vmatpush.msra.mxu0 %v48_v26  ;;  %v74_v39 = vld [vmem:[%s3248_s1 + $0x160] sm:$0xff]  ;;  %v41_v40 = vld [vmem:[%s3248_s1 + $0x58] sm:$0xff]  ;;  %v40_v42 = vld [vmem:[%s3248_s1 + $0x50] sm:$0xff] }
   0xf   :  { %175 = vmatpush.msra.mxu3 %v81_v25  ;;  %129 = vmatpush.msra.mxu1 %v80_v27  ;;  %v73_v41 = vld [vmem:[%s3248_s1 + $0x158] sm:$0xff]  ;;  %v72_v43 = vld [vmem:[%s3248_s1 + $0x150] sm:$0xff]  ;;  %v39_v44 = vld [vmem:[%s3248_s1 + $0x48] sm:$0xff] }
  0x10   :  { %153 = vmatpush.msra.mxu2 %v47_v28  ;;  %107 = vmatpush.msra.mxu0 %v46_v30  ;;  %v71_v45 = vld [vmem:[%s3248_s1 + $0x148] sm:$0xff]  ;;  %v38_v46 = vld [vmem:[%s3248_s1 + $0x40] sm:$0xff]  ;;  %v37_v48 = vld [vmem:[%s3248_s1 + $0x38] sm:$0xff] }
  0x11   :  { %176 = vmatpush.msra.mxu3 %v79_v29  ;;  %130 = vmatpush.msra.mxu1 %v78_v31  ;;  %v70_v47 = vld [vmem:[%s3248_s1 + $0x140] sm:$0xff]  ;;  %v69_v49 = vld [vmem:[%s3248_s1 + $0x138] sm:$0xff]  ;;  %v36_v50 = vld [vmem:[%s3248_s1 + $0x30] sm:$0xff] }
  0x12   :  { %154 = vmatpush.msra.mxu2 %v45_v32  ;;  %108 = vmatpush.msra.mxu0 %v44_v34  ;;  %v68_v51 = vld [vmem:[%s3248_s1 + $0x130] sm:$0xff]  ;;  %v35_v52 = vld [vmem:[%s3248_s1 + $0x28] sm:$0xff]  ;;  %v34_v54 = vld [vmem:[%s3248_s1 + $0x20] sm:$0xff] }
  0x13   :  { %177 = vmatpush.msra.mxu3 %v77_v33  ;;  %131 = vmatpush.msra.mxu1 %v76_v35  ;;  %v67_v53 = vld [vmem:[%s3248_s1 + $0x128] sm:$0xff]  ;;  %v66_v55 = vld [vmem:[%s3248_s1 + $0x120] sm:$0xff]  ;;  %v33_v56 = vld [vmem:[%s3248_s1 + $0x18] sm:$0xff] }
  0x14   :  { %155 = vmatpush.msra.mxu2 %v43_v36  ;;  %109 = vmatpush.msra.mxu0 %v42_v38  ;;  %v65_v57 = vld [vmem:[%s3248_s1 + $0x118] sm:$0xff]  ;;  %v32_v58 = vld [vmem:[%s3248_s1 + $0x10] sm:$0xff]  ;;  %v31_v60 = vld [vmem:[%s3248_s1 + $0x8] sm:$0xff] }
  0x15   :  { %178 = vmatpush.msra.mxu3 %v75_v37  ;;  %132 = vmatpush.msra.mxu1 %v74_v39  ;;  %v64_v59 = vld [vmem:[%s3248_s1 + $0x110] sm:$0xff]  ;;  %v63_v61 = vld [vmem:[%s3248_s1 + $0x108] sm:$0xff]  ;;  %v26_v62 = vld [vmem:[%s3249_s0] sm:$0xff] }
  0x16   :  { %156 = vmatpush.msra.mxu2 %v41_v40  ;;  %110 = vmatpush.msra.mxu0 %v40_v42  ;;  %v27_v63 = vld [vmem:[%s3249_s0 + $0x8] sm:$0xff]  ;;  %v30_v0 = vld [vmem:[%s3248_s1] sm:$0xff]  ;;  %v2571_v2 = vld [vmem:[%s3250_s2 + $0x70] sm:$0xff] }
  0x17   :  { %179 = vmatpush.msra.mxu3 %v73_v41  ;;  %133 = vmatpush.msra.mxu1 %v72_v43  ;;  %v62_v1 = vld [vmem:[%s3248_s1 + $0x100] sm:$0xff]  ;;  %v2576_v3 = vld [vmem:[%s3250_s2 + $0x78] sm:$0xff]  ;;  %v2586_v5 = vld [vmem:[%s3250_s2 + $0x68] sm:$0xff] }
  0x18   :  { %157 = vmatpush.msra.mxu2 %v39_v44  ;;  %111 = vmatpush.msra.mxu0 %v38_v46  ;;  %v2581_v4 = vld [vmem:[%s3250_s2 + $0x60] sm:$0xff]  ;;  %v2593_v6 = vld [vmem:[%s3250_s2 + $0x50] sm:$0xff]  ;;  %v2598_v7 = vld [vmem:[%s3250_s2 + $0x58] sm:$0xff] }
  0x19   :  { %180 = vmatpush.msra.mxu3 %v71_v45  ;;  %134 = vmatpush.msra.mxu1 %v70_v47  ;;  %v28_v8 = vld [vmem:[%s3249_s0 + $0x10] sm:$0xff]  ;;  %v29_v9 = vld [vmem:[%s3249_s0 + $0x18] sm:$0xff]  ;;  %v2613_v10 = vld [vmem:[%s3250_s2 + $0x40] sm:$0xff] }
  0x1a   :  { %158 = vmatpush.msra.mxu2 %v37_v48  ;;  %112 = vmatpush.msra.mxu0 %v36_v50  ;;  %v2618_v11 = vld [vmem:[%s3250_s2 + $0x48] sm:$0xff]  ;;  %v2627_v12 = vld [vmem:[%s3250_s2 + $0x30] sm:$0xff]  ;;  %v2632_v13 = vld [vmem:[%s3250_s2 + $0x38] sm:$0xff] }
  0x1b   :  { %181 = vmatpush.msra.mxu3 %v69_v49  ;;  %135 = vmatpush.msra.mxu1 %v68_v51  ;;  %v2639_v14 = vld [vmem:[%s3250_s2 + $0x20] sm:$0xff]  ;;  %v2644_v15 = vld [vmem:[%s3250_s2 + $0x28] sm:$0xff]  ;;  %v2651_v16 = vld [vmem:[%s3250_s2 + $0x10] sm:$0xff] }
  0x1c   :  { %159 = vmatpush.msra.mxu2 %v35_v52  ;;  %113 = vmatpush.msra.mxu0 %v34_v54  ;;  %v2656_v17 = vld [vmem:[%s3250_s2 + $0x18] sm:$0xff]  ;;  %v2665_v18 = vld [vmem:[%s3250_s2] sm:$0xff]  ;;  %v2670_v19 = vld [vmem:[%s3250_s2 + $0x8] sm:$0xff] }
  0x1d   :  { %182 = vmatpush.msra.mxu3 %v67_v53  ;;  %136 = vmatpush.msra.mxu1 %v66_v55  ;;  %v94_v21 = vld [vmem:[%s3251_s3] sm:$0x3]  ;;  %s2328_s3 = smov 64  }
  0x1e   :  { %160 = vmatpush.msra.mxu2 %v33_v56  ;;  %114 = vmatpush.msra.mxu0 %v32_v58  ;;  %v96_v22 = vperm.slane %v94_v21, 0  ;;  %v97_v26 = vperm.slane %v94_v21, 1 }
  0x1f   :  { %183 = vmatpush.msra.mxu3 %v65_v57  ;;  %137 = vmatpush.msra.mxu1 %v64_v59 }
  0x20   :  { %161 = vmatpush.msra.mxu2 %v31_v60  ;;  %115 = vmatpush.msra.mxu0 %v30_v0 }
  0x21   :  { %184 = vmatpush.msra.mxu3 %v63_v61  ;;  %162 = vmatmul.f32.vlgmr.msra.gmra.mxu2 %v26_v62 }
  0x22   :  { %185 = vmatmul.f32.vlgmr.msra.gmra.mxu3 %v27_v63  ;;  %138 = vmatpush.msra.mxu1 %v62_v1 }
  0x23   :  { %116 = vmatmul.f32.vlgmr.msra.gmra.mxu0 %v26_v62  ;;  %139 = vmatmul.f32.vlgmr.msra.gmra.mxu1 %v27_v63 }
  0x24   :  { %230 = vmatpush.msrb.mxu0 %v2571_v2  ;;  %250 = vmatpush.msrb.mxu1 %v2576_v3 }
  0x25   :  { %337 = vmatpush.msrb.mxu2 %v2571_v2  ;;  %357 = vmatpush.msrb.mxu3 %v2576_v3 }
  0x26   :  { %231 = vmatpush.msrb.mxu0 %v2581_v4  ;;  %251 = vmatpush.msrb.mxu1 %v2586_v5 }
  0x27   :  { %338 = vmatpush.msrb.mxu2 %v2581_v4  ;;  %358 = vmatpush.msrb.mxu3 %v2586_v5 }
  0x28   :  { %232 = vmatpush.msrb.mxu0 %v2593_v6  ;;  %252 = vmatpush.msrb.mxu1 %v2598_v7 }
  0x29   :  { %165 = vmatmul.f32.gmra.mxu2 %v28_v8  ;;  %359 = vmatpush.msrb.mxu3 %v2598_v7 }
  0x2a   :  { %188 = vmatmul.f32.gmra.mxu3 %v29_v9  ;;  %233 = vmatpush.msrb.mxu0 %v2613_v10 }
  0x2b   :  { %253 = vmatpush.msrb.mxu1 %v2618_v11  ;;  %119 = vmatmul.f32.gmra.mxu0 %v28_v8 }
  0x2c   :  { %142 = vmatmul.f32.gmra.mxu1 %v29_v9  ;;  %234 = vmatpush.msrb.mxu0 %v2627_v12 }
  0x2d   :  { %254 = vmatpush.msrb.mxu1 %v2632_v13  ;;  %339 = vmatpush.msrb.mxu2 %v2593_v6 }
  0x2e   :  { %235 = vmatpush.msrb.mxu0 %v2639_v14  ;;  %360 = vmatpush.msrb.mxu3 %v2618_v11 }
  0x2f   :  { %255 = vmatpush.msrb.mxu1 %v2644_v15  ;;  %340 = vmatpush.msrb.mxu2 %v2613_v10 }
  0x30   :  { %236 = vmatpush.msrb.mxu0 %v2651_v16  ;;  %361 = vmatpush.msrb.mxu3 %v2632_v13 }
  0x31   :  { %256 = vmatpush.msrb.mxu1 %v2656_v17  ;;  %341 = vmatpush.msrb.mxu2 %v2627_v12 }
  0x32   :  { %237 = vmatpush.msrb.mxu0 %v2665_v18  ;;  %362 = vmatpush.msrb.mxu3 %v2644_v15 }
  0x33   :  { %257 = vmatpush.msrb.mxu1 %v2670_v19  ;;  %238 = vmatmul.f32.vlgmr.msrb.gmra.mxu0 %v2327_v20 }
  0x34   :  { %258 = vmatmul.f32.vlgmr.msrb.gmra.mxu1 %v2327_v20  ;;  %342 = vmatpush.msrb.mxu2 %v2639_v14 }
  0x35   :  { %443 = vmatpush.msra.mxu0 %v2571_v2  ;;  %463 = vmatpush.msra.mxu1 %v2576_v3 }
  0x36   :  { %343 = vmatpush.msrb.mxu2 %v2651_v16  ;;  %363 = vmatpush.msrb.mxu3 %v2656_v17 }
  0x37   :  { %444 = vmatpush.msra.mxu0 %v2581_v4  ;;  %464 = vmatpush.msra.mxu1 %v2586_v5 }
  0x38   :  { %344 = vmatpush.msrb.mxu2 %v2665_v18  ;;  %364 = vmatpush.msrb.mxu3 %v2670_v19 }
  0x39   :  { %445 = vmatpush.msra.mxu0 %v2593_v6  ;;  %465 = vmatpush.msra.mxu1 %v2598_v7 }
  0x3a   :  { %549 = vmatpush.msra.mxu2 %v2571_v2  ;;  %569 = vmatpush.msra.mxu3 %v2576_v3 }
  0x3b   :  { %446 = vmatpush.msra.mxu0 %v2613_v10  ;;  %466 = vmatpush.msra.mxu1 %v2618_v11 }
  0x3c   :  { %550 = vmatpush.msra.mxu2 %v2581_v4  ;;  %570 = vmatpush.msra.mxu3 %v2586_v5 }
  0x3d   :  { %447 = vmatpush.msra.mxu0 %v2627_v12  ;;  %467 = vmatpush.msra.mxu1 %v2632_v13 }
  0x3e   :  { %551 = vmatpush.msra.mxu2 %v2593_v6  ;;  %571 = vmatpush.msra.mxu3 %v2598_v7 }
  0x3f   :  { %448 = vmatpush.msra.mxu0 %v2639_v14  ;;  %468 = vmatpush.msra.mxu1 %v2644_v15 }
  0x40   :  { %552 = vmatpush.msra.mxu2 %v2613_v10  ;;  %572 = vmatpush.msra.mxu3 %v2618_v11 }
  0x41   :  { %449 = vmatpush.msra.mxu0 %v2651_v16  ;;  %469 = vmatpush.msra.mxu1 %v2656_v17 }
  0x42   :  { %553 = vmatpush.msra.mxu2 %v2627_v12  ;;  %573 = vmatpush.msra.mxu3 %v2632_v13 }
  0x43   :  { %450 = vmatpush.msra.mxu0 %v2665_v18  ;;  %470 = vmatpush.msra.mxu1 %v2670_v19 }
  0x44   :  { %554 = vmatpush.msra.mxu2 %v2639_v14  ;;  %574 = vmatpush.msra.mxu3 %v2644_v15 }
  0x45   :  { %655 = vmatpush.msrb.mxu0 %v2571_v2  ;;  %675 = vmatpush.msrb.mxu1 %v2576_v3 }
  0x46   :  { %555 = vmatpush.msra.mxu2 %v2651_v16  ;;  %575 = vmatpush.msra.mxu3 %v2656_v17 }
  0x47   :  { %656 = vmatpush.msrb.mxu0 %v2581_v4  ;;  %676 = vmatpush.msrb.mxu1 %v2586_v5 }
  0x48   :  { %556 = vmatpush.msra.mxu2 %v2665_v18  ;;  %576 = vmatpush.msra.mxu3 %v2670_v19 }
  0x49   :  { %657 = vmatpush.msrb.mxu0 %v2593_v6  ;;  %677 = vmatpush.msrb.mxu1 %v2598_v7 }
  0x4b   :  { %658 = vmatpush.msrb.mxu0 %v2613_v10  ;;  %678 = vmatpush.msrb.mxu1 %v2618_v11 }
  0x4d   :  { %659 = vmatpush.msrb.mxu0 %v2627_v12  ;;  %679 = vmatpush.msrb.mxu1 %v2632_v13 }
  0x4f   :  { %660 = vmatpush.msrb.mxu0 %v2639_v14  ;;  %680 = vmatpush.msrb.mxu1 %v2644_v15 }
  0x51   :  { %661 = vmatpush.msrb.mxu0 %v2651_v16  ;;  %681 = vmatpush.msrb.mxu1 %v2656_v17 }
  0x53   :  { %662 = vmatpush.msrb.mxu0 %v2665_v18  ;;  %682 = vmatpush.msrb.mxu1 %v2670_v19 }
  0xa0   :  { %v117_v23 = vpop.f32.mrf.mxu0  ;;  %v140_v24 = vpop.f32.mrf.mxu1 }
  0xa1   :  { %v118_v25 = vadd.f32 %v117_v23, %v96_v22 }
  0xa3   :  { %v141_v27 = vadd.f32 %v140_v24, %v118_v25 }
  0xa4   :  { %v163_v28 = vpop.f32.mrf.mxu2 }
  0xa5   :  { %v186_v29 = vpop.f32.mrf.mxu3  ;;  %192 = vst [vmem:[#allocation2] sm:$0xff] %v141_v27  ;;  %v164_v30 = vadd.f32 %v163_v28, %v97_v26 }
  0xa7   :  { %v187_v31 = vadd.f32 %v186_v29, %v164_v30 }
  0xa8   :  { %v120_v32 = vpop.f32.mrf.mxu0 }
  0xa9   :  { %193 = vst [vmem:[#allocation2 + $0x8] sm:$0xff] %v187_v31  ;;  %v121_v33 = vadd.f32 %v120_v32, %v96_v22  ;;  %v143_v34 = vpop.f32.mrf.mxu1 }
  0xab   :  { %v144_v35 = vadd.f32 %v143_v34, %v121_v33 }
  0xac   :  { %v166_v36 = vpop.f32.mrf.mxu2 }
  0xad   :  { %v189_v37 = vpop.f32.mrf.mxu3  ;;  %194 = vst [vmem:[#allocation2 + $0x10] sm:$0xff] %v144_v35  ;;  %v167_v38 = vadd.f32 %v166_v36, %v97_v26 }
  0xaf   :  { %v190_v39 = vadd.f32 %v189_v37, %v167_v38 }
  0xb0   :  { %v212_v40 = vld [vmem:[#allocation2] ss:$8 sm:$0x3]  ;;  %v239_v41 = vpop.f32.mrf.mxu0  ;;  %v321_v33 = vld [vmem:[#allocation2 + $0x1] ss:$8 sm:$0x3] }
  0xb1   :  { %195 = vst [vmem:[#allocation2 + $0x18] sm:$0xff] %v190_v39  ;;  %v214_v42 = vperm.slane %v212_v40, 0  ;;  %v215_v47 = vperm.slane %v212_v40, 1  ;;  %v259_v48 = vpop.f32.mrf.mxu1  ;;  %v323_v34 = vperm.slane %v321_v33, 0 }
  0xb3   :  { %v240_v43 = vadd.f32 %v239_v41, %v214_v42  ;;  %v260_v50 = vadd.f32 %v259_v48, %v215_v47  ;;  %v324_v41 = vperm.slane %v321_v33, 1 }
  0xb5   :  { %v2031_v44 = vmul.f32 -1.442695, %v240_v43  ;;  %v2032_v62 = vmul.f32 -1.442695, %v260_v50 }
  0xb7   :  { %2111 = vpow2.f32 %v2031_v44 }
  0xbd   :  { %v2112_v45 = vpop.eup %2111 }
  0xbe   :  { %v265_v46 = vadd.f32 1.0, %v2112_v45 }
  0xc0   :  { %2113 = vrcp.f32 %v265_v46  ;;  %v277_v53 = vand.u32 2147483648, %v265_v46  ;;  %v275_v55 = vand.u32 2147483647, %v265_v46  ;;  %vm271_vm1 = vweird.f32 %v265_v46 }
  0xc1   :  { %2115 = vtanh.f32 %v260_v50 }
  0xc2   :  { %v278_v57 = vor.u32 1.1754944e-38, %v277_v53  ;;  %vm276_vm3 = vcmp.eq.f32.partialorder %v275_v55, 8.507059e+37  ;;  %2117 = vpow2.f32 %v2032_v62 }
  0xc6   :  { %v2114_v49 = vpop.eup %2113 }
  0xc7   :  { %v267_v51 = vmul.f32 %v2114_v49, %v265_v46  ;;  %vm272_vm0 = vweird.f32 %v2114_v49  ;;  %v2116_v59 = vpop.eup %2115 }
  0xc8   :  { %vm273_vm2 = vmor %vm271_vm1, %vm272_vm0  ;;  %v2118_v63 = vpop.eup %2117 }
  0xc9   :  { %v268_v52 = vsub.f32 1.0, %v267_v51  ;;  %v285_v0 = vadd.f32 1.0, %v2118_v63 }
  0xcb   :  { %v269_v54 = vmul.f32 %v2114_v49, %v268_v52  ;;  %2119 = vrcp.f32 %v285_v0  ;;  %v297_v25 = vand.u32 2147483648, %v285_v0  ;;  %vm291_vm5 = vweird.f32 %v285_v0 }
  0xcc   :  { %v295_v26 = vand.u32 2147483647, %v285_v0 }
  0xcd   :  { %v270_v56 = vadd.f32 %v2114_v49, %v269_v54  ;;  %v298_v28 = vor.u32 1.1754944e-38, %v297_v25 }
  0xce   :  { %vm296_vm7 = vcmp.eq.f32.partialorder %v295_v26, 8.507059e+37  ;;  %v427_v26 = vld [vmem:[#allocation2 + $0x2] ss:$8 sm:$0x3] }
  0xcf   :  { %v274_v58 = vsel %vm273_vm2, %v2114_v49, %v270_v56 }
  0xd0   :  { %v279_v60 = vsel %vm276_vm3, %v278_v57, %v274_v58 }
  0xd1   :  { %v302_v61 = vmul.f32 %v2116_v59, %v279_v60  ;;  %v2120_v1 = vpop.eup %2119  ;;  %v301_v21 = vmul.f32 0.0, %v279_v60 }
  0xd2   :  { %v287_v8 = vmul.f32 %v2120_v1, %v285_v0  ;;  %vm292_vm4 = vweird.f32 %v2120_v1 }
  0xd3   :  { %304 = vrot.lane.b32.xlu0 %v302_v61, %s2328_s3  ;;  %vm293_vm6 = vmor %vm291_vm5, %vm292_vm4 }
  0xd4   :  { %v288_v9 = vsub.f32 1.0, %v287_v8 }
  0xd6   :  { %v289_v20 = vmul.f32 %v2120_v1, %v288_v9 }
  0xd8   :  { %v290_v24 = vadd.f32 %v2120_v1, %v289_v20 }
  0xda   :  { %v294_v27 = vsel %vm293_vm6, %v2120_v1, %v290_v24 }
  0xdb   :  { %v299_v30 = vsel %vm296_vm7, %v298_v28, %v294_v27  ;;  %v429_v27 = vperm.slane %v427_v26, 0 }
 0x145   :  { %v305_v22 = vpop.permute.xlu0 %304 }
 0x146   :  { %v2738_v23 = vadd.f32 %v305_v22, %v301_v21 }
 0x148   :  { %2121 = vtanh.f32 %v2738_v23 }
 0x14e   :  { %v2122_v29 = vpop.eup %2121 }
 0x14f   :  { %v2741_v31 = vmul.f32 %v2122_v29, %v299_v30 }
 0x151   :  { %311 = vrot.lane.b32.xlu0 %v2741_v31, %s2328_s3 }
 0x1c3   :  { %v312_v32 = vpop.permute.xlu0 %311 }
 0x1c4   :  { %315 = vst.msk [vmem:[#allocation3] sm:$0x1] %vm314_vm8, %v312_v32  ;;  %2033 = vmatmul.msk.f32.vlgmr.msrb.gmra.mxu2 %vm218_vm9, %v312_v32  ;;  %2034 = vmatmul.msk.f32.vlgmr.msrb.gmra.mxu3 %vm218_vm9, %v312_v32 }
 0x1c5   :  { %761 = vmatpush.msrb.mxu2 %v2571_v2  ;;  %781 = vmatpush.msrb.mxu3 %v2576_v3 }
 0x1c7   :  { %762 = vmatpush.msrb.mxu2 %v2581_v4  ;;  %782 = vmatpush.msrb.mxu3 %v2586_v5 }
 0x1c9   :  { %763 = vmatpush.msrb.mxu2 %v2593_v6  ;;  %783 = vmatpush.msrb.mxu3 %v2598_v7 }
 0x1cb   :  { %764 = vmatpush.msrb.mxu2 %v2613_v10  ;;  %784 = vmatpush.msrb.mxu3 %v2618_v11 }
 0x1cd   :  { %765 = vmatpush.msrb.mxu2 %v2627_v12  ;;  %785 = vmatpush.msrb.mxu3 %v2632_v13 }
 0x1cf   :  { %766 = vmatpush.msrb.mxu2 %v2639_v14  ;;  %786 = vmatpush.msrb.mxu3 %v2644_v15 }
 0x1d1   :  { %767 = vmatpush.msrb.mxu2 %v2651_v16  ;;  %787 = vmatpush.msrb.mxu3 %v2656_v17 }
 0x1d3   :  { %768 = vmatpush.msrb.mxu2 %v2665_v18  ;;  %788 = vmatpush.msrb.mxu3 %v2670_v19 }
 0x247   :  { %v346_v35 = vpop.f32.mrf.mxu2  ;;  %v366_v40 = vpop.f32.mrf.mxu3 }
 0x248   :  { %v347_v36 = vadd.f32 %v346_v35, %v323_v34  ;;  %v367_v43 = vadd.f32 %v366_v40, %v324_v41  ;;  %v430_v35 = vperm.slane %v427_v26, 1 }
 0x24a   :  { %v2035_v37 = vmul.f32 -1.442695, %v347_v36  ;;  %v2036_v55 = vmul.f32 -1.442695, %v367_v43 }
 0x24c   :  { %2123 = vpow2.f32 %v2035_v37 }
 0x252   :  { %v2124_v38 = vpop.eup %2123 }
 0x253   :  { %v372_v39 = vadd.f32 1.0, %v2124_v38 }
 0x255   :  { %2125 = vrcp.f32 %v372_v39  ;;  %v384_v46 = vand.u32 2147483648, %v372_v39  ;;  %v382_v48 = vand.u32 2147483647, %v372_v39  ;;  %vm378_vm11 = vweird.f32 %v372_v39 }
 0x256   :  { %2127 = vtanh.f32 %v367_v43 }
 0x257   :  { %v385_v50 = vor.u32 1.1754944e-38, %v384_v46  ;;  %vm383_vm13 = vcmp.eq.f32.partialorder %v382_v48, 8.507059e+37  ;;  %2129 = vpow2.f32 %v2036_v55 }
 0x25b   :  { %v2126_v42 = vpop.eup %2125 }
 0x25c   :  { %v374_v44 = vmul.f32 %v2126_v42, %v372_v39  ;;  %vm379_vm10 = vweird.f32 %v2126_v42  ;;  %v2128_v52 = vpop.eup %2127 }
 0x25d   :  { %vm380_vm12 = vmor %vm378_vm11, %vm379_vm10  ;;  %v2130_v56 = vpop.eup %2129 }
 0x25e   :  { %v375_v45 = vsub.f32 1.0, %v374_v44  ;;  %v392_v57 = vadd.f32 1.0, %v2130_v56 }
 0x260   :  { %v376_v47 = vmul.f32 %v2126_v42, %v375_v45  ;;  %2131 = vrcp.f32 %v392_v57  ;;  %v404_v8 = vand.u32 2147483648, %v392_v57  ;;  %vm398_vm15 = vweird.f32 %v392_v57 }
 0x261   :  { %v402_v9 = vand.u32 2147483647, %v392_v57 }
 0x262   :  { %v377_v49 = vadd.f32 %v2126_v42, %v376_v47  ;;  %v405_v21 = vor.u32 1.1754944e-38, %v404_v8 }
 0x263   :  { %vm403_vm1 = vcmp.eq.f32.partialorder %v402_v9, 8.507059e+37 }
 0x264   :  { %v381_v51 = vsel %vm380_vm12, %v2126_v42, %v377_v49 }
 0x265   :  { %v386_v53 = vsel %vm383_vm13, %v385_v50, %v381_v51 }
 0x266   :  { %v409_v54 = vmul.f32 %v2128_v52, %v386_v53  ;;  %v2132_v58 = vpop.eup %2131  ;;  %v408_v62 = vmul.f32 %v386_v53, %v2738_v23 }
 0x267   :  { %v394_v59 = vmul.f32 %v2132_v58, %v392_v57  ;;  %vm399_vm14 = vweird.f32 %v2132_v58 }
 0x268   :  { %411 = vrot.lane.b32.xlu1 %v409_v54, %s2328_s3  ;;  %vm400_vm0 = vmor %vm398_vm15, %vm399_vm14 }
 0x269   :  { %v395_v60 = vsub.f32 1.0, %v394_v59 }
 0x26b   :  { %v396_v61 = vmul.f32 %v2132_v58, %v395_v60 }
 0x26d   :  { %v397_v1 = vadd.f32 %v2132_v58, %v396_v61 }
 0x26f   :  { %v401_v20 = vsel %vm400_vm0, %v2132_v58, %v397_v1 }
 0x270   :  { %v406_v24 = vsel %vm403_vm1, %v405_v21, %v401_v20  ;;  %v533_v20 = vld [vmem:[#allocation2 + $0x3] ss:$8 sm:$0x3] }
 0x271   :  { %v535_v21 = vperm.slane %v533_v20, 0 }
 0x2da   :  { %v412_v63 = vpop.permute.xlu1 %411 }
 0x2db   :  { %v2766_v0 = vadd.f32 %v412_v63, %v408_v62 }
 0x2dd   :  { %2133 = vtanh.f32 %v2766_v0 }
 0x2e3   :  { %v2134_v22 = vpop.eup %2133 }
 0x2e4   :  { %v2769_v25 = vmul.f32 %v2134_v22, %v406_v24 }
 0x2e6   :  { %418 = vrot.lane.b32.xlu1 %v2769_v25, %s2328_s3 }
 0x358   :  { %v419_v23 = vpop.permute.xlu1 %418 }
 0x359   :  { %421 = vst.msk [vmem:[#allocation3 + $0x1] sm:$0x1] %vm314_vm8, %v419_v23  ;;  %2037 = vmatmul.msk.f32.vlgmr.msra.gmra.mxu0 %vm218_vm9, %v419_v23  ;;  %2038 = vmatmul.msk.f32.vlgmr.msra.gmra.mxu1 %vm218_vm9, %v419_v23 }
 0x35a   :  { %867 = vmatpush.msra.mxu0 %v2571_v2  ;;  %887 = vmatpush.msra.mxu1 %v2576_v3 }
 0x35c   :  { %868 = vmatpush.msra.mxu0 %v2581_v4  ;;  %888 = vmatpush.msra.mxu1 %v2586_v5 }
 0x35e   :  { %869 = vmatpush.msra.mxu0 %v2593_v6  ;;  %889 = vmatpush.msra.mxu1 %v2598_v7 }
 0x360   :  { %870 = vmatpush.msra.mxu0 %v2613_v10  ;;  %890 = vmatpush.msra.mxu1 %v2618_v11 }
 0x362   :  { %871 = vmatpush.msra.mxu0 %v2627_v12  ;;  %891 = vmatpush.msra.mxu1 %v2632_v13 }
 0x364   :  { %872 = vmatpush.msra.mxu0 %v2639_v14  ;;  %892 = vmatpush.msra.mxu1 %v2644_v15 }
 0x366   :  { %873 = vmatpush.msra.mxu0 %v2651_v16  ;;  %893 = vmatpush.msra.mxu1 %v2656_v17 }
 0x368   :  { %874 = vmatpush.msra.mxu0 %v2665_v18  ;;  %894 = vmatpush.msra.mxu1 %v2670_v19 }
 0x3d6   :  { %v452_v28 = vpop.f32.mrf.mxu0  ;;  %v472_v34 = vpop.f32.mrf.mxu1 }
 0x3d7   :  { %v453_v29 = vadd.f32 %v452_v28, %v429_v27  ;;  %v473_v37 = vadd.f32 %v472_v34, %v430_v35 }
 0x3d9   :  { %v2039_v30 = vmul.f32 -1.442695, %v453_v29  ;;  %v2040_v49 = vmul.f32 -1.442695, %v473_v37  ;;  %v536_v29 = vperm.slane %v533_v20, 1 }
 0x3db   :  { %2135 = vpow2.f32 %v2039_v30 }
 0x3e1   :  { %v2136_v32 = vpop.eup %2135 }
 0x3e2   :  { %v478_v33 = vadd.f32 1.0, %v2136_v32 }
 0x3e4   :  { %2137 = vrcp.f32 %v478_v33  ;;  %v490_v40 = vand.u32 2147483648, %v478_v33  ;;  %v488_v42 = vand.u32 2147483647, %v478_v33  ;;  %vm484_vm3 = vweird.f32 %v478_v33 }
 0x3e5   :  { %2139 = vtanh.f32 %v473_v37 }
 0x3e6   :  { %v491_v44 = vor.u32 1.1754944e-38, %v490_v40  ;;  %vm489_vm5 = vcmp.eq.f32.partialorder %v488_v42, 8.507059e+37  ;;  %2141 = vpow2.f32 %v2040_v49 }
 0x3ea   :  { %v2138_v36 = vpop.eup %2137 }
 0x3eb   :  { %v480_v38 = vmul.f32 %v2138_v36, %v478_v33  ;;  %vm485_vm2 = vweird.f32 %v2138_v36  ;;  %v2140_v46 = vpop.eup %2139 }
 0x3ec   :  { %vm486_vm4 = vmor %vm484_vm3, %vm485_vm2  ;;  %v2142_v50 = vpop.eup %2141 }
 0x3ed   :  { %v481_v39 = vsub.f32 1.0, %v480_v38  ;;  %v498_v51 = vadd.f32 1.0, %v2142_v50 }
 0x3ef   :  { %v482_v41 = vmul.f32 %v2138_v36, %v481_v39  ;;  %2143 = vrcp.f32 %v498_v51  ;;  %v510_v60 = vand.u32 2147483648, %v498_v51  ;;  %vm504_vm7 = vweird.f32 %v498_v51 }
 0x3f0   :  { %v508_v61 = vand.u32 2147483647, %v498_v51 }
 0x3f1   :  { %v483_v43 = vadd.f32 %v2138_v36, %v482_v41  ;;  %v511_v63 = vor.u32 1.1754944e-38, %v510_v60 }
 0x3f2   :  { %vm509_vm11 = vcmp.eq.f32.partialorder %v508_v61, 8.507059e+37 }
 0x3f3   :  { %v487_v45 = vsel %vm486_vm4, %v2138_v36, %v483_v43 }
 0x3f4   :  { %v492_v47 = vsel %vm489_vm5, %v491_v44, %v487_v45 }
 0x3f5   :  { %v515_v48 = vmul.f32 %v2140_v46, %v492_v47  ;;  %v2144_v52 = vpop.eup %2143  ;;  %v514_v56 = vmul.f32 %v492_v47, %v2766_v0 }
 0x3f6   :  { %v500_v53 = vmul.f32 %v2144_v52, %v498_v51  ;;  %vm505_vm6 = vweird.f32 %v2144_v52 }
 0x3f7   :  { %517 = vrot.lane.b32.xlu2 %v515_v48, %s2328_s3  ;;  %vm506_vm10 = vmor %vm504_vm7, %vm505_vm6 }
 0x3f8   :  { %v501_v54 = vsub.f32 1.0, %v500_v53 }
 0x3fa   :  { %v502_v55 = vmul.f32 %v2144_v52, %v501_v54 }
 0x3fc   :  { %v503_v59 = vadd.f32 %v2144_v52, %v502_v55 }
 0x3fe   :  { %v507_v62 = vsel %vm506_vm10, %v2144_v52, %v503_v59 }
 0x3ff   :  { %v512_v8 = vsel %vm509_vm11, %v511_v63, %v507_v62  ;;  %v639_v63 = vld [vmem:[#allocation2 + $0x4] ss:$8 sm:$0x3] }
 0x451   :  { %v518_v57 = vpop.permute.xlu2 %517 }
 0x452   :  { %v2794_v58 = vadd.f32 %v518_v57, %v514_v56 }
 0x454   :  { %2145 = vtanh.f32 %v2794_v58 }
 0x45a   :  { %v2146_v1 = vpop.eup %2145 }
 0x45b   :  { %v2797_v9 = vmul.f32 %v2146_v1, %v512_v8  ;;  %v641_v1 = vperm.slane %v639_v63, 0 }
 0x45d   :  { %524 = vrot.lane.b32.xlu2 %v2797_v9, %s2328_s3 }
 0x4b7   :  { %v525_v0 = vpop.permute.xlu2 %524 }
 0x4b8   :  { %527 = vst.msk [vmem:[#allocation3 + $0x2] sm:$0x1] %vm314_vm8, %v525_v0  ;;  %2041 = vmatmul.msk.f32.vlgmr.msra.gmra.mxu2 %vm218_vm9, %v525_v0  ;;  %2042 = vmatmul.msk.f32.vlgmr.msra.gmra.mxu3 %vm218_vm9, %v525_v0 }
 0x4b9   :  { %973 = vmatpush.msra.mxu2 %v2571_v2  ;;  %993 = vmatpush.msra.mxu3 %v2576_v3 }
 0x4bb   :  { %974 = vmatpush.msra.mxu2 %v2581_v4  ;;  %994 = vmatpush.msra.mxu3 %v2586_v5 }
 0x4bd   :  { %975 = vmatpush.msra.mxu2 %v2593_v6  ;;  %995 = vmatpush.msra.mxu3 %v2598_v7 }
 0x4bf   :  { %976 = vmatpush.msra.mxu2 %v2613_v10  ;;  %996 = vmatpush.msra.mxu3 %v2618_v11 }
 0x4c1   :  { %977 = vmatpush.msra.mxu2 %v2627_v12  ;;  %997 = vmatpush.msra.mxu3 %v2632_v13 }
 0x4c3   :  { %978 = vmatpush.msra.mxu2 %v2639_v14  ;;  %998 = vmatpush.msra.mxu3 %v2644_v15 }
 0x4c5   :  { %979 = vmatpush.msra.mxu2 %v2651_v16  ;;  %999 = vmatpush.msra.mxu3 %v2656_v17 }
 0x4c7   :  { %980 = vmatpush.msra.mxu2 %v2665_v18  ;;  %1000 = vmatpush.msra.mxu3 %v2670_v19 }
 0x53b   :  { %v558_v22 = vpop.f32.mrf.mxu2  ;;  %v578_v28 = vpop.f32.mrf.mxu3 }
 0x53c   :  { %v559_v24 = vadd.f32 %v558_v22, %v535_v21  ;;  %v579_v32 = vadd.f32 %v578_v28, %v536_v29 }
 0x53e   :  { %v2043_v23 = vmul.f32 -1.442695, %v559_v24  ;;  %v2044_v44 = vmul.f32 -1.442695, %v579_v32 }
 0x540   :  { %2147 = vpow2.f32 %v2043_v23  ;;  %v642_v23 = vperm.slane %v639_v63, 1 }
 0x546   :  { %v2148_v26 = vpop.eup %2147 }
 0x547   :  { %v584_v27 = vadd.f32 1.0, %v2148_v26 }
 0x549   :  { %2149 = vrcp.f32 %v584_v27  ;;  %v596_v35 = vand.u32 2147483648, %v584_v27  ;;  %v594_v37 = vand.u32 2147483647, %v584_v27  ;;  %vm590_vm13 = vweird.f32 %v584_v27 }
 0x54a   :  { %2151 = vtanh.f32 %v579_v32 }
 0x54b   :  { %v597_v39 = vor.u32 1.1754944e-38, %v596_v35  ;;  %vm595_vm15 = vcmp.eq.f32.partialorder %v594_v37, 8.507059e+37  ;;  %2153 = vpow2.f32 %v2044_v44 }
 0x54f   :  { %v2150_v30 = vpop.eup %2149 }
 0x550   :  { %v586_v33 = vmul.f32 %v2150_v30, %v584_v27  ;;  %vm591_vm12 = vweird.f32 %v2150_v30  ;;  %v2152_v41 = vpop.eup %2151 }
 0x551   :  { %vm592_vm14 = vmor %vm590_vm13, %vm591_vm12  ;;  %v2154_v45 = vpop.eup %2153 }
 0x552   :  { %v587_v34 = vsub.f32 1.0, %v586_v33  ;;  %v604_v46 = vadd.f32 1.0, %v2154_v45 }
 0x554   :  { %v588_v36 = vmul.f32 %v2150_v30, %v587_v34  ;;  %2155 = vrcp.f32 %v604_v46  ;;  %v616_v55 = vand.u32 2147483648, %v604_v46  ;;  %vm610_vm1 = vweird.f32 %v604_v46 }
 0x555   :  { %v614_v56 = vand.u32 2147483647, %v604_v46 }
 0x556   :  { %v589_v38 = vadd.f32 %v2150_v30, %v588_v36  ;;  %v617_v59 = vor.u32 1.1754944e-38, %v616_v55 }
 0x557   :  { %vm615_vm3 = vcmp.eq.f32.partialorder %v614_v56, 8.507059e+37 }
 0x558   :  { %v593_v40 = vsel %vm592_vm14, %v2150_v30, %v589_v38 }
 0x559   :  { %v598_v42 = vsel %vm595_vm15, %v597_v39, %v593_v40 }
 0x55a   :  { %v621_v43 = vmul.f32 %v2152_v41, %v598_v42  ;;  %v2156_v47 = vpop.eup %2155  ;;  %v620_v51 = vmul.f32 %v598_v42, %v2794_v58 }
 0x55b   :  { %v606_v48 = vmul.f32 %v2156_v47, %v604_v46  ;;  %vm611_vm0 = vweird.f32 %v2156_v47 }
 0x55c   :  { %623 = vrot.lane.b32.xlu0 %v621_v43, %s2328_s3  ;;  %vm612_vm2 = vmor %vm610_vm1, %vm611_vm0 }
 0x55d   :  { %v607_v49 = vsub.f32 1.0, %v606_v48 }
 0x55f   :  { %v608_v50 = vmul.f32 %v2156_v47, %v607_v49 }
 0x561   :  { %v609_v54 = vadd.f32 %v2156_v47, %v608_v50 }
 0x563   :  { %v613_v57 = vsel %vm612_vm2, %v2156_v47, %v609_v54 }
 0x564   :  { %v618_v61 = vsel %vm615_vm3, %v617_v59, %v613_v57 }
 0x5ce   :  { %v624_v52 = vpop.permute.xlu0 %623 }
 0x5cf   :  { %v2822_v53 = vadd.f32 %v624_v52, %v620_v51 }
 0x5d1   :  { %2157 = vtanh.f32 %v2822_v53 }
 0x5d7   :  { %v2158_v60 = vpop.eup %2157 }
 0x5d8   :  { %v2825_v62 = vmul.f32 %v2158_v60, %v618_v61 }
 0x5da   :  { %630 = vrot.lane.b32.xlu1 %v2825_v62, %s2328_s3 }
 0x64c   :  { %v631_v58 = vpop.permute.xlu1 %630 }
 0x64d   :  { %633 = vst.msk [vmem:[#allocation3 + $0x3] sm:$0x1] %vm314_vm8, %v631_v58  ;;  %2045 = vmatmul.msk.f32.vlgmr.msrb.gmra.mxu0 %vm218_vm9, %v631_v58  ;;  %2046 = vmatmul.msk.f32.vlgmr.msrb.gmra.mxu1 %vm218_vm9, %v631_v58 }
 0x64e   :  { %1079 = vmatpush.msrb.mxu0 %v2571_v2  ;;  %1099 = vmatpush.msrb.mxu1 %v2576_v3 }
 0x650   :  { %1080 = vmatpush.msrb.mxu0 %v2581_v4  ;;  %1100 = vmatpush.msrb.mxu1 %v2586_v5 }
 0x652   :  { %1081 = vmatpush.msrb.mxu0 %v2593_v6  ;;  %1101 = vmatpush.msrb.mxu1 %v2598_v7 }
 0x654   :  { %1082 = vmatpush.msrb.mxu0 %v2613_v10  ;;  %1102 = vmatpush.msrb.mxu1 %v2618_v11 }
 0x656   :  { %1083 = vmatpush.msrb.mxu0 %v2627_v12  ;;  %1103 = vmatpush.msrb.mxu1 %v2632_v13 }
 0x658   :  { %1084 = vmatpush.msrb.mxu0 %v2639_v14  ;;  %1104 = vmatpush.msrb.mxu1 %v2644_v15 }
 0x65a   :  { %1085 = vmatpush.msrb.mxu0 %v2651_v16  ;;  %1105 = vmatpush.msrb.mxu1 %v2656_v17 }
 0x65c   :  { %1086 = vmatpush.msrb.mxu0 %v2665_v18  ;;  %1106 = vmatpush.msrb.mxu1 %v2670_v19 }
 0x6ca   :  { %v664_v8 = vpop.f32.mrf.mxu0  ;;  %v684_v24 = vpop.f32.mrf.mxu1 }
 0x6cb   :  { %v665_v0 = vadd.f32 %v664_v8, %v641_v1  ;;  %v685_v27 = vadd.f32 %v684_v24, %v642_v23 }
 0x6cd   :  { %v2047_v20 = vmul.f32 -1.442695, %v665_v0  ;;  %v2048_v40 = vmul.f32 -1.442695, %v685_v27 }
 0x6cf   :  { %2159 = vpow2.f32 %v2047_v20 }
 0x6d5   :  { %v2160_v21 = vpop.eup %2159 }
 0x6d6   :  { %v690_v22 = vadd.f32 1.0, %v2160_v21 }
 0x6d8   :  { %2161 = vrcp.f32 %v690_v22  ;;  %v702_v30 = vand.u32 2147483648, %v690_v22  ;;  %v700_v33 = vand.u32 2147483647, %v690_v22  ;;  %vm696_vm5 = vweird.f32 %v690_v22 }
 0x6d9   :  { %2163 = vtanh.f32 %v685_v27 }
 0x6da   :  { %v703_v35 = vor.u32 1.1754944e-38, %v702_v30  ;;  %vm701_vm7 = vcmp.eq.f32.partialorder %v700_v33, 8.507059e+37  ;;  %2165 = vpow2.f32 %v2048_v40  ;;  %v2891_v40 = vld [vmem:[%s3250_s2 + $0x70] sm:$0xff] }
 0x6de   :  { %v2162_v26 = vpop.eup %2161 }
 0x6df   :  { %v692_v28 = vmul.f32 %v2162_v26, %v690_v22  ;;  %vm697_vm4 = vweird.f32 %v2162_v26  ;;  %v2164_v37 = vpop.eup %2163 }
 0x6e0   :  { %vm698_vm6 = vmor %vm696_vm5, %vm697_vm4  ;;  %v2166_v41 = vpop.eup %2165 }
 0x6e1   :  { %v693_v29 = vsub.f32 1.0, %v692_v28  ;;  %v710_v42 = vadd.f32 1.0, %v2166_v41  ;;  %v2897_v41 = vld [vmem:[%s3250_s2 + $0x78] sm:$0xff] }
 0x6e3   :  { %v694_v32 = vmul.f32 %v2162_v26, %v693_v29  ;;  %2167 = vrcp.f32 %v710_v42  ;;  %v722_v51 = vand.u32 2147483648, %v710_v42  ;;  %vm716_vm11 = vweird.f32 %v710_v42 }
 0x6e4   :  { %v720_v52 = vand.u32 2147483647, %v710_v42 }
 0x6e5   :  { %v695_v34 = vadd.f32 %v2162_v26, %v694_v32  ;;  %v723_v55 = vor.u32 1.1754944e-38, %v722_v51  ;;  %v2957_v51 = vld [vmem:[%s3250_s2 + $0x28] sm:$0xff] }
 0x6e6   :  { %vm721_vm13 = vcmp.eq.f32.partialorder %v720_v52, 8.507059e+37  ;;  %v2963_v52 = vld [vmem:[%s3250_s2 + $0x10] sm:$0xff] }
 0x6e7   :  { %v699_v36 = vsel %vm698_vm6, %v2162_v26, %v695_v34 }
 0x6e8   :  { %v704_v38 = vsel %vm701_vm7, %v703_v35, %v699_v36 }
 0x6e9   :  { %v727_v39 = vmul.f32 %v2164_v37, %v704_v38  ;;  %v2168_v43 = vpop.eup %2167  ;;  %v726_v47 = vmul.f32 %v704_v38, %v2822_v53 }
 0x6ea   :  { %v712_v44 = vmul.f32 %v2168_v43, %v710_v42  ;;  %vm717_vm10 = vweird.f32 %v2168_v43  ;;  %v2903_v42 = vld [vmem:[%s3250_s2 + $0x60] sm:$0xff] }
 0x6eb   :  { %729 = vrot.lane.b32.xlu2 %v727_v39, %s2328_s3  ;;  %vm718_vm12 = vmor %vm716_vm11, %vm717_vm10 }
 0x6ec   :  { %v713_v45 = vsub.f32 1.0, %v712_v44  ;;  %v2915_v44 = vld [vmem:[%s3250_s2 + $0x50] sm:$0xff] }
 0x6ee   :  { %v714_v46 = vmul.f32 %v2168_v43, %v713_v45  ;;  %v2921_v45 = vld [vmem:[%s3250_s2 + $0x58] sm:$0xff] }
 0x6f0   :  { %v715_v50 = vadd.f32 %v2168_v43, %v714_v46  ;;  %v2927_v46 = vld [vmem:[%s3250_s2 + $0x40] sm:$0xff] }
 0x6f2   :  { %v719_v54 = vsel %vm718_vm12, %v2168_v43, %v715_v50  ;;  %v2909_v43 = vld [vmem:[%s3250_s2 + $0x68] sm:$0xff]  ;;  %v2951_v50 = vld [vmem:[%s3250_s2 + $0x20] sm:$0xff] }
 0x6f3   :  { %v724_v57 = vsel %vm721_vm13, %v723_v55, %v719_v54  ;;  %v2969_v54 = vld [vmem:[%s3250_s2 + $0x18] sm:$0xff]  ;;  %v2975_v55 = vld [vmem:[%s3250_s2] sm:$0xff] }
 0x745   :  { %v730_v48 = vpop.permute.xlu2 %729 }
 0x746   :  { %v2850_v49 = vadd.f32 %v730_v48, %v726_v47  ;;  %v2933_v47 = vld [vmem:[%s3250_s2 + $0x48] sm:$0xff]  ;;  %v2939_v48 = vld [vmem:[%s3250_s2 + $0x30] sm:$0xff] }
 0x748   :  { %2169 = vtanh.f32 %v2850_v49 }
 0x74e   :  { %v2170_v56 = vpop.eup %2169 }
 0x74f   :  { %v2853_v59 = vmul.f32 %v2170_v56, %v724_v57  ;;  %v2981_v56 = vld [vmem:[%s3250_s2 + $0x8] sm:$0xff] }
 0x750   :  { %v851_v57 = vld [vmem:[#allocation2 + $0x6] ss:$8 sm:$0x3] }
 0x751   :  { %736 = vrot.lane.b32.xlu0 %v2853_v59, %s2328_s3 }
 0x7c3   :  { %v737_v53 = vpop.permute.xlu0 %736 }
 0x7c4   :  { %739 = vst.msk [vmem:[#allocation3 + $0x4] sm:$0x1] %vm314_vm8, %v737_v53  ;;  %2049 = vmatmul.msk.f32.vlgmr.msrb.gmra.mxu2 %vm218_vm9, %v737_v53  ;;  %2050 = vmatmul.msk.f32.vlgmr.msrb.gmra.mxu3 %vm218_vm9, %v737_v53  ;;  %v853_v53 = vperm.slane %v851_v57, 0 }
 0x7c5   :  { %1185 = vmatpush.msrb.mxu2 %v2571_v2  ;;  %1205 = vmatpush.msrb.mxu3 %v2576_v3  ;;  %v745_v2 = vld [vmem:[#allocation2 + $0x5] ss:$8 sm:$0x3] }
 0x7c6   :  { %v747_v3 = vperm.slane %v745_v2, 0 }
 0x7c7   :  { %1186 = vmatpush.msrb.mxu2 %v2581_v4  ;;  %1206 = vmatpush.msrb.mxu3 %v2586_v5 }
 0x7c9   :  { %1187 = vmatpush.msrb.mxu2 %v2593_v6  ;;  %1207 = vmatpush.msrb.mxu3 %v2598_v7 }
 0x7cb   :  { %1188 = vmatpush.msrb.mxu2 %v2613_v10  ;;  %1208 = vmatpush.msrb.mxu3 %v2618_v11 }
 0x7cd   :  { %1189 = vmatpush.msrb.mxu2 %v2627_v12  ;;  %1209 = vmatpush.msrb.mxu3 %v2632_v13  ;;  %v748_v12 = vperm.slane %v745_v2, 1 }
 0x7cf   :  { %1190 = vmatpush.msrb.mxu2 %v2639_v14  ;;  %1210 = vmatpush.msrb.mxu3 %v2644_v15 }
 0x7d1   :  { %1191 = vmatpush.msrb.mxu2 %v2651_v16  ;;  %1211 = vmatpush.msrb.mxu3 %v2656_v17 }
 0x7d3   :  { %1192 = vmatpush.msrb.mxu2 %v2665_v18  ;;  %1212 = vmatpush.msrb.mxu3 %v2670_v19 }
 0x847   :  { %v770_v4 = vpop.f32.mrf.mxu2  ;;  %v790_v11 = vpop.f32.mrf.mxu3 }
 0x848   :  { %v771_v5 = vadd.f32 %v770_v4, %v747_v3  ;;  %v791_v14 = vadd.f32 %v790_v11, %v748_v12 }
 0x84a   :  { %v2051_v6 = vmul.f32 -1.442695, %v771_v5  ;;  %v2052_v0 = vmul.f32 -1.442695, %v791_v14 }
 0x84c   :  { %2171 = vpow2.f32 %v2051_v6 }
 0x852   :  { %v2172_v7 = vpop.eup %2171 }
 0x853   :  { %v796_v10 = vadd.f32 1.0, %v2172_v7 }
 0x855   :  { %2173 = vrcp.f32 %v796_v10  ;;  %v808_v17 = vand.u32 2147483648, %v796_v10  ;;  %v806_v19 = vand.u32 2147483647, %v796_v10  ;;  %vm802_vm15 = vweird.f32 %v796_v10 }
 0x856   :  { %2175 = vtanh.f32 %v791_v14 }
 0x857   :  { %v809_v61 = vor.u32 1.1754944e-38, %v808_v17  ;;  %vm807_vm1 = vcmp.eq.f32.partialorder %v806_v19, 8.507059e+37  ;;  %2177 = vpow2.f32 %v2052_v0 }
 0x85b   :  { %v2174_v13 = vpop.eup %2173 }
 0x85c   :  { %v798_v15 = vmul.f32 %v2174_v13, %v796_v10  ;;  %vm803_vm14 = vweird.f32 %v2174_v13  ;;  %v2176_v63 = vpop.eup %2175  ;;  %v854_v10 = vperm.slane %v851_v57, 1 }
 0x85d   :  { %vm804_vm0 = vmor %vm802_vm15, %vm803_vm14  ;;  %v2178_v20 = vpop.eup %2177 }
 0x85e   :  { %v799_v16 = vsub.f32 1.0, %v798_v15  ;;  %v816_v21 = vadd.f32 1.0, %v2178_v20 }
 0x860   :  { %v800_v18 = vmul.f32 %v2174_v13, %v799_v16  ;;  %2179 = vrcp.f32 %v816_v21  ;;  %v828_v32 = vand.u32 2147483648, %v816_v21  ;;  %vm822_vm3 = vweird.f32 %v816_v21 }
 0x861   :  { %v826_v33 = vand.u32 2147483647, %v816_v21 }
 0x862   :  { %v801_v60 = vadd.f32 %v2174_v13, %v800_v18  ;;  %v829_v35 = vor.u32 1.1754944e-38, %v828_v32 }
 0x863   :  { %vm827_vm5 = vcmp.eq.f32.partialorder %v826_v33, 8.507059e+37 }
 0x864   :  { %v805_v58 = vsel %vm804_vm0, %v2174_v13, %v801_v60 }
 0x865   :  { %v810_v1 = vsel %vm807_vm1, %v809_v61, %v805_v58 }
 0x866   :  { %v833_v8 = vmul.f32 %v2176_v63, %v810_v1  ;;  %v2180_v22 = vpop.eup %2179  ;;  %v832_v27 = vmul.f32 %v810_v1, %v2850_v49  ;;  %v2945_v49 = vld [vmem:[%s3250_s2 + $0x38] sm:$0xff] }
 0x867   :  { %v818_v24 = vmul.f32 %v2180_v22, %v816_v21  ;;  %vm823_vm2 = vweird.f32 %v2180_v22 }
 0x868   :  { %835 = vrot.lane.b32.xlu1 %v833_v8, %s2328_s3  ;;  %vm824_vm4 = vmor %vm822_vm3, %vm823_vm2 }
 0x869   :  { %v819_v23 = vsub.f32 1.0, %v818_v24 }
 0x86b   :  { %v820_v26 = vmul.f32 %v2180_v22, %v819_v23 }
 0x86d   :  { %v821_v30 = vadd.f32 %v2180_v22, %v820_v26 }
 0x86f   :  { %v825_v34 = vsel %vm824_vm4, %v2180_v22, %v821_v30 }
 0x870   :  { %v830_v37 = vsel %vm827_vm5, %v829_v35, %v825_v34 }
 0x8da   :  { %v836_v28 = vpop.permute.xlu1 %835 }
 0x8db   :  { %v2878_v29 = vadd.f32 %v836_v28, %v832_v27 }
 0x8dd   :  { %2181 = vtanh.f32 %v2878_v29 }
 0x8e3   :  { %v2182_v36 = vpop.eup %2181 }
 0x8e4   :  { %v2881_v38 = vmul.f32 %v2182_v36, %v830_v37 }
 0x8e6   :  { %842 = vrot.lane.b32.xlu2 %v2881_v38, %s2328_s3 }
 0x940   :  { %v843_v39 = vpop.permute.xlu2 %842 }
 0x941   :  { %845 = vst.msk [vmem:[#allocation3 + $0x5] sm:$0x1] %vm314_vm8, %v843_v39  ;;  %2053 = vmatmul.msk.f32.vlgmr.msra.gmra.mxu0 %vm218_vm9, %v843_v39  ;;  %2054 = vmatmul.msk.f32.vlgmr.msra.gmra.mxu1 %vm218_vm9, %v843_v39  ;;  %v957_v39 = vld [vmem:[#allocation2 + $0x7] ss:$8 sm:$0x3] }
 0x942   :  { %1291 = vmatpush.msra.mxu0 %v2891_v40  ;;  %1311 = vmatpush.msra.mxu1 %v2897_v41  ;;  %v959_v57 = vperm.slane %v957_v39, 0 }
 0x944   :  { %1292 = vmatpush.msra.mxu0 %v2903_v42  ;;  %1312 = vmatpush.msra.mxu1 %v2909_v43 }
 0x946   :  { %1293 = vmatpush.msra.mxu0 %v2915_v44  ;;  %1313 = vmatpush.msra.mxu1 %v2921_v45 }
 0x948   :  { %1294 = vmatpush.msra.mxu0 %v2927_v46  ;;  %1314 = vmatpush.msra.mxu1 %v2933_v47 }
 0x94a   :  { %1295 = vmatpush.msra.mxu0 %v2939_v48  ;;  %1315 = vmatpush.msra.mxu1 %v2945_v49 }
 0x94c   :  { %1296 = vmatpush.msra.mxu0 %v2951_v50  ;;  %1316 = vmatpush.msra.mxu1 %v2957_v51 }
 0x94e   :  { %1297 = vmatpush.msra.mxu0 %v2963_v52  ;;  %1317 = vmatpush.msra.mxu1 %v2969_v54 }
 0x950   :  { %1298 = vmatpush.msra.mxu0 %v2975_v55  ;;  %1318 = vmatpush.msra.mxu1 %v2981_v56 }
 0x9be   :  { %v876_v2 = vpop.f32.mrf.mxu0  ;;  %v896_v7 = vpop.f32.mrf.mxu1 }
 0x9bf   :  { %v877_v3 = vadd.f32 %v876_v2, %v853_v53  ;;  %v897_v12 = vadd.f32 %v896_v7, %v854_v10  ;;  %v960_v7 = vperm.slane %v957_v39, 1  ;;  %v1063_v39 = vld [vmem:[#allocation2 + $0x10] ss:$8 sm:$0x3] }
 0x9c1   :  { %v2055_v4 = vmul.f32 -1.442695, %v877_v3  ;;  %v2056_v1 = vmul.f32 -1.442695, %v897_v12 }
 0x9c3   :  { %2183 = vpow2.f32 %v2055_v4 }
 0x9c9   :  { %v2184_v5 = vpop.eup %2183 }
 0x9ca   :  { %v902_v6 = vadd.f32 1.0, %v2184_v5 }
 0x9cc   :  { %2185 = vrcp.f32 %v902_v6  ;;  %v914_v15 = vand.u32 2147483648, %v902_v6  ;;  %v912_v17 = vand.u32 2147483647, %v902_v6  ;;  %vm908_vm7 = vweird.f32 %v902_v6 }
 0x9cd   :  { %2187 = vtanh.f32 %v897_v12 }
 0x9ce   :  { %v915_v19 = vor.u32 1.1754944e-38, %v914_v15  ;;  %vm913_vm11 = vcmp.eq.f32.partialorder %v912_v17, 8.507059e+37  ;;  %2189 = vpow2.f32 %v2056_v1 }
 0x9d2   :  { %v2186_v11 = vpop.eup %2185 }
 0x9d3   :  { %v904_v13 = vmul.f32 %v2186_v11, %v902_v6  ;;  %vm909_vm6 = vweird.f32 %v2186_v11  ;;  %v2188_v61 = vpop.eup %2187 }
 0x9d4   :  { %vm910_vm10 = vmor %vm908_vm7, %vm909_vm6  ;;  %v2190_v8 = vpop.eup %2189 }
 0x9d5   :  { %v905_v14 = vsub.f32 1.0, %v904_v13  ;;  %v922_v0 = vadd.f32 1.0, %v2190_v8 }
 0x9d7   :  { %v906_v16 = vmul.f32 %v2186_v11, %v905_v14  ;;  %2191 = vrcp.f32 %v922_v0  ;;  %v934_v30 = vand.u32 2147483648, %v922_v0  ;;  %vm928_vm13 = vweird.f32 %v922_v0 }
 0x9d8   :  { %v932_v32 = vand.u32 2147483647, %v922_v0 }
 0x9d9   :  { %v907_v18 = vadd.f32 %v2186_v11, %v906_v16  ;;  %v935_v34 = vor.u32 1.1754944e-38, %v934_v30 }
 0x9da   :  { %vm933_vm15 = vcmp.eq.f32.partialorder %v932_v32, 8.507059e+37 }
 0x9db   :  { %v911_v60 = vsel %vm910_vm10, %v2186_v11, %v907_v18 }
 0x9dc   :  { %v916_v58 = vsel %vm913_vm11, %v915_v19, %v911_v60 }
 0x9dd   :  { %v939_v63 = vmul.f32 %v2188_v61, %v916_v58  ;;  %v2192_v20 = vpop.eup %2191  ;;  %v938_v23 = vmul.f32 %v916_v58, %v2878_v29 }
 0x9de   :  { %v924_v21 = vmul.f32 %v2192_v20, %v922_v0  ;;  %vm929_vm12 = vweird.f32 %v2192_v20 }
 0x9df   :  { %941 = vrot.lane.b32.xlu0 %v939_v63, %s2328_s3  ;;  %vm930_vm14 = vmor %vm928_vm13, %vm929_vm12 }
 0x9e0   :  { %v925_v22 = vsub.f32 1.0, %v924_v21 }
 0x9e2   :  { %v926_v24 = vmul.f32 %v2192_v20, %v925_v22 }
 0x9e4   :  { %v927_v28 = vadd.f32 %v2192_v20, %v926_v24 }
 0x9e6   :  { %v931_v33 = vsel %vm930_vm14, %v2192_v20, %v927_v28 }
 0x9e7   :  { %v936_v36 = vsel %vm933_vm15, %v935_v34, %v931_v33 }
 0xa51   :  { %v942_v26 = vpop.permute.xlu0 %941 }
 0xa52   :  { %v2986_v27 = vadd.f32 %v942_v26, %v938_v23 }
 0xa54   :  { %2193 = vtanh.f32 %v2986_v27 }
 0xa5a   :  { %v2194_v35 = vpop.eup %2193 }
 0xa5b   :  { %v2989_v37 = vmul.f32 %v2194_v35, %v936_v36 }
 0xa5d   :  { %948 = vrot.lane.b32.xlu1 %v2989_v37, %s2328_s3 }
 0xacf   :  { %v949_v29 = vpop.permute.xlu1 %948 }
 0xad0   :  { %951 = vst.msk [vmem:[#allocation3 + $0x6] sm:$0x1] %vm314_vm8, %v949_v29  ;;  %2057 = vmatmul.msk.f32.vlgmr.msra.gmra.mxu2 %vm218_vm9, %v949_v29  ;;  %2058 = vmatmul.msk.f32.vlgmr.msra.gmra.mxu3 %vm218_vm9, %v949_v29 }
 0xad1   :  { %1397 = vmatpush.msra.mxu2 %v2891_v40  ;;  %1417 = vmatpush.msra.mxu3 %v2897_v41 }
 0xad3   :  { %1398 = vmatpush.msra.mxu2 %v2903_v42  ;;  %1418 = vmatpush.msra.mxu3 %v2909_v43 }
 0xad5   :  { %1399 = vmatpush.msra.mxu2 %v2915_v44  ;;  %1419 = vmatpush.msra.mxu3 %v2921_v45 }
 0xad7   :  { %1400 = vmatpush.msra.mxu2 %v2927_v46  ;;  %1420 = vmatpush.msra.mxu3 %v2933_v47 }
 0xad9   :  { %1401 = vmatpush.msra.mxu2 %v2939_v48  ;;  %1421 = vmatpush.msra.mxu3 %v2945_v49 }
 0xadb   :  { %1402 = vmatpush.msra.mxu2 %v2951_v50  ;;  %1422 = vmatpush.msra.mxu3 %v2957_v51 }
 0xadd   :  { %1403 = vmatpush.msra.mxu2 %v2963_v52  ;;  %1423 = vmatpush.msra.mxu3 %v2969_v54 }
 0xadf   :  { %1404 = vmatpush.msra.mxu2 %v2975_v55  ;;  %1424 = vmatpush.msra.mxu3 %v2981_v56 }
 0xb53   :  { %v982_v53 = vpop.f32.mrf.mxu2  ;;  %v1002_v6 = vpop.f32.mrf.mxu3 }
 0xb54   :  { %v983_v2 = vadd.f32 %v982_v53, %v959_v57  ;;  %v1003_v11 = vadd.f32 %v1002_v6, %v960_v7  ;;  %v1065_v57 = vperm.slane %v1063_v39, 0  ;;  %v1066_v7 = vperm.slane %v1063_v39, 1 }
 0xb56   :  { %v2059_v3 = vmul.f32 -1.442695, %v983_v2  ;;  %v2060_v63 = vmul.f32 -1.442695, %v1003_v11 }
 0xb58   :  { %2195 = vpow2.f32 %v2059_v3 }
 0xb5e   :  { %v2196_v4 = vpop.eup %2195 }
 0xb5f   :  { %v1008_v5 = vadd.f32 1.0, %v2196_v4 }
 0xb61   :  { %2197 = vrcp.f32 %v1008_v5  ;;  %v1020_v14 = vand.u32 2147483648, %v1008_v5  ;;  %v1018_v16 = vand.u32 2147483647, %v1008_v5  ;;  %vm1014_vm1 = vweird.f32 %v1008_v5 }
 0xb62   :  { %2199 = vtanh.f32 %v1003_v11 }
 0xb63   :  { %v1021_v18 = vor.u32 1.1754944e-38, %v1020_v14  ;;  %vm1019_vm3 = vcmp.eq.f32.partialorder %v1018_v16, 8.507059e+37  ;;  %2201 = vpow2.f32 %v2060_v63 }
 0xb67   :  { %v2198_v10 = vpop.eup %2197 }
 0xb68   :  { %v1010_v12 = vmul.f32 %v2198_v10, %v1008_v5  ;;  %vm1015_vm0 = vweird.f32 %v2198_v10  ;;  %v2200_v60 = vpop.eup %2199 }
 0xb69   :  { %vm1016_vm2 = vmor %vm1014_vm1, %vm1015_vm0  ;;  %v2202_v1 = vpop.eup %2201 }
 0xb6a   :  { %v1011_v13 = vsub.f32 1.0, %v1010_v12  ;;  %v1028_v8 = vadd.f32 1.0, %v2202_v1 }
 0xb6c   :  { %v1012_v15 = vmul.f32 %v2198_v10, %v1011_v13  ;;  %2203 = vrcp.f32 %v1028_v8  ;;  %v1040_v30 = vand.u32 2147483648, %v1028_v8  ;;  %vm1034_vm5 = vweird.f32 %v1028_v8 }
 0xb6d   :  { %v1038_v32 = vand.u32 2147483647, %v1028_v8 }
 0xb6e   :  { %v1013_v17 = vadd.f32 %v2198_v10, %v1012_v15  ;;  %v1041_v34 = vor.u32 1.1754944e-38, %v1040_v30 }
 0xb6f   :  { %vm1039_vm7 = vcmp.eq.f32.partialorder %v1038_v32, 8.507059e+37 }
 0xb70   :  { %v1017_v19 = vsel %vm1016_vm2, %v2198_v10, %v1013_v17 }
 0xb71   :  { %v1022_v61 = vsel %vm1019_vm3, %v1021_v18, %v1017_v19 }
 0xb72   :  { %v1045_v58 = vmul.f32 %v2200_v60, %v1022_v61  ;;  %v2204_v0 = vpop.eup %2203  ;;  %v1044_v24 = vmul.f32 %v1022_v61, %v2986_v27 }
 0xb73   :  { %v1030_v20 = vmul.f32 %v2204_v0, %v1028_v8  ;;  %vm1035_vm4 = vweird.f32 %v2204_v0 }
 0xb74   :  { %1047 = vrot.lane.b32.xlu2 %v1045_v58, %s2328_s3  ;;  %vm1036_vm6 = vmor %vm1034_vm5, %vm1035_vm4 }
 0xb75   :  { %v1031_v21 = vsub.f32 1.0, %v1030_v20 }
 0xb77   :  { %v1032_v22 = vmul.f32 %v2204_v0, %v1031_v21 }
 0xb79   :  { %v1033_v28 = vadd.f32 %v2204_v0, %v1032_v22 }
 0xb7b   :  { %v1037_v33 = vsel %vm1036_vm6, %v2204_v0, %v1033_v28 }
 0xb7c   :  { %v1042_v36 = vsel %vm1039_vm7, %v1041_v34, %v1037_v33 }
 0xbce   :  { %v1048_v23 = vpop.permute.xlu2 %1047 }
 0xbcf   :  { %v3014_v26 = vadd.f32 %v1048_v23, %v1044_v24 }
 0xbd1   :  { %2205 = vtanh.f32 %v3014_v26 }
 0xbd7   :  { %v2206_v35 = vpop.eup %2205 }
 0xbd8   :  { %v3017_v29 = vmul.f32 %v2206_v35, %v1042_v36 }
 0xbda   :  { %1054 = vrot.lane.b32.xlu0 %v3017_v29, %s2328_s3 }
 0xc4c   :  { %v1055_v27 = vpop.permute.xlu0 %1054 }
 0xc4d   :  { %1057 = vst.msk [vmem:[#allocation3 + $0x7] sm:$0x1] %vm314_vm8, %v1055_v27  ;;  %2061 = vmatmul.msk.f32.vlgmr.msrb.gmra.mxu0 %vm218_vm9, %v1055_v27  ;;  %2062 = vmatmul.msk.f32.vlgmr.msrb.gmra.mxu1 %vm218_vm9, %v1055_v27 }
 0xc4e   :  { %1503 = vmatpush.msrb.mxu0 %v2891_v40  ;;  %1523 = vmatpush.msrb.mxu1 %v2897_v41 }
 0xc50   :  { %1504 = vmatpush.msrb.mxu0 %v2903_v42  ;;  %1524 = vmatpush.msrb.mxu1 %v2909_v43 }
 0xc52   :  { %1505 = vmatpush.msrb.mxu0 %v2915_v44  ;;  %1525 = vmatpush.msrb.mxu1 %v2921_v45 }
 0xc54   :  { %1506 = vmatpush.msrb.mxu0 %v2927_v46  ;;  %1526 = vmatpush.msrb.mxu1 %v2933_v47 }
 0xc56   :  { %1507 = vmatpush.msrb.mxu0 %v2939_v48  ;;  %1527 = vmatpush.msrb.mxu1 %v2945_v49 }
 0xc58   :  { %1508 = vmatpush.msrb.mxu0 %v2951_v50  ;;  %1528 = vmatpush.msrb.mxu1 %v2957_v51 }
 0xc5a   :  { %1509 = vmatpush.msrb.mxu0 %v2963_v52  ;;  %1529 = vmatpush.msrb.mxu1 %v2969_v54 }
 0xc5c   :  { %1510 = vmatpush.msrb.mxu0 %v2975_v55  ;;  %1530 = vmatpush.msrb.mxu1 %v2981_v56 }
 0xcca   :  { %v1088_v53 = vpop.f32.mrf.mxu0  ;;  %v1108_v6 = vpop.f32.mrf.mxu1 }
 0xccb   :  { %v1089_v2 = vadd.f32 %v1088_v53, %v1065_v57  ;;  %v1109_v11 = vadd.f32 %v1108_v6, %v1066_v7  ;;  %v1169_v57 = vld [vmem:[#allocation2 + $0x11] ss:$8 sm:$0x3] }
 0xccc   :  { %v1171_v53 = vperm.slane %v1169_v57, 0 }
 0xccd   :  { %v2063_v3 = vmul.f32 -1.442695, %v1089_v2  ;;  %v2064_v63 = vmul.f32 -1.442695, %v1109_v11 }
 0xccf   :  { %2207 = vpow2.f32 %v2063_v3 }
 0xcd5   :  { %v2208_v4 = vpop.eup %2207 }
 0xcd6   :  { %v1114_v5 = vadd.f32 1.0, %v2208_v4 }
 0xcd8   :  { %2209 = vrcp.f32 %v1114_v5  ;;  %v1126_v14 = vand.u32 2147483648, %v1114_v5  ;;  %v1124_v16 = vand.u32 2147483647, %v1114_v5  ;;  %vm1120_vm11 = vweird.f32 %v1114_v5 }
 0xcd9   :  { %2211 = vtanh.f32 %v1109_v11 }
 0xcda   :  { %v1127_v18 = vor.u32 1.1754944e-38, %v1126_v14  ;;  %vm1125_vm13 = vcmp.eq.f32.partialorder %v1124_v16, 8.507059e+37  ;;  %2213 = vpow2.f32 %v2064_v63 }
 0xcde   :  { %v2210_v10 = vpop.eup %2209 }
 0xcdf   :  { %v1116_v12 = vmul.f32 %v2210_v10, %v1114_v5  ;;  %vm1121_vm10 = vweird.f32 %v2210_v10  ;;  %v2212_v60 = vpop.eup %2211 }
 0xce0   :  { %vm1122_vm12 = vmor %vm1120_vm11, %vm1121_vm10  ;;  %v2214_v1 = vpop.eup %2213 }
 0xce1   :  { %v1117_v13 = vsub.f32 1.0, %v1116_v12  ;;  %v1134_v8 = vadd.f32 1.0, %v2214_v1 }
 0xce3   :  { %v1118_v15 = vmul.f32 %v2210_v10, %v1117_v13  ;;  %2215 = vrcp.f32 %v1134_v8  ;;  %v1146_v32 = vand.u32 2147483648, %v1134_v8  ;;  %vm1140_vm15 = vweird.f32 %v1134_v8 }
 0xce4   :  { %v1144_v33 = vand.u32 2147483647, %v1134_v8 }
 0xce5   :  { %v1119_v17 = vadd.f32 %v2210_v10, %v1118_v15  ;;  %v1147_v35 = vor.u32 1.1754944e-38, %v1146_v32 }
 0xce6   :  { %vm1145_vm1 = vcmp.eq.f32.partialorder %v1144_v33, 8.507059e+37 }
 0xce7   :  { %v1123_v19 = vsel %vm1122_vm12, %v2210_v10, %v1119_v17  ;;  %v1172_v10 = vperm.slane %v1169_v57, 1 }
 0xce8   :  { %v1128_v61 = vsel %vm1125_vm13, %v1127_v18, %v1123_v19 }
 0xce9   :  { %v1151_v58 = vmul.f32 %v2212_v60, %v1128_v61  ;;  %v2216_v0 = vpop.eup %2215  ;;  %v1150_v24 = vmul.f32 %v1128_v61, %v3014_v26 }
 0xcea   :  { %v1136_v20 = vmul.f32 %v2216_v0, %v1134_v8  ;;  %vm1141_vm14 = vweird.f32 %v2216_v0 }
 0xceb   :  { %1153 = vrot.lane.b32.xlu1 %v1151_v58, %s2328_s3  ;;  %vm1142_vm0 = vmor %vm1140_vm15, %vm1141_vm14 }
 0xcec   :  { %v1137_v21 = vsub.f32 1.0, %v1136_v20 }
 0xcee   :  { %v1138_v22 = vmul.f32 %v2216_v0, %v1137_v21 }
 0xcf0   :  { %v1139_v30 = vadd.f32 %v2216_v0, %v1138_v22 }
 0xcf2   :  { %v1143_v34 = vsel %vm1142_vm0, %v2216_v0, %v1139_v30 }
 0xcf3   :  { %v1148_v27 = vsel %vm1145_vm1, %v1147_v35, %v1143_v34 }
 0xd5d   :  { %v1154_v23 = vpop.permute.xlu1 %1153 }
 0xd5e   :  { %v3042_v28 = vadd.f32 %v1154_v23, %v1150_v24 }
 0xd60   :  { %2217 = vtanh.f32 %v3042_v28 }
 0xd66   :  { %v2218_v36 = vpop.eup %2217 }
 0xd67   :  { %v3045_v39 = vmul.f32 %v2218_v36, %v1148_v27 }
 0xd69   :  { %1160 = vrot.lane.b32.xlu2 %v3045_v39, %s2328_s3 }
 0xdc3   :  { %v1161_v26 = vpop.permute.xlu2 %1160 }
 0xdc4   :  { %1163 = vst.msk [vmem:[#allocation3 + $0x8] sm:$0x1] %vm314_vm8, %v1161_v26  ;;  %2065 = vmatmul.msk.f32.vlgmr.msrb.gmra.mxu2 %vm218_vm9, %v1161_v26  ;;  %2066 = vmatmul.msk.f32.vlgmr.msrb.gmra.mxu3 %vm218_vm9, %v1161_v26 }
 0xdc5   :  { %1609 = vmatpush.msrb.mxu2 %v2891_v40  ;;  %1629 = vmatpush.msrb.mxu3 %v2897_v41 }
 0xdc7   :  { %1610 = vmatpush.msrb.mxu2 %v2903_v42  ;;  %1630 = vmatpush.msrb.mxu3 %v2909_v43 }
 0xdc9   :  { %1611 = vmatpush.msrb.mxu2 %v2915_v44  ;;  %1631 = vmatpush.msrb.mxu3 %v2921_v45 }
 0xdcb   :  { %1612 = vmatpush.msrb.mxu2 %v2927_v46  ;;  %1632 = vmatpush.msrb.mxu3 %v2933_v47 }
 0xdcd   :  { %1613 = vmatpush.msrb.mxu2 %v2939_v48  ;;  %1633 = vmatpush.msrb.mxu3 %v2945_v49 }
 0xdcf   :  { %1614 = vmatpush.msrb.mxu2 %v2951_v50  ;;  %1634 = vmatpush.msrb.mxu3 %v2957_v51 }
 0xdd1   :  { %1615 = vmatpush.msrb.mxu2 %v2963_v52  ;;  %1635 = vmatpush.msrb.mxu3 %v2969_v54 }
 0xdd3   :  { %1616 = vmatpush.msrb.mxu2 %v2975_v55  ;;  %1636 = vmatpush.msrb.mxu3 %v2981_v56 }
 0xe47   :  { %v1194_v2 = vpop.f32.mrf.mxu2  ;;  %v1214_v7 = vpop.f32.mrf.mxu3 }
 0xe48   :  { %v1195_v3 = vadd.f32 %v1194_v2, %v1171_v53  ;;  %v1215_v12 = vadd.f32 %v1214_v7, %v1172_v10  ;;  %v1275_v2 = vld [vmem:[#allocation2 + $0x12] ss:$8 sm:$0x3] }
 0xe4a   :  { %v2067_v4 = vmul.f32 -1.442695, %v1195_v3  ;;  %v2068_v1 = vmul.f32 -1.442695, %v1215_v12  ;;  %v1277_v3 = vperm.slane %v1275_v2, 0 }
 0xe4c   :  { %2219 = vpow2.f32 %v2067_v4 }
 0xe52   :  { %v2220_v5 = vpop.eup %2219 }
 0xe53   :  { %v1220_v6 = vadd.f32 1.0, %v2220_v5 }
 0xe55   :  { %2221 = vrcp.f32 %v1220_v6  ;;  %v1232_v15 = vand.u32 2147483648, %v1220_v6  ;;  %v1230_v17 = vand.u32 2147483647, %v1220_v6  ;;  %vm1226_vm3 = vweird.f32 %v1220_v6 }
 0xe56   :  { %2223 = vtanh.f32 %v1215_v12  ;;  %v1278_v12 = vperm.slane %v1275_v2, 1 }
 0xe57   :  { %v1233_v19 = vor.u32 1.1754944e-38, %v1232_v15  ;;  %vm1231_vm5 = vcmp.eq.f32.partialorder %v1230_v17, 8.507059e+37  ;;  %2225 = vpow2.f32 %v2068_v1 }
 0xe5b   :  { %v2222_v11 = vpop.eup %2221 }
 0xe5c   :  { %v1222_v13 = vmul.f32 %v2222_v11, %v1220_v6  ;;  %vm1227_vm2 = vweird.f32 %v2222_v11  ;;  %v2224_v61 = vpop.eup %2223 }
 0xe5d   :  { %vm1228_vm4 = vmor %vm1226_vm3, %vm1227_vm2  ;;  %v2226_v8 = vpop.eup %2225 }
 0xe5e   :  { %v1223_v14 = vsub.f32 1.0, %v1222_v13  ;;  %v1240_v0 = vadd.f32 1.0, %v2226_v8 }
 0xe60   :  { %v1224_v16 = vmul.f32 %v2222_v11, %v1223_v14  ;;  %2227 = vrcp.f32 %v1240_v0  ;;  %v1252_v34 = vand.u32 2147483648, %v1240_v0  ;;  %vm1246_vm7 = vweird.f32 %v1240_v0 }
 0xe61   :  { %v1250_v35 = vand.u32 2147483647, %v1240_v0 }
 0xe62   :  { %v1225_v18 = vadd.f32 %v2222_v11, %v1224_v16  ;;  %v1253_v27 = vor.u32 1.1754944e-38, %v1252_v34 }
 0xe63   :  { %vm1251_vm11 = vcmp.eq.f32.partialorder %v1250_v35, 8.507059e+37 }
 0xe64   :  { %v1229_v60 = vsel %vm1228_vm4, %v2222_v11, %v1225_v18 }
 0xe65   :  { %v1234_v58 = vsel %vm1231_vm5, %v1233_v19, %v1229_v60 }
 0xe66   :  { %v1257_v63 = vmul.f32 %v2224_v61, %v1234_v58  ;;  %v2228_v20 = vpop.eup %2227  ;;  %v1256_v23 = vmul.f32 %v1234_v58, %v3042_v28 }
 0xe67   :  { %v1242_v21 = vmul.f32 %v2228_v20, %v1240_v0  ;;  %vm1247_vm6 = vweird.f32 %v2228_v20 }
 0xe68   :  { %1259 = vrot.lane.b32.xlu0 %v1257_v63, %s2328_s3  ;;  %vm1248_vm10 = vmor %vm1246_vm7, %vm1247_vm6 }
 0xe69   :  { %v1243_v22 = vsub.f32 1.0, %v1242_v21 }
 0xe6b   :  { %v1244_v24 = vmul.f32 %v2228_v20, %v1243_v22 }
 0xe6d   :  { %v1245_v33 = vadd.f32 %v2228_v20, %v1244_v24 }
 0xe6f   :  { %v1249_v36 = vsel %vm1248_vm10, %v2228_v20, %v1245_v33 }
 0xe70   :  { %v1254_v57 = vsel %vm1251_vm11, %v1253_v27, %v1249_v36 }
 0xeda   :  { %v1260_v30 = vpop.permute.xlu0 %1259 }
 0xedb   :  { %v3070_v32 = vadd.f32 %v1260_v30, %v1256_v23 }
 0xedd   :  { %2229 = vtanh.f32 %v3070_v32 }
 0xee3   :  { %v2230_v26 = vpop.eup %2229 }
 0xee4   :  { %v3073_v53 = vmul.f32 %v2230_v26, %v1254_v57 }
 0xee6   :  { %1266 = vrot.lane.b32.xlu1 %v3073_v53, %s2328_s3 }
 0xf58   :  { %v1267_v28 = vpop.permute.xlu1 %1266 }
 0xf59   :  { %1269 = vst.msk [vmem:[#allocation3 + $0x9] sm:$0x1] %vm314_vm8, %v1267_v28  ;;  %2069 = vmatmul.msk.f32.vlgmr.msra.gmra.mxu0 %vm218_vm9, %v1267_v28  ;;  %2070 = vmatmul.msk.f32.vlgmr.msra.gmra.mxu1 %vm218_vm9, %v1267_v28 }
 0xf5a   :  { %1715 = vmatpush.msra.mxu0 %v2891_v40  ;;  %1735 = vmatpush.msra.mxu1 %v2897_v41 }
 0xf5c   :  { %1716 = vmatpush.msra.mxu0 %v2903_v42  ;;  %1736 = vmatpush.msra.mxu1 %v2909_v43 }
 0xf5e   :  { %1717 = vmatpush.msra.mxu0 %v2915_v44  ;;  %1737 = vmatpush.msra.mxu1 %v2921_v45 }
 0xf60   :  { %1718 = vmatpush.msra.mxu0 %v2927_v46  ;;  %1738 = vmatpush.msra.mxu1 %v2933_v47 }
 0xf62   :  { %1719 = vmatpush.msra.mxu0 %v2939_v48  ;;  %1739 = vmatpush.msra.mxu1 %v2945_v49 }
 0xf64   :  { %1720 = vmatpush.msra.mxu0 %v2951_v50  ;;  %1740 = vmatpush.msra.mxu1 %v2957_v51 }
 0xf66   :  { %1721 = vmatpush.msra.mxu0 %v2963_v52  ;;  %1741 = vmatpush.msra.mxu1 %v2969_v54 }
 0xf68   :  { %1722 = vmatpush.msra.mxu0 %v2975_v55  ;;  %1742 = vmatpush.msra.mxu1 %v2981_v56 }
 0xfd6   :  { %v1300_v4 = vpop.f32.mrf.mxu0  ;;  %v1320_v11 = vpop.f32.mrf.mxu1 }
 0xfd7   :  { %v1301_v5 = vadd.f32 %v1300_v4, %v1277_v3  ;;  %v1321_v14 = vadd.f32 %v1320_v11, %v1278_v12 }
 0xfd9   :  { %v2071_v6 = vmul.f32 -1.442695, %v1301_v5  ;;  %v2072_v0 = vmul.f32 -1.442695, %v1321_v14 }
 0xfdb   :  { %2231 = vpow2.f32 %v2071_v6 }
 0xfe1   :  { %v2232_v7 = vpop.eup %2231 }
 0xfe2   :  { %v1326_v10 = vadd.f32 1.0, %v2232_v7 }
 0xfe4   :  { %2233 = vrcp.f32 %v1326_v10  ;;  %v1338_v17 = vand.u32 2147483648, %v1326_v10  ;;  %v1336_v19 = vand.u32 2147483647, %v1326_v10  ;;  %vm1332_vm13 = vweird.f32 %v1326_v10 }
 0xfe5   :  { %2235 = vtanh.f32 %v1321_v14 }
 0xfe6   :  { %v1339_v61 = vor.u32 1.1754944e-38, %v1338_v17  ;;  %vm1337_vm15 = vcmp.eq.f32.partialorder %v1336_v19, 8.507059e+37  ;;  %2237 = vpow2.f32 %v2072_v0 }
 0xfea   :  { %v2234_v13 = vpop.eup %2233 }
 0xfeb   :  { %v1328_v15 = vmul.f32 %v2234_v13, %v1326_v10  ;;  %vm1333_vm12 = vweird.f32 %v2234_v13  ;;  %v2236_v63 = vpop.eup %2235 }
 0xfec   :  { %vm1334_vm14 = vmor %vm1332_vm13, %vm1333_vm12  ;;  %v2238_v20 = vpop.eup %2237 }
 0xfed   :  { %v1329_v16 = vsub.f32 1.0, %v1328_v15  ;;  %v1346_v21 = vadd.f32 1.0, %v2238_v20 }
 0xfef   :  { %v1330_v18 = vmul.f32 %v2234_v13, %v1329_v16  ;;  %2239 = vrcp.f32 %v1346_v21  ;;  %v1358_v27 = vand.u32 2147483648, %v1346_v21  ;;  %vm1352_vm1 = vweird.f32 %v1346_v21 }
 0xff0   :  { %v1356_v26 = vand.u32 2147483647, %v1346_v21 }
 0xff1   :  { %v1331_v60 = vadd.f32 %v2234_v13, %v1330_v18  ;;  %v1359_v28 = vor.u32 1.1754944e-38, %v1358_v27 }
 0xff2   :  { %vm1357_vm3 = vcmp.eq.f32.partialorder %v1356_v26, 8.507059e+37 }
 0xff3   :  { %v1335_v58 = vsel %vm1334_vm14, %v2234_v13, %v1331_v60 }
 0xff4   :  { %v1340_v1 = vsel %vm1337_vm15, %v1339_v61, %v1335_v58 }
 0xff5   :  { %v1363_v8 = vmul.f32 %v2236_v63, %v1340_v1  ;;  %v2240_v22 = vpop.eup %2239  ;;  %v1362_v33 = vmul.f32 %v1340_v1, %v3070_v32 }
 0xff6   :  { %v1348_v24 = vmul.f32 %v2240_v22, %v1346_v21  ;;  %vm1353_vm0 = vweird.f32 %v2240_v22 }
 0xff7   :  { %1365 = vrot.lane.b32.xlu2 %v1363_v8, %s2328_s3  ;;  %vm1354_vm2 = vmor %vm1352_vm1, %vm1353_vm0 }
 0xff8   :  { %v1349_v23 = vsub.f32 1.0, %v1348_v24 }
 0xffa   :  { %v1350_v30 = vmul.f32 %v2240_v22, %v1349_v23 }
 0xffc   :  { %v1351_v36 = vadd.f32 %v2240_v22, %v1350_v30  ;;  %v1487_v30 = vld [vmem:[#allocation2 + $0x14] ss:$8 sm:$0x3] }
 0xffe   :  { %v1355_v57 = vsel %vm1354_vm2, %v2240_v22, %v1351_v36 }
 0xfff   :  { %v1360_v3 = vsel %vm1357_vm3, %v1359_v28, %v1355_v57  ;;  %v1490_v28 = vperm.slane %v1487_v30, 1 }
0x1051   :  { %v1366_v34 = vpop.permute.xlu2 %1365 }
0x1052   :  { %v3098_v35 = vadd.f32 %v1366_v34, %v1362_v33  ;;  %v1489_v33 = vperm.slane %v1487_v30, 0 }
0x1054   :  { %2241 = vtanh.f32 %v3098_v35 }
0x105a   :  { %v2242_v2 = vpop.eup %2241 }
0x105b   :  { %v3101_v4 = vmul.f32 %v2242_v2, %v1360_v3 }
0x105d   :  { %1372 = vrot.lane.b32.xlu0 %v3101_v4, %s2328_s3 }
0x10cf   :  { %v1373_v32 = vpop.permute.xlu0 %1372 }
0x10d0   :  { %1375 = vst.msk [vmem:[#allocation3 + $0xa] sm:$0x1] %vm314_vm8, %v1373_v32  ;;  %2073 = vmatmul.msk.f32.vlgmr.msra.gmra.mxu2 %vm218_vm9, %v1373_v32  ;;  %2074 = vmatmul.msk.f32.vlgmr.msra.gmra.mxu3 %vm218_vm9, %v1373_v32 }
0x10d1   :  { %1821 = vmatpush.msra.mxu2 %v2891_v40  ;;  %1841 = vmatpush.msra.mxu3 %v2897_v41  ;;  %v1381_v40 = vld [vmem:[#allocation2 + $0x13] ss:$8 sm:$0x3] }
0x10d2   :  { %v1383_v41 = vperm.slane %v1381_v40, 0 }
0x10d3   :  { %1822 = vmatpush.msra.mxu2 %v2903_v42  ;;  %1842 = vmatpush.msra.mxu3 %v2909_v43 }
0x10d5   :  { %1823 = vmatpush.msra.mxu2 %v2915_v44  ;;  %1843 = vmatpush.msra.mxu3 %v2921_v45 }
0x10d7   :  { %1824 = vmatpush.msra.mxu2 %v2927_v46  ;;  %1844 = vmatpush.msra.mxu3 %v2933_v47 }
0x10d9   :  { %1825 = vmatpush.msra.mxu2 %v2939_v48  ;;  %1845 = vmatpush.msra.mxu3 %v2945_v49  ;;  %v1384_v48 = vperm.slane %v1381_v40, 1 }
0x10db   :  { %1826 = vmatpush.msra.mxu2 %v2951_v50  ;;  %1846 = vmatpush.msra.mxu3 %v2957_v51 }
0x10dd   :  { %1827 = vmatpush.msra.mxu2 %v2963_v52  ;;  %1847 = vmatpush.msra.mxu3 %v2969_v54 }
0x10df   :  { %1828 = vmatpush.msra.mxu2 %v2975_v55  ;;  %1848 = vmatpush.msra.mxu3 %v2981_v56 }
0x1153   :  { %v1406_v42 = vpop.f32.mrf.mxu2  ;;  %v1426_v47 = vpop.f32.mrf.mxu3 }
0x1154   :  { %v1407_v43 = vadd.f32 %v1406_v42, %v1383_v41  ;;  %v1427_v50 = vadd.f32 %v1426_v47, %v1384_v48 }
0x1156   :  { %v2075_v44 = vmul.f32 -1.442695, %v1407_v43  ;;  %v2076_v13 = vmul.f32 -1.442695, %v1427_v50 }
0x1158   :  { %2243 = vpow2.f32 %v2075_v44 }
0x115e   :  { %v2244_v45 = vpop.eup %2243 }
0x115f   :  { %v1432_v46 = vadd.f32 1.0, %v2244_v45 }
0x1161   :  { %2245 = vrcp.f32 %v1432_v46  ;;  %v1444_v54 = vand.u32 2147483648, %v1432_v46  ;;  %v1442_v56 = vand.u32 2147483647, %v1432_v46  ;;  %vm1438_vm5 = vweird.f32 %v1432_v46 }
0x1162   :  { %2247 = vtanh.f32 %v1427_v50 }
0x1163   :  { %v1445_v6 = vor.u32 1.1754944e-38, %v1444_v54  ;;  %vm1443_vm7 = vcmp.eq.f32.partialorder %v1442_v56, 8.507059e+37  ;;  %2249 = vpow2.f32 %v2076_v13 }
0x1167   :  { %v2246_v49 = vpop.eup %2245 }
0x1168   :  { %v1434_v51 = vmul.f32 %v2246_v49, %v1432_v46  ;;  %vm1439_vm4 = vweird.f32 %v2246_v49  ;;  %v2248_v10 = vpop.eup %2247 }
0x1169   :  { %vm1440_vm6 = vmor %vm1438_vm5, %vm1439_vm4  ;;  %v2250_v14 = vpop.eup %2249 }
0x116a   :  { %v1435_v52 = vsub.f32 1.0, %v1434_v51  ;;  %v1452_v15 = vadd.f32 1.0, %v2250_v14 }
0x116c   :  { %v1436_v55 = vmul.f32 %v2246_v49, %v1435_v52  ;;  %2251 = vrcp.f32 %v1452_v15  ;;  %v1464_v1 = vand.u32 2147483648, %v1452_v15  ;;  %vm1458_vm11 = vweird.f32 %v1452_v15 }
0x116d   :  { %v1462_v8 = vand.u32 2147483647, %v1452_v15 }
0x116e   :  { %v1437_v5 = vadd.f32 %v2246_v49, %v1436_v55  ;;  %v1465_v20 = vor.u32 1.1754944e-38, %v1464_v1 }
0x116f   :  { %vm1463_vm13 = vcmp.eq.f32.partialorder %v1462_v8, 8.507059e+37 }
0x1170   :  { %v1441_v7 = vsel %vm1440_vm6, %v2246_v49, %v1437_v5 }
0x1171   :  { %v1446_v11 = vsel %vm1443_vm7, %v1445_v6, %v1441_v7 }
0x1172   :  { %v1469_v12 = vmul.f32 %v2248_v10, %v1446_v11  ;;  %v2252_v16 = vpop.eup %2251  ;;  %v1468_v60 = vmul.f32 %v1446_v11, %v3098_v35 }
0x1173   :  { %v1454_v17 = vmul.f32 %v2252_v16, %v1452_v15  ;;  %vm1459_vm10 = vweird.f32 %v2252_v16 }
0x1174   :  { %1471 = vrot.lane.b32.xlu1 %v1469_v12, %s2328_s3  ;;  %vm1460_vm12 = vmor %vm1458_vm11, %vm1459_vm10 }
0x1175   :  { %v1455_v18 = vsub.f32 1.0, %v1454_v17 }
0x1177   :  { %v1456_v19 = vmul.f32 %v2252_v16, %v1455_v18 }
0x1179   :  { %v1457_v63 = vadd.f32 %v2252_v16, %v1456_v19 }
0x117b   :  { %v1461_v0 = vsel %vm1460_vm12, %v2252_v16, %v1457_v63 }
0x117c   :  { %v1466_v22 = vsel %vm1463_vm13, %v1465_v20, %v1461_v0 }
0x11e6   :  { %v1472_v61 = vpop.permute.xlu1 %1471 }
0x11e7   :  { %v1474_v58 = vadd.f32 %v1472_v61, %v1468_v60  ;;  %v1593_v60 = vld [vmem:[#allocation2 + $0x15] ss:$8 sm:$0x3] }
0x11e8   :  { %v1595_v61 = vperm.slane %v1593_v60, 0 }
0x11e9   :  { %2253 = vtanh.f32 %v1474_v58 }
0x11ef   :  { %v2254_v21 = vpop.eup %2253 }
0x11f0   :  { %v3126_v24 = vmul.f32 %v2254_v21, %v1466_v22  ;;  %v1596_v21 = vperm.slane %v1593_v60, 1 }
0x11f2   :  { %1478 = vrot.lane.b32.xlu2 %v3126_v24, %s2328_s3 }
0x124c   :  { %v1479_v23 = vpop.permute.xlu2 %1478 }
0x124d   :  { %1481 = vst.msk [vmem:[#allocation3 + $0xb] sm:$0x1] %vm314_vm8, %v1479_v23  ;;  %2077 = vmatmul.msk.f32.vlgmr.msrb.gmra.mxu0 %vm218_vm9, %v1479_v23  ;;  %2078 = vmatmul.msk.f32.vlgmr.msrb.gmra.mxu1 %vm218_vm9, %v1479_v23 }
0x12ca   :  { %v1512_v34 = vpop.f32.mrf.mxu0  ;;  %v1532_v57 = vpop.f32.mrf.mxu1 }
0x12cb   :  { %v1513_v35 = vadd.f32 %v1512_v34, %v1489_v33  ;;  %v1533_v3 = vadd.f32 %v1532_v57, %v1490_v28 }
0x12cd   :  { %v2079_v36 = vmul.f32 -1.442695, %v1513_v35  ;;  %v2080_v50 = vmul.f32 -1.442695, %v1533_v3 }
0x12cf   :  { %2255 = vpow2.f32 %v2079_v36 }
0x12d5   :  { %v2256_v27 = vpop.eup %2255 }
0x12d6   :  { %v1538_v26 = vadd.f32 1.0, %v2256_v27 }
0x12d8   :  { %2257 = vrcp.f32 %v1538_v26  ;;  %v1550_v41 = vand.u32 2147483648, %v1538_v26  ;;  %v1548_v43 = vand.u32 2147483647, %v1538_v26  ;;  %vm1544_vm15 = vweird.f32 %v1538_v26 }
0x12d9   :  { %2259 = vtanh.f32 %v1533_v3 }
0x12da   :  { %v1551_v45 = vor.u32 1.1754944e-38, %v1550_v41  ;;  %vm1549_vm1 = vcmp.eq.f32.partialorder %v1548_v43, 8.507059e+37  ;;  %2261 = vpow2.f32 %v2080_v50 }
0x12de   :  { %v2258_v2 = vpop.eup %2257 }
0x12df   :  { %v1540_v32 = vmul.f32 %v2258_v2, %v1538_v26  ;;  %vm1545_vm14 = vweird.f32 %v2258_v2  ;;  %v2260_v47 = vpop.eup %2259 }
0x12e0   :  { %vm1546_vm0 = vmor %vm1544_vm15, %vm1545_vm14  ;;  %v2262_v51 = vpop.eup %2261 }
0x12e1   :  { %v1541_v40 = vsub.f32 1.0, %v1540_v32  ;;  %v1558_v52 = vadd.f32 1.0, %v2262_v51 }
0x12e3   :  { %v1542_v42 = vmul.f32 %v2258_v2, %v1541_v40  ;;  %2263 = vrcp.f32 %v1558_v52  ;;  %v1570_v12 = vand.u32 2147483648, %v1558_v52  ;;  %vm1564_vm3 = vweird.f32 %v1558_v52 }
0x12e4   :  { %v1568_v13 = vand.u32 2147483647, %v1558_v52 }
0x12e5   :  { %v1543_v44 = vadd.f32 %v2258_v2, %v1542_v42  ;;  %v1571_v15 = vor.u32 1.1754944e-38, %v1570_v12 }
0x12e6   :  { %vm1569_vm5 = vcmp.eq.f32.partialorder %v1568_v13, 8.507059e+37  ;;  %v1910_v13 = vld [vmem:[#allocation3] sm:$0xff] }
0x12e7   :  { %v1547_v46 = vsel %vm1546_vm0, %v2258_v2, %v1543_v44  ;;  %vm1922_vm0 = vcmask 261120  }
0x12e8   :  { %v1552_v48 = vsel %vm1549_vm1, %v1551_v45, %v1547_v46 }
0x12e9   :  { %v1575_v49 = vmul.f32 %v2260_v47, %v1552_v48  ;;  %v2264_v54 = vpop.eup %2263  ;;  %v1574_v6 = vmul.f32 %v1552_v48, %v1474_v58 }
0x12ea   :  { %v1560_v55 = vmul.f32 %v2264_v54, %v1558_v52  ;;  %vm1565_vm2 = vweird.f32 %v2264_v54 }
0x12eb   :  { %1577 = vrot.lane.b32.xlu0 %v1575_v49, %s2328_s3  ;;  %vm1566_vm4 = vmor %vm1564_vm3, %vm1565_vm2 }
0x12ec   :  { %v1561_v56 = vsub.f32 1.0, %v1560_v55 }
0x12ee   :  { %v1562_v5 = vmul.f32 %v2264_v54, %v1561_v56 }
0x12f0   :  { %v1563_v11 = vadd.f32 %v2264_v54, %v1562_v5 }
0x12f2   :  { %v1567_v14 = vsel %vm1566_vm4, %v2264_v54, %v1563_v11  ;;  %v1912_v11 = vld [vmem:[%s3252_s4] sm:$0xff] }
0x12f3   :  { %v1572_v17 = vsel %vm1569_vm5, %v1571_v15, %v1567_v14  ;;  %v1699_v14 = vld [vmem:[#allocation2 + $0x16] ss:$8 sm:$0x3] }
0x12f4   :  { %v1701_v15 = vperm.slane %v1699_v14, 0 }
0x135d   :  { %v1578_v7 = vpop.permute.xlu0 %1577 }
0x135e   :  { %v1580_v10 = vadd.f32 %v1578_v7, %v1574_v6  ;;  %v1915_v6 = vld [vmem:[%s3252_s4 + $0x18] sm:$0xff]  ;;  %v1914_v7 = vld [vmem:[%s3252_s4 + $0x10] sm:$0xff] }
0x135f   :  { %1970 = vmatpush.msrb.mxu1 %v1915_v6 }
0x1360   :  { %2265 = vtanh.f32 %v1580_v10 }
0x1361   :  { %1971 = vmatpush.msrb.mxu1 %v1914_v7 }
0x1366   :  { %v2266_v16 = vpop.eup %2265 }
0x1367   :  { %v3134_v18 = vmul.f32 %v2266_v16, %v1572_v17 }
0x1369   :  { %1584 = vrot.lane.b32.xlu1 %v3134_v18, %s2328_s3 }
0x13db   :  { %v1585_v19 = vpop.permute.xlu1 %1584 }
0x13dc   :  { %1587 = vst.msk [vmem:[#allocation3 + $0xc] sm:$0x1] %vm314_vm8, %v1585_v19  ;;  %2081 = vmatmul.msk.f32.vlgmr.msrb.gmra.mxu2 %vm218_vm9, %v1585_v19  ;;  %2082 = vmatmul.msk.f32.vlgmr.msrb.gmra.mxu3 %vm218_vm9, %v1585_v19 }
0x13dd   :  { %2103 = vmatpush.msrb.mxu3 %v1915_v6 }
0x13df   :  { %2104 = vmatpush.msrb.mxu3 %v1914_v7 }
0x145f   :  { %v1618_v58 = vpop.f32.mrf.mxu2  ;;  %v1638_v20 = vpop.f32.mrf.mxu3 }
0x1460   :  { %v1619_v63 = vadd.f32 %v1618_v58, %v1595_v61  ;;  %v1639_v23 = vadd.f32 %v1638_v20, %v1596_v21 }
0x1462   :  { %v2083_v1 = vmul.f32 -1.442695, %v1619_v63  ;;  %v2084_v32 = vmul.f32 -1.442695, %v1639_v23  ;;  %v1702_v63 = vperm.slane %v1699_v14, 1 }
0x1464   :  { %2267 = vpow2.f32 %v2083_v1 }
0x146a   :  { %v2268_v8 = vpop.eup %2267 }
0x146b   :  { %v1644_v0 = vadd.f32 1.0, %v2268_v8 }
0x146d   :  { %2269 = vrcp.f32 %v1644_v0  ;;  %v1656_v34 = vand.u32 2147483648, %v1644_v0  ;;  %v1654_v36 = vand.u32 2147483647, %v1644_v0  ;;  %vm1650_vm7 = vweird.f32 %v1644_v0 }
0x146e   :  { %2271 = vtanh.f32 %v1639_v23 }
0x146f   :  { %v1657_v26 = vor.u32 1.1754944e-38, %v1656_v34  ;;  %vm1655_vm11 = vcmp.eq.f32.partialorder %v1654_v36, 8.507059e+37  ;;  %2273 = vpow2.f32 %v2084_v32 }
0x1473   :  { %v2270_v22 = vpop.eup %2269 }
0x1474   :  { %v1646_v30 = vmul.f32 %v2270_v22, %v1644_v0  ;;  %vm1651_vm6 = vweird.f32 %v2270_v22  ;;  %v2272_v28 = vpop.eup %2271 }
0x1475   :  { %vm1652_vm10 = vmor %vm1650_vm7, %vm1651_vm6  ;;  %v2274_v40 = vpop.eup %2273 }
0x1476   :  { %v1647_v33 = vsub.f32 1.0, %v1646_v30  ;;  %v1664_v41 = vadd.f32 1.0, %v2274_v40 }
0x1478   :  { %v1648_v35 = vmul.f32 %v2270_v22, %v1647_v33  ;;  %2275 = vrcp.f32 %v1664_v41  ;;  %v1676_v50 = vand.u32 2147483648, %v1664_v41  ;;  %vm1670_vm13 = vweird.f32 %v1664_v41 }
0x1479   :  { %v1674_v51 = vand.u32 2147483647, %v1664_v41 }
0x147a   :  { %v1649_v27 = vadd.f32 %v2270_v22, %v1648_v35  ;;  %v1677_v54 = vor.u32 1.1754944e-38, %v1676_v50 }
0x147b   :  { %vm1675_vm15 = vcmp.eq.f32.partialorder %v1674_v51, 8.507059e+37 }
0x147c   :  { %v1653_v57 = vsel %vm1652_vm10, %v2270_v22, %v1649_v27 }
0x147d   :  { %v1658_v2 = vsel %vm1655_vm11, %v1657_v26, %v1653_v57 }
0x147e   :  { %v1681_v3 = vmul.f32 %v2272_v28, %v1658_v2  ;;  %v2276_v42 = vpop.eup %2275  ;;  %v1680_v46 = vmul.f32 %v1658_v2, %v1580_v10  ;;  %v1913_v10 = vld [vmem:[%s3252_s4 + $0x8] sm:$0xff]  ;;  %s2329_s4 = smov 32  }
0x147f   :  { %v1666_v43 = vmul.f32 %v2276_v42, %v1664_v41  ;;  %vm1671_vm12 = vweird.f32 %v2276_v42  ;;  %1972 = vmatpush.msrb.mxu1 %v1913_v10  ;;  %2105 = vmatpush.msrb.mxu3 %v1913_v10 }
0x1480   :  { %1683 = vrot.lane.b32.xlu2 %v1681_v3, %s2328_s3  ;;  %vm1672_vm14 = vmor %vm1670_vm13, %vm1671_vm12 }
0x1481   :  { %v1667_v44 = vsub.f32 1.0, %v1666_v43  ;;  %1973 = vmatpush.msrb.mxu1 %v1912_v11  ;;  %2106 = vmatpush.msrb.mxu3 %v1912_v11 }
0x1483   :  { %v1668_v45 = vmul.f32 %v2276_v42, %v1667_v44 }
0x1485   :  { %v1669_v49 = vadd.f32 %v2276_v42, %v1668_v45 }
0x1487   :  { %v1673_v52 = vsel %vm1672_vm14, %v2276_v42, %v1669_v49 }
0x1488   :  { %v1678_v56 = vsel %vm1675_vm15, %v1677_v54, %v1673_v52 }
0x14da   :  { %v1684_v47 = vpop.permute.xlu2 %1683 }
0x14db   :  { %v3142_v48 = vadd.f32 %v1684_v47, %v1680_v46 }
0x14dd   :  { %2277 = vtanh.f32 %v3142_v48 }
0x14e3   :  { %v2278_v55 = vpop.eup %2277 }
0x14e4   :  { %v3145_v5 = vmul.f32 %v2278_v55, %v1678_v56  ;;  %v1805_v55 = vld [vmem:[#allocation2 + $0x17] ss:$8 sm:$0x3] }
0x14e5   :  { %v1807_v56 = vperm.slane %v1805_v55, 0  ;;  %v1808_v14 = vperm.slane %v1805_v55, 1 }
0x14e6   :  { %1690 = vrot.lane.b32.xlu0 %v3145_v5, %s2328_s3 }
0x1558   :  { %v1691_v12 = vpop.permute.xlu0 %1690 }
0x1559   :  { %1693 = vst.msk [vmem:[#allocation3 + $0xd] sm:$0x1] %vm314_vm8, %v1691_v12  ;;  %2085 = vmatmul.msk.f32.vlgmr.msra.gmra.mxu0 %vm218_vm9, %v1691_v12  ;;  %2086 = vmatmul.msk.f32.vlgmr.msra.gmra.mxu1 %vm218_vm9, %v1691_v12 }
0x1561   :  { %2095 = vmatmul.msk.f32.vlgmr.msrb.gmra.mxu1 %vm1922_vm0, %v1910_v13 }
0x15d6   :  { %v1724_v16 = vpop.f32.mrf.mxu0  ;;  %v1744_v58 = vpop.f32.mrf.mxu1 }
0x15d7   :  { %v1725_v17 = vadd.f32 %v1724_v16, %v1701_v15  ;;  %v1745_v8 = vadd.f32 %v1744_v58, %v1702_v63 }
0x15d9   :  { %v2087_v19 = vmul.f32 -1.442695, %v1725_v17  ;;  %v2088_v26 = vmul.f32 -1.442695, %v1745_v8 }
0x15db   :  { %2279 = vpow2.f32 %v2087_v19 }
0x15e1   :  { %v2280_v60 = vpop.eup %2279 }
0x15e2   :  { %v1750_v61 = vadd.f32 1.0, %v2280_v60 }
0x15e4   :  { %2281 = vrcp.f32 %v1750_v61  ;;  %v1762_v21 = vand.u32 2147483648, %v1750_v61  ;;  %v1760_v23 = vand.u32 2147483647, %v1750_v61  ;;  %vm1756_vm2 = vweird.f32 %v1750_v61 }
0x15e5   :  { %2283 = vtanh.f32 %v1745_v8 }
0x15e6   :  { %v1763_v33 = vor.u32 1.1754944e-38, %v1762_v21  ;;  %vm1761_vm4 = vcmp.eq.f32.partialorder %v1760_v23, 8.507059e+37  ;;  %2285 = vpow2.f32 %v2088_v26 }
0x15ea   :  { %v2282_v1 = vpop.eup %2281 }
0x15eb   :  { %v1752_v0 = vmul.f32 %v2282_v1, %v1750_v61  ;;  %vm1757_vm1 = vweird.f32 %v2282_v1  ;;  %v2284_v35 = vpop.eup %2283 }
0x15ec   :  { %vm1758_vm3 = vmor %vm1756_vm2, %vm1757_vm1  ;;  %v2286_v57 = vpop.eup %2285 }
0x15ed   :  { %v1753_v20 = vsub.f32 1.0, %v1752_v0  ;;  %v1770_v28 = vadd.f32 1.0, %v2286_v57 }
0x15ef   :  { %v1754_v22 = vmul.f32 %v2282_v1, %v1753_v20  ;;  %2287 = vrcp.f32 %v1770_v28  ;;  %vm1776_vm6 = vweird.f32 %v1770_v28 }
0x15f1   :  { %v1755_v30 = vadd.f32 %v2282_v1, %v1754_v22 }
0x15f3   :  { %v1759_v34 = vsel %vm1758_vm3, %v2282_v1, %v1755_v30 }
0x15f4   :  { %v1764_v36 = vsel %vm1761_vm4, %v1763_v33, %v1759_v34  ;;  %v1921_v33 = vld [vmem:[%s3253_s5 + $0x18] sm:$0xff]  ;;  %v1920_v34 = vld [vmem:[%s3253_s5 + $0x10] sm:$0xff] }
0x15f5   :  { %v1787_v27 = vmul.f32 %v2284_v35, %v1764_v36  ;;  %v2288_v2 = vpop.eup %2287  ;;  %2099 = vmatpush.msrb.mxu2 %v1921_v33  ;;  %1941 = vmatpush.msrb.mxu0 %v1921_v33 }
0x15f6   :  { %v1772_v3 = vmul.f32 %v2288_v2, %v1770_v28  ;;  %vm1777_vm5 = vweird.f32 %v2288_v2 }
0x15f7   :  { %1789 = vrot.lane.b32.xlu1 %v1787_v27, %s2328_s3  ;;  %vm1778_vm7 = vmor %vm1776_vm6, %vm1777_vm5  ;;  %2100 = vmatpush.msrb.mxu2 %v1920_v34 }
0x15f8   :  { %1942 = vmatpush.msrb.mxu0 %v1920_v34 }
0x15ff   :  { %316 = vrot.lane.b32.xlu1 %v2741_v31, %s2329_s4  ;;  %v1773_v31 = vsub.f32 1.0, %v1772_v3 }
0x1601   :  { %v1774_v32 = vmul.f32 %v2288_v2, %v1773_v31 }
0x1607   :  { %634 = vrot.lane.b32.xlu1 %v2825_v62, %s2329_s4  ;;  %v1786_v62 = vmul.f32 %v1764_v36, %v3142_v48 }
0x160f   :  { %952 = vrot.lane.b32.xlu1 %v2989_v37, %s2329_s4  ;;  %v1775_v37 = vadd.f32 %v2288_v2, %v1774_v32 }
0x1611   :  { %v1779_v42 = vsel %vm1778_vm7, %v2288_v2, %v1775_v37 }
0x1617   :  { %1164 = vrot.lane.b32.xlu1 %v3045_v39, %s2329_s4  ;;  %v1782_v39 = vand.u32 2147483648, %v1770_v28 }
0x1619   :  { %v1783_v43 = vor.u32 1.1754944e-38, %v1782_v39 }
0x161f   :  { %1482 = vrot.lane.b32.xlu1 %v3126_v24, %s2329_s4  ;;  %v1780_v24 = vand.u32 2147483647, %v1770_v28 }
0x1621   :  { %vm1781_vm10 = vcmp.eq.f32.partialorder %v1780_v24, 8.507059e+37 }
0x1622   :  { %v1784_v46 = vsel %vm1781_vm10, %v1783_v43, %v1779_v42 }
0x1669   :  { %v1790_v40 = vpop.permute.xlu1 %1789 }
0x166a   :  { %v3177_v41 = vadd.f32 %v1790_v40, %v1786_v62 }
0x166c   :  { %2289 = vtanh.f32 %v3177_v41 }
0x1671   :  { %v317_v44 = vpop.permute.xlu1 %316 }
0x1672   :  { %v2290_v45 = vpop.eup %2289  ;;  %319 = vst.msk [vmem:[#allocation4 + $0xf] sm:$0x1] %vm314_vm8, %v317_v44 }
0x1673   :  { %v1794_v47 = vmul.f32 %v2290_v45, %v1784_v46 }
0x1675   :  { %1800 = vrot.lane.b32.xlu1 %v1794_v47, %s2329_s4  ;;  %1796 = vrot.lane.b32.xlu2 %v1794_v47, %s2328_s3 }
0x1679   :  { %v635_v48 = vpop.permute.xlu1 %634 }
0x167a   :  { %637 = vst.msk [vmem:[#allocation4 + $0xc] sm:$0x1] %vm314_vm8, %v635_v48 }
0x167d   :  { %422 = vrot.lane.b32.xlu2 %v2769_v25, %s2329_s4 }
0x1681   :  { %v953_v49 = vpop.permute.xlu1 %952 }
0x1682   :  { %955 = vst.msk [vmem:[#allocation4 + $0x9] sm:$0x1] %vm314_vm8, %v953_v49 }
0x1685   :  { %740 = vrot.lane.b32.xlu2 %v2853_v59, %s2329_s4 }
0x1689   :  { %v1165_v50 = vpop.permute.xlu1 %1164 }
0x168a   :  { %1167 = vst.msk [vmem:[#allocation4 + $0x7] sm:$0x1] %vm314_vm8, %v1165_v50 }
0x168d   :  { %1058 = vrot.lane.b32.xlu2 %v3017_v29, %s2329_s4 }
0x1691   :  { %v1483_v51 = vpop.permute.xlu1 %1482 }
0x1692   :  { %1485 = vst.msk [vmem:[#allocation4 + $0x4] sm:$0x1] %vm314_vm8, %v1483_v51 }
0x1695   :  { %1270 = vrot.lane.b32.xlu2 %v3073_v53, %s2329_s4 }
0x169d   :  { %1588 = vrot.lane.b32.xlu2 %v3134_v18, %s2329_s4 }
0x16cf   :  { %v1797_v25 = vpop.permute.xlu2 %1796 }
0x16d0   :  { %1799 = vst.msk [vmem:[#allocation3 + $0xe] sm:$0x1] %vm314_vm8, %v1797_v25  ;;  %2089 = vmatmul.msk.f32.vlgmr.msra.gmra.mxu2 %vm218_vm9, %v1797_v25  ;;  %2090 = vmatmul.msk.f32.vlgmr.msra.gmra.mxu3 %vm218_vm9, %v1797_v25  ;;  %v1975_v25 = vpop.f32.mrf.mxu1 }
0x16d7   :  { %v423_v59 = vpop.permute.xlu2 %422 }
0x16d8   :  { %425 = vst.msk [vmem:[#allocation4 + $0xe] sm:$0x1] %vm314_vm8, %v423_v59 }
0x16df   :  { %v741_v29 = vpop.permute.xlu2 %740 }
0x16e0   :  { %743 = vst.msk [vmem:[#allocation4 + $0xb] sm:$0x1] %vm314_vm8, %v741_v29 }
0x16e7   :  { %v1801_v52 = vpop.permute.xlu1 %1800  ;;  %v1059_v54 = vpop.permute.xlu2 %1058 }
0x16e8   :  { %1803 = vst.msk [vmem:[#allocation4 + $0x1] sm:$0x1] %vm314_vm8, %v1801_v52 }
0x16e9   :  { %1061 = vst.msk [vmem:[#allocation4 + $0x8] sm:$0x1] %vm314_vm8, %v1059_v54 }
0x16ef   :  { %v1271_v53 = vpop.permute.xlu2 %1270 }
0x16f0   :  { %1273 = vst.msk [vmem:[#allocation4 + $0x6] sm:$0x1] %vm314_vm8, %v1271_v53 }
0x16f7   :  { %v1589_v18 = vpop.permute.xlu2 %1588 }
0x16f8   :  { %1591 = vst.msk [vmem:[#allocation4 + $0x3] sm:$0x1] %vm314_vm8, %v1589_v18 }
0x1753   :  { %v1830_v6 = vpop.f32.mrf.mxu2  ;;  %v1850_v13 = vpop.f32.mrf.mxu3 }
0x1754   :  { %v1831_v7 = vadd.f32 %v1830_v6, %v1807_v56  ;;  %v1851_v16 = vadd.f32 %v1850_v13, %v1808_v14 }
0x1756   :  { %v2091_v10 = vmul.f32 -1.442695, %v1831_v7  ;;  %v2092_v22 = vmul.f32 -1.442695, %v1851_v16 }
0x1758   :  { %2291 = vpow2.f32 %v2091_v10 }
0x175e   :  { %v2292_v11 = vpop.eup %2291 }
0x175f   :  { %v1856_v12 = vadd.f32 1.0, %v2292_v11 }
0x1761   :  { %2293 = vrcp.f32 %v1856_v12  ;;  %v1868_v60 = vand.u32 2147483648, %v1856_v12  ;;  %v1866_v58 = vand.u32 2147483647, %v1856_v12  ;;  %vm1862_vm11 = vweird.f32 %v1856_v12 }
0x1762   :  { %2295 = vtanh.f32 %v1851_v16 }
0x1763   :  { %v1869_v1 = vor.u32 1.1754944e-38, %v1868_v60  ;;  %vm1867_vm13 = vcmp.eq.f32.partialorder %v1866_v58, 8.507059e+37  ;;  %2297 = vpow2.f32 %v2092_v22 }
0x1767   :  { %v2294_v15 = vpop.eup %2293 }
0x1768   :  { %v1858_v17 = vmul.f32 %v2294_v15, %v1856_v12  ;;  %vm1863_vm9 = vweird.f32 %v2294_v15  ;;  %v2296_v0 = vpop.eup %2295 }
0x1769   :  { %vm1864_vm12 = vmor %vm1862_vm11, %vm1863_vm9  ;;  %v2298_v23 = vpop.eup %2297 }
0x176a   :  { %v1859_v19 = vsub.f32 1.0, %v1858_v17  ;;  %v1876_v30 = vadd.f32 1.0, %v2298_v23 }
0x176c   :  { %v1860_v61 = vmul.f32 %v2294_v15, %v1859_v19  ;;  %2299 = vrcp.f32 %v1876_v30  ;;  %v1888_v3 = vand.u32 2147483648, %v1876_v30  ;;  %vm1882_vm15 = vweird.f32 %v1876_v30 }
0x176d   :  { %v1886_v31 = vand.u32 2147483647, %v1876_v30 }
0x176e   :  { %v1861_v63 = vadd.f32 %v2294_v15, %v1860_v61  ;;  %v1889_v62 = vor.u32 1.1754944e-38, %v1888_v3 }
0x176f   :  { %vm1887_vm2 = vcmp.eq.f32.partialorder %v1886_v31, 8.507059e+37 }
0x1770   :  { %v1865_v8 = vsel %vm1864_vm12, %v2294_v15, %v1861_v63 }
0x1771   :  { %v1870_v20 = vsel %vm1867_vm13, %v1869_v1, %v1865_v8 }
0x1772   :  { %v1893_v21 = vmul.f32 %v2296_v0, %v1870_v20  ;;  %v1892_v26 = vmul.f32 %v1870_v20, %v3177_v41 }
0x1774   :  { %1895 = vrot.lane.b32.xlu0 %v1893_v21, %s2328_s3 }
0x177c   :  { %528 = vrot.lane.b32.xlu0 %v2797_v9, %s2329_s4  ;;  %v2300_v9 = vpop.eup %2299 }
0x177d   :  { %v1878_v35 = vmul.f32 %v2300_v9, %v1876_v30  ;;  %vm1883_vm14 = vweird.f32 %v2300_v9 }
0x177e   :  { %vm1884_vm1 = vmor %vm1882_vm15, %vm1883_vm14 }
0x177f   :  { %v1879_v36 = vsub.f32 1.0, %v1878_v35 }
0x1781   :  { %v1880_v27 = vmul.f32 %v2300_v9, %v1879_v36 }
0x1783   :  { %v1881_v2 = vadd.f32 %v2300_v9, %v1880_v27 }
0x1784   :  { %846 = vrot.lane.b32.xlu0 %v2881_v38, %s2329_s4  ;;  %v1919_v38 = vld [vmem:[%s3253_s5 + $0x8] sm:$0xff] }
0x1785   :  { %2101 = vmatpush.msrb.mxu2 %v1919_v38  ;;  %1943 = vmatpush.msrb.mxu0 %v1919_v38  ;;  %v1885_v32 = vsel %vm1884_vm1, %v2300_v9, %v1881_v2 }
0x1786   :  { %v1890_v39 = vsel %vm1887_vm2, %v1889_v62, %v1885_v32 }
0x178c   :  { %1376 = vrot.lane.b32.xlu0 %v3101_v4, %s2329_s4  ;;  %v1918_v4 = vld [vmem:[%s3253_s5] sm:$0xff] }
0x178d   :  { %2102 = vmatpush.msrb.mxu2 %v1918_v4  ;;  %1944 = vmatpush.msrb.mxu0 %v1918_v4 }
0x17e6   :  { %v1896_v57 = vpop.permute.xlu0 %1895 }
0x17e7   :  { %v1898_v28 = vadd.f32 %v1896_v57, %v1892_v26 }
0x17e9   :  { %2301 = vtanh.f32 %v1898_v28 }
0x17ee   :  { %v529_v40 = vpop.permute.xlu0 %528 }
0x17ef   :  { %v2302_v37 = vpop.eup %2301  ;;  %531 = vst.msk [vmem:[#allocation4 + $0xd] sm:$0x1] %vm314_vm8, %v529_v40 }
0x17f0   :  { %v1900_v24 = vmul.f32 %v2302_v37, %v1890_v39 }
0x17f2   :  { %1906 = vrot.lane.b32.xlu2 %v1900_v24, %s2329_s4  ;;  %1902 = vrot.lane.b32.xlu0 %v1900_v24, %s2328_s3 }
0x17f6   :  { %v847_v41 = vpop.permute.xlu0 %846 }
0x17f7   :  { %849 = vst.msk [vmem:[#allocation4 + $0xa] sm:$0x1] %vm314_vm8, %v847_v41 }
0x17fa   :  { %1694 = vrot.lane.b32.xlu0 %v3145_v5, %s2329_s4  ;;  %v2110_v5 = vld [vmem:[%s3254_s6] ss:$0 sm:$0xff] }
0x17fe   :  { %v1377_v42 = vpop.permute.xlu0 %1376  ;;  %v1917_v43 = vld [vmem:[#allocation4 + $0x8] sm:$0xff] }
0x17ff   :  { %1379 = vst.msk [vmem:[#allocation4 + $0x5] sm:$0x1] %vm314_vm8, %v1377_v42  ;;  %2094 = vmatmul.msk.f32.vlgmr.msrb.gmra.mxu2 %vm1922_vm0, %v1917_v43 }
0x184c   :  { %v1907_v44 = vpop.permute.xlu2 %1906 }
0x184d   :  { %1909 = vst.msk [vmem:[#allocation4] sm:$0x1] %vm314_vm8, %v1907_v44 }
0x1864   :  { %v1903_v45 = vpop.permute.xlu0 %1902 }
0x1865   :  { %1905 = vst.msk [vmem:[#allocation3 + $0xf] sm:$0x1] %vm314_vm8, %v1903_v45 }
0x186c   :  { %v1695_v46 = vpop.permute.xlu0 %1694  ;;  %v1911_v47 = vld [vmem:[#allocation3 + $0x8] sm:$0xff] }
0x186d   :  { %1697 = vst.msk [vmem:[#allocation4 + $0x2] sm:$0x1] %vm314_vm8, %v1695_v46  ;;  %2096 = vmatmul.msk.f32.vlgmr.msrb.gmra.mxu3 %vm1922_vm0, %v1911_v47 }
0x1874   :  { %v1916_v48 = vld [vmem:[#allocation4] sm:$0xff] }
0x1875   :  { %2093 = vmatmul.msk.f32.vlgmr.msrb.gmra.mxu0 %vm1922_vm0, %v1916_v48 }
0x1882   :  { %v1949_v49 = vpop.f32.mrf.mxu2 }
0x18f0   :  { %v1978_v50 = vpop.f32.mrf.mxu3 }
0x18f1   :  { %v1979_v51 = vadd.f32 %v1978_v50, %v1949_v49 }
0x18f2   :  { %v1946_v59 = vpop.f32.mrf.mxu0 }
0x18f3   :  { %v1986_v29 = vadd.f32 %v2110_v5, %v1979_v51  ;;  %v1976_v52 = vadd.f32 %v1975_v25, %v1946_v59 }
0x18f5   :  { %v2098_v54 = vmul.f32 -1.442695, %v1986_v29  ;;  %v1985_v53 = vadd.f32 %v2110_v5, %v1976_v52 }
0x18f7   :  { %2303 = vpow2.f32 %v2098_v54  ;;  %v2097_v18 = vmul.f32 -1.442695, %v1985_v53 }
0x18f9   :  { %2305 = vpow2.f32 %v2097_v18 }
0x18fd   :  { %v2304_v55 = vpop.eup %2303 }
0x18fe   :  { %v1994_v56 = vadd.f32 1.0, %v2304_v55 }
0x18ff   :  { %v2306_v6 = vpop.eup %2305 }
0x1900   :  { %2307 = vrcp.f32 %v1994_v56  ;;  %v1993_v7 = vadd.f32 1.0, %v2306_v6  ;;  %v2021_v14 = vand.u32 2147483648, %v1994_v56  ;;  %v2019_v17 = vand.u32 2147483647, %v1994_v56 }
0x1901   :  { %vm2015_vm0 = vweird.f32 %v1994_v56 }
0x1902   :  { %2309 = vrcp.f32 %v1993_v7  ;;  %v2006_v61 = vand.u32 2147483648, %v1993_v7  ;;  %v2022_v58 = vor.u32 1.1754944e-38, %v2021_v14  ;;  %v2004_v1 = vand.u32 2147483647, %v1993_v7 }
0x1903   :  { %vm2020_vm5 = vcmp.eq.f32.partialorder %v2019_v17, 8.507059e+37  ;;  %vm2000_vm6 = vweird.f32 %v1993_v7 }
0x1904   :  { %v2007_v21 = vor.u32 1.1754944e-38, %v2006_v61  ;;  %vm2005_vm10 = vcmp.eq.f32.partialorder %v2004_v1, 8.507059e+37 }
0x1906   :  { %v2308_v10 = vpop.eup %2307 }
0x1907   :  { %v2011_v11 = vmul.f32 %v2308_v10, %v1994_v56  ;;  %vm2016_vm8 = vweird.f32 %v2308_v10 }
0x1908   :  { %v2310_v12 = vpop.eup %2309  ;;  %vm2017_vm3 = vmor %vm2015_vm0, %vm2016_vm8 }
0x1909   :  { %v2012_v13 = vsub.f32 1.0, %v2011_v11  ;;  %v1996_v15 = vmul.f32 %v2310_v12, %v1993_v7  ;;  %vm2001_vm4 = vweird.f32 %v2310_v12 }
0x190a   :  { %vm2002_vm7 = vmor %vm2000_vm6, %vm2001_vm4 }
0x190b   :  { %v2013_v16 = vmul.f32 %v2308_v10, %v2012_v13  ;;  %v1997_v19 = vsub.f32 1.0, %v1996_v15 }
0x190d   :  { %v2014_v60 = vadd.f32 %v2308_v10, %v2013_v16  ;;  %v1998_v63 = vmul.f32 %v2310_v12, %v1997_v19 }
0x190f   :  { %v2018_v8 = vsel %vm2017_vm3, %v2308_v10, %v2014_v60  ;;  %v1999_v20 = vadd.f32 %v2310_v12, %v1998_v63 }
0x1910   :  { %v2023_v0 = vsel %vm2020_vm5, %v2022_v58, %v2018_v8 }
0x1911   :  { %2026 = vst [vmem:[%s3255_s7 + $0x8] sm:$0xff] %v2023_v0  ;;  %v2003_v22 = vsel %vm2002_vm7, %v2310_v12, %v1999_v20 }
0x1912   :  { %v2008_v23 = vsel %vm2005_vm10, %v2007_v21, %v2003_v22 }
0x1913   :  { %2025 = vst [vmem:[%s3255_s7] sm:$0xff] %v2008_v23 }

</bundles_post_ra>
